<compile_context>
chip_gen: v5e
topology: v5e:2x2
jax: 0.10.0
libtpu: 0.0.40
codegen_flags: <defaults>
</compile_context>

<pallas_src>
import functools
import math

import jax
import jax.numpy as jnp
from jax.experimental import pallas as pl
from jax.experimental.pallas import tpu as pltpu


# ------------------------------- in-kernel helpers -------------------------------

def _layernorm(z, g, b):
    # torch LayerNorm: biased variance, eps=1e-5, f32 math
    mu = jnp.mean(z, axis=-1, keepdims=True)
    d = z - mu
    var = jnp.mean(d * d, axis=-1, keepdims=True)
    return d * jax.lax.rsqrt(var + 1e-5) * g + b


def _softmax_lastdim(a):
    a = a - jnp.max(a, axis=-1, keepdims=True)
    e = jnp.exp(a)
    return e * pl.reciprocal(jnp.sum(e, axis=-1, keepdims=True), approx=True)


def _mha(q, k, v, m, h):
    # q, k, v: (S, D) f32 (D = h*dk, heads contiguous along lanes); m: (S,1) f32 or None.
    # Returns lane-dense (S, D) concat of per-head attention outputs.
    S, D = q.shape
    dk = D // h
    scale = 1.0 / math.sqrt(dk)
    outs = []
    for hh in range(h):                               # static in-kernel loop over heads
        sl = slice(hh * dk, (hh + 1) * dk)
        a = jax.lax.dot_general(
            q[:, sl].astype(jnp.bfloat16), k[:, sl].astype(jnp.bfloat16),
            (((1,), (1,)), ((), ())),
            preferred_element_type=jnp.float32) * scale          # (S, S)
        if m is not None:
            a = a * m                                  # pre-softmax query-row mask
        p = _softmax_lastdim(a)
        outs.append(jnp.dot(p.astype(jnp.bfloat16), v[:, sl].astype(jnp.bfloat16),
                            preferred_element_type=jnp.float32))  # (S, dk)
    return jnp.concatenate(outs, axis=-1)              # (S, D)


def _bf16_matmul(x, w):
    return jnp.dot(x.astype(jnp.bfloat16), w, preferred_element_type=jnp.float32)


# ------------------------------- Pallas kernels -------------------------------

def _encoder_stack_kernel(x_ref, m_ref, wqkv_ref, wo_ref, bo_ref,
                          w1_ref, b1_ref, w2_ref, b2_ref, g_ref, b_ref,
                          hs_ref, *, h, L):
    # x: (1,S,D) f32; m: (1,S,1) f32; stacked weights lead with layer dim L.
    # hs: (L,1,S,D) f32 -- hidden state emitted after every encoder layer.
    x = x_ref[0]
    m = m_ref[0]
    D = x.shape[-1]
    for j in range(L):                                 # static loop over layers
        qkv = _bf16_matmul(x, wqkv_ref[j])                           # (S, 3D)
        y = _mha(qkv[:, :D], qkv[:, D:2 * D], qkv[:, 2 * D:], m, h)  # (S, D)
        attn = _bf16_matmul(y, wo_ref[j]) + bo_ref[j]
        y2 = _layernorm(attn + x, g_ref[j], b_ref[j])
        h1 = jnp.maximum(_bf16_matmul(y2, w1_ref[j]) + b1_ref[j], 0.0)
        mlp = _bf16_matmul(h1, w2_ref[j]) + b2_ref[j]
        x = _layernorm(mlp + y2, g_ref[j], b_ref[j])
        hs_ref[j, 0] = x


def _decoder_step_kernel(seq_ref, m_ref, enc_ref,
                         m_wqkv_ref, m_wo_ref, m_bo_ref,
                         c_wqk_ref, c_wv_ref, c_wo_ref, c_bo_ref,
                         w1_ref, b1_ref, w2_ref, b2_ref, g_ref, b_ref,
                         ow_ref, ob_ref, probs_ref, *, h, L):
    # One full autoregressive decode step (all decoder layers + output head + softmax).
    x = seq_ref[0]                                     # (S, D)
    m = m_ref[0]                                       # (S, 1)
    D = x.shape[-1]
    for j in range(L):                                 # static loop over layers
        # masked self-attention + residual + LN
        qkv = _bf16_matmul(x, m_wqkv_ref[j])                              # (S, 3D)
        y = _mha(qkv[:, :D], qkv[:, D:2 * D], qkv[:, 2 * D:], m, h)
        attn = _bf16_matmul(y, m_wo_ref[j]) + m_bo_ref[j]
        y2 = _layernorm(attn + x, g_ref[j], b_ref[j])
        # cross-attention: torch wiring multi_head_attention(v=y2, k=x1, q=x1); residual = y2
        x1 = enc_ref[j, 0]                             # encoder hidden state (S, D)
        qk = _bf16_matmul(x1, c_wqk_ref[j])                               # (S, 2D)
        v = _bf16_matmul(y2, c_wv_ref[j])                                 # (S, D)
        yc = _mha(qk[:, :D], qk[:, D:], v, None, h)
        attn_c = _bf16_matmul(yc, c_wo_ref[j]) + c_bo_ref[j]
        y5 = _layernorm(attn_c + y2, g_ref[j], b_ref[j])
        # MLP + residual + LN
        h1 = jnp.maximum(_bf16_matmul(y5, w1_ref[j]) + b1_ref[j], 0.0)
        mlp = _bf16_matmul(h1, w2_ref[j]) + b2_ref[j]
        x = _layernorm(mlp + y5, g_ref[j], b_ref[j])
    # tied output head + final softmax
    # TODO(synk): vocab dim (V=16) < 128 lanes -> masked stores; kept exact to preserve shape.
    logits = _bf16_matmul(x, ow_ref[...]) + ob_ref[...]
    probs_ref[0] = _softmax_lastdim(logits)


# ------------------------------- Pallas wrappers -------------------------------

_PAR = pltpu.CompilerParams(dimension_semantics=("parallel",))


def _full_spec(shape):
    # whole-array block, constant across the batch grid (stays resident in VMEM)
    return pl.BlockSpec(shape, lambda b, n=len(shape): (0,) * n)


def run_encoder_stack(x, mask, ew, h):
    B, S, D = x.shape
    L = ew['wqkv'].shape[0]
    H4 = ew['w1'].shape[-1]
    m3 = mask.astype(jnp.float32).reshape(B, S, 1)
    return pl.pallas_call(
        functools.partial(_encoder_stack_kernel, h=h, L=L),
        out_shape=jax.ShapeDtypeStruct((L, B, S, D), jnp.float32),
        grid=(B,),
        in_specs=[
            pl.BlockSpec((1, S, D), lambda b: (b, 0, 0)),
            pl.BlockSpec((1, S, 1), lambda b: (b, 0, 0)),
            _full_spec((L, D, 3 * D)),
            _full_spec((L, D, D)),
            _full_spec((L, 1, D)),
            _full_spec((L, D, H4)),
            _full_spec((L, 1, H4)),
            _full_spec((L, H4, D)),
            _full_spec((L, 1, D)),
            _full_spec((L, 1, D)),
            _full_spec((L, 1, D)),
        ],
        out_specs=pl.BlockSpec((L, 1, S, D), lambda b: (0, b, 0, 0)),
        compiler_params=_PAR,
    )(x, m3, ew['wqkv'], ew['wo'], ew['bo'],
      ew['w1'], ew['b1'], ew['w2'], ew['b2'], ew['g'], ew['b'])


def run_decoder_step(seq, mask_b, enc_hs, dw, out_w, out_b, h):
    B, S, D = seq.shape
    L = enc_hs.shape[0]
    V = out_w.shape[-1]
    H4 = dw['w1'].shape[-1]
    m3 = mask_b.astype(jnp.float32).reshape(B, S, 1)
    return pl.pallas_call(
        functools.partial(_decoder_step_kernel, h=h, L=L),
        out_shape=jax.ShapeDtypeStruct((B, S, V), jnp.float32),
        grid=(B,),
        in_specs=[
            pl.BlockSpec((1, S, D), lambda b: (b, 0, 0)),
            pl.BlockSpec((1, S, 1), lambda b: (b, 0, 0)),
            pl.BlockSpec((L, 1, S, D), lambda b: (0, b, 0, 0)),
            _full_spec((L, D, 3 * D)),
            _full_spec((L, D, D)),
            _full_spec((L, 1, D)),
            _full_spec((L, D, 2 * D)),
            _full_spec((L, D, D)),
            _full_spec((L, D, D)),
            _full_spec((L, 1, D)),
            _full_spec((L, D, H4)),
            _full_spec((L, 1, H4)),
            _full_spec((L, H4, D)),
            _full_spec((L, 1, D)),
            _full_spec((L, 1, D)),
            _full_spec((L, 1, D)),
            _full_spec((D, V)),
            _full_spec((1, V)),
        ],
        out_specs=pl.BlockSpec((1, S, V), lambda b: (b, 0, 0)),
        compiler_params=_PAR,
    )(seq, m3, enc_hs,
      dw['m_wqkv'], dw['m_wo'], dw['m_bo'],
      dw['c_wqk'], dw['c_wv'], dw['c_wo'], dw['c_bo'],
      dw['w1'], dw['b1'], dw['w2'], dw['b2'], dw['g'], dw['b'],
      out_w, out_b)


# ------------------------------- Model pieces -------------------------------

def position_embeddings(S, D):
    pos = jnp.arange(S, dtype=jnp.float32)
    i = jnp.arange(D // 2, dtype=jnp.float32)
    denom = jnp.power(10000.0, (2.0 * i) / D)          # 10000^(2i/d_model)
    ang = pos[:, None] / denom[None, :]
    pe = jnp.zeros((S, D), jnp.float32)
    pe = pe.at[:, 0::2].set(jnp.sin(ang))
    pe = pe.at[:, 1::2].set(jnp.cos(ang))              # cosine uses exponent 2i too
    return pe


@functools.partial(jax.jit, static_argnames=("h",))
def transformer_forward_eval(params, input_ids, input_mask, *, h):
    B, S = input_ids.shape
    V, D = params['emb'].shape
    factor = math.sqrt(D)

    pos = position_embeddings(S, D)[None]              # (1, S, D)
    x = params['emb'][input_ids] * factor + pos        # dropout = identity (eval)

    mask_f = input_mask.astype(jnp.float32)
    enc_hs = run_encoder_stack(x, mask_f, params['enc'], h)    # (L, B, S, D)

    output_ids = input_ids.astype(jnp.int32)
    output_probs = jax.nn.one_hot(output_ids, V, dtype=jnp.float32)
    output_ids = output_ids.at[:, 1:].set(0)
    output_probs = output_probs.at[:, 1:, :].set(0.0)

    ii = jnp.arange(S - 1)[:, None]
    jj = jnp.arange(S)[None, :]
    output_masks = (ii >= jj).astype(jnp.float32)      # triu(ones(S,S-1)).T
    update_masks = (jj == ii + 1).astype(jnp.float32)  # triu(.).flip([0,1])

    emb = params['emb']
    dw = params['dec']
    out_w = params['out_w']
    out_b = params['out_b']

    def step(i, carry):
        out_ids, out_probs = carry
        om = output_masks[i - 1]                       # (S,)
        um = update_masks[i - 1]                       # (S,)
        om_b = jnp.broadcast_to(om[None, :], (B, S))
        known = emb[out_ids] * factor * om_b[..., None]
        seq = known + pos
        probs = run_decoder_step(seq, om_b, enc_hs, dw, out_w, out_b, h)   # (B, S, V)
        out_probs = out_probs + um[None, :, None] * probs
        out_ids = out_ids + (um[None, :] *
                             out_probs.argmax(axis=-1).astype(jnp.float32)).astype(jnp.int32)
        return out_ids, out_probs

    output_ids, output_probs = jax.lax.fori_loop(1, S, step, (output_ids, output_probs))
    return output_probs, output_ids


# ------------------------------- Parameter init -------------------------------

def init_params(key, d_model, h, l, num_tokens):
    dh = 4 * d_model
    keys = jax.random.split(key, 20)

    def glorot(k, shape):
        std = math.sqrt(2.0 / (shape[-2] + shape[-1]))
        return std * jax.random.normal(k, shape, jnp.float32)

    enc = {
        'wqkv': glorot(keys[0], (l, d_model, 3 * d_model)).astype(jnp.bfloat16),
        'wo':   glorot(keys[1], (l, d_model, d_model)).astype(jnp.bfloat16),
        'bo':   jnp.zeros((l, 1, d_model), jnp.float32),
        'w1':   glorot(keys[2], (l, d_model, dh)).astype(jnp.bfloat16),
        'b1':   0.01 * jax.random.normal(keys[3], (l, 1, dh), jnp.float32),
        'w2':   glorot(keys[4], (l, dh, d_model)).astype(jnp.bfloat16),
        'b2':   0.01 * jax.random.normal(keys[5], (l, 1, d_model), jnp.float32),
        'g':    jnp.ones((l, 1, d_model), jnp.float32),
        'b':    jnp.zeros((l, 1, d_model), jnp.float32),
    }
    dec = {
        'm_wqkv': glorot(keys[6], (l, d_model, 3 * d_model)).astype(jnp.bfloat16),
        'm_wo':   glorot(keys[7], (l, d_model, d_model)).astype(jnp.bfloat16),
        'm_bo':   jnp.zeros((l, 1, d_model), jnp.float32),
        'c_wqk':  glorot(keys[8], (l, d_model, 2 * d_model)).astype(jnp.bfloat16),
        'c_wv':   glorot(keys[9], (l, d_model, d_model)).astype(jnp.bfloat16),
        'c_wo':   glorot(keys[10], (l, d_model, d_model)).astype(jnp.bfloat16),
        'c_bo':   jnp.zeros((l, 1, d_model), jnp.float32),
        'w1':     glorot(keys[11], (l, d_model, dh)).astype(jnp.bfloat16),
        'b1':     0.01 * jax.random.normal(keys[12], (l, 1, dh), jnp.float32),
        'w2':     glorot(keys[13], (l, dh, d_model)).astype(jnp.bfloat16),
        'b2':     0.01 * jax.random.normal(keys[14], (l, 1, d_model), jnp.float32),
        'g':      jnp.ones((l, 1, d_model), jnp.float32),
        'b':      jnp.zeros((l, 1, d_model), jnp.float32),
    }
    W = glorot(keys[15], (num_tokens, d_model))        # linear.weight == token embedding (tied)
    b = 0.01 * jax.random.normal(keys[16], (num_tokens,), jnp.float32)
    return {
        'enc': enc, 'dec': dec,
        'emb': W,                                      # f32 for the gather lookup
        'out_w': W.T.astype(jnp.bfloat16),             # tied head, bf16 matmul operand
        'out_b': b.reshape(1, num_tokens),
    }


# ------------------------------- main -------------------------------

if __name__ == "__main__":
    d_model, h, l, num_tokens = 32, 4, 2, 16
    B, S = 2, 8

    key = jax.random.PRNGKey(0)
    pkey, ikey = jax.random.split(key)
    params = init_params(pkey, d_model, h, l, num_tokens)

    input_ids = jax.random.randint(ikey, (B, S), 0, num_tokens, dtype=jnp.int32)
    input_mask = jnp.ones((B, S), jnp.float32)

    probs, ids = transformer_forward_eval(params, input_ids, input_mask, h=h)
    probs, ids = jax.block_until_ready((probs, ids))

    assert probs.shape == (B, S, num_tokens)
    assert ids.shape == (B, S)
    assert bool(jnp.all(jnp.isfinite(probs)))
    print("KERNEL_OK")
</pallas_src>

<mosaic_0001>
module attributes {stable_mosaic.version = 11 : i64} {
  func.func @_encoder_stack_kernel(%arg0: i32, %arg1: memref<1x8x32xf32, #tpu.memory_space<vmem>>, %arg2: memref<1x8x1xf32, #tpu.memory_space<vmem>>, %arg3: memref<2x32x96xbf16, #tpu.memory_space<vmem>>, %arg4: memref<2x32x32xbf16, #tpu.memory_space<vmem>>, %arg5: memref<2x1x32xf32, #tpu.memory_space<vmem>>, %arg6: memref<2x32x128xbf16, #tpu.memory_space<vmem>>, %arg7: memref<2x1x128xf32, #tpu.memory_space<vmem>>, %arg8: memref<2x128x32xbf16, #tpu.memory_space<vmem>>, %arg9: memref<2x1x32xf32, #tpu.memory_space<vmem>>, %arg10: memref<2x1x32xf32, #tpu.memory_space<vmem>>, %arg11: memref<2x1x32xf32, #tpu.memory_space<vmem>>, %arg12: memref<2x1x8x32xf32, #tpu.memory_space<vmem>>) attributes {dimension_semantics = [#tpu.dimension_semantics<parallel>], iteration_bounds = array<i64: 2>, scalar_prefetch = 0 : i64, scratch_operands = 0 : i64, tpu.core_type = #tpu.core_type<tc>, window_params = [{transform_indices = @transform_0, window_bounds = array<i64: 1, 8, 32>}, {transform_indices = @transform_1, window_bounds = array<i64: 1, 8, 1>}, {pipeline_mode = #tpu.pipeline_mode<synchronous>, transform_indices = @transform_2, window_bounds = array<i64: 2, 32, 96>}, {pipeline_mode = #tpu.pipeline_mode<synchronous>, transform_indices = @transform_3, window_bounds = array<i64: 2, 32, 32>}, {pipeline_mode = #tpu.pipeline_mode<synchronous>, transform_indices = @transform_4, window_bounds = array<i64: 2, 1, 32>}, {pipeline_mode = #tpu.pipeline_mode<synchronous>, transform_indices = @transform_5, window_bounds = array<i64: 2, 32, 128>}, {pipeline_mode = #tpu.pipeline_mode<synchronous>, transform_indices = @transform_6, window_bounds = array<i64: 2, 1, 128>}, {pipeline_mode = #tpu.pipeline_mode<synchronous>, transform_indices = @transform_7, window_bounds = array<i64: 2, 128, 32>}, {pipeline_mode = #tpu.pipeline_mode<synchronous>, transform_indices = @transform_8, window_bounds = array<i64: 2, 1, 32>}, {pipeline_mode = #tpu.pipeline_mode<synchronous>, transform_indices = @transform_9, window_bounds = array<i64: 2, 1, 32>}, {pipeline_mode = #tpu.pipeline_mode<synchronous>, transform_indices = @transform_10, window_bounds = array<i64: 2, 1, 32>}, {transform_indices = @transform_11, window_bounds = array<i64: 2, 1, 8, 32>}]} {
    %c0 = arith.constant 0 : index
    %c0_0 = arith.constant 0 : index
    %c0_1 = arith.constant 0 : index
    %0 = vector.load %arg1[%c0, %c0_0, %c0_1] : memref<1x8x32xf32, #tpu.memory_space<vmem>>, vector<1x8x32xf32>
    %1 = vector.shape_cast %0 : vector<1x8x32xf32> to vector<8x32xf32>
    %c0_2 = arith.constant 0 : index
    %c0_3 = arith.constant 0 : index
    %c0_4 = arith.constant 0 : index
    %2 = vector.load %arg2[%c0_2, %c0_3, %c0_4] : memref<1x8x1xf32, #tpu.memory_space<vmem>>, vector<1x8x1xf32>
    %3 = vector.shape_cast %2 : vector<1x8x1xf32> to vector<8x1xf32>
    %c0_5 = arith.constant 0 : index
    %c0_6 = arith.constant 0 : index
    %c0_7 = arith.constant 0 : index
    %4 = vector.load %arg3[%c0_5, %c0_6, %c0_7] : memref<2x32x96xbf16, #tpu.memory_space<vmem>>, vector<1x32x96xbf16>
    %5 = vector.shape_cast %4 : vector<1x32x96xbf16> to vector<32x96xbf16>
    %6 = arith.truncf %1 : vector<8x32xf32> to vector<8x32xbf16>
    %cst = arith.constant dense<0.000000e+00> : vector<8x96xf32>
    %7 = tpu.matmul %6, %5, %cst {dimension_numbers = #tpu.dot_dimension_numbers<[1], [0], [0], [1], [0, 0, 1, 1], [], []>} : vector<8x32xbf16>, vector<32x96xbf16>, vector<8x96xf32> -> vector<8x96xf32>
    %8 = vector.extract_strided_slice %7 {offsets = [0, 0], sizes = [8, 32], strides = [1, 1]} : vector<8x96xf32> to vector<8x32xf32>
    %9 = vector.extract_strided_slice %7 {offsets = [0, 32], sizes = [8, 32], strides = [1, 1]} : vector<8x96xf32> to vector<8x32xf32>
    %10 = vector.extract_strided_slice %7 {offsets = [0, 64], sizes = [8, 32], strides = [1, 1]} : vector<8x96xf32> to vector<8x32xf32>
    %11 = vector.extract_strided_slice %8 {offsets = [0, 0], sizes = [8, 8], strides = [1, 1]} : vector<8x32xf32> to vector<8x8xf32>
    %12 = arith.truncf %11 : vector<8x8xf32> to vector<8x8xbf16>
    %13 = vector.extract_strided_slice %9 {offsets = [0, 0], sizes = [8, 8], strides = [1, 1]} : vector<8x32xf32> to vector<8x8xf32>
    %14 = arith.truncf %13 : vector<8x8xf32> to vector<8x8xbf16>
    %cst_8 = arith.constant dense<0.000000e+00> : vector<8x8xf32>
    %15 = tpu.matmul %12, %14, %cst_8 {dimension_numbers = #tpu.dot_dimension_numbers<[1], [1], [0], [0], [0, 0, 1, 0], [], []>} : vector<8x8xbf16>, vector<8x8xbf16>, vector<8x8xf32> -> vector<8x8xf32>
    %cst_9 = arith.constant 0.353553385 : f32
    %16 = vector.broadcast %cst_9 : f32 to vector<8x8xf32>
    %17 = arith.mulf %15, %16 : vector<8x8xf32>
    %18 = vector.broadcast %3 : vector<8x1xf32> to vector<8x8xf32>
    %19 = arith.mulf %17, %18 : vector<8x8xf32>
    %cst_10 = arith.constant dense<0xFF800000> : vector<8xf32>
    %20 = vector.multi_reduction <maximumf>, %19, %cst_10 [1] : vector<8x8xf32> to vector<8xf32>
    %21 = vector.shape_cast %20 : vector<8xf32> to vector<8x1xf32>
    %22 = vector.broadcast %21 : vector<8x1xf32> to vector<8x8xf32>
    %23 = arith.subf %19, %22 : vector<8x8xf32>
    %24 = math.exp %23 : vector<8x8xf32>
    %cst_11 = arith.constant dense<0.000000e+00> : vector<8xf32>
    %25 = vector.multi_reduction <add>, %24, %cst_11 [1] : vector<8x8xf32> to vector<8xf32>
    %26 = vector.shape_cast %25 : vector<8xf32> to vector<8x1xf32>
    %27 = tpu.reciprocal %26 {approx = true} : vector<8x1xf32> -> vector<8x1xf32>
    %28 = vector.broadcast %27 : vector<8x1xf32> to vector<8x8xf32>
    %29 = arith.mulf %24, %28 : vector<8x8xf32>
    %30 = arith.truncf %29 : vector<8x8xf32> to vector<8x8xbf16>
    %31 = vector.extract_strided_slice %10 {offsets = [0, 0], sizes = [8, 8], strides = [1, 1]} : vector<8x32xf32> to vector<8x8xf32>
    %32 = arith.truncf %31 : vector<8x8xf32> to vector<8x8xbf16>
    %cst_12 = arith.constant dense<0.000000e+00> : vector<8x8xf32>
    %33 = tpu.matmul %30, %32, %cst_12 {dimension_numbers = #tpu.dot_dimension_numbers<[1], [0], [0], [1], [0, 0, 1, 1], [], []>} : vector<8x8xbf16>, vector<8x8xbf16>, vector<8x8xf32> -> vector<8x8xf32>
    %34 = vector.extract_strided_slice %8 {offsets = [0, 8], sizes = [8, 8], strides = [1, 1]} : vector<8x32xf32> to vector<8x8xf32>
    %35 = arith.truncf %34 : vector<8x8xf32> to vector<8x8xbf16>
    %36 = vector.extract_strided_slice %9 {offsets = [0, 8], sizes = [8, 8], strides = [1, 1]} : vector<8x32xf32> to vector<8x8xf32>
    %37 = arith.truncf %36 : vector<8x8xf32> to vector<8x8xbf16>
    %cst_13 = arith.constant dense<0.000000e+00> : vector<8x8xf32>
    %38 = tpu.matmul %35, %37, %cst_13 {dimension_numbers = #tpu.dot_dimension_numbers<[1], [1], [0], [0], [0, 0, 1, 0], [], []>} : vector<8x8xbf16>, vector<8x8xbf16>, vector<8x8xf32> -> vector<8x8xf32>
    %cst_14 = arith.constant 0.353553385 : f32
    %39 = vector.broadcast %cst_14 : f32 to vector<8x8xf32>
    %40 = arith.mulf %38, %39 : vector<8x8xf32>
    %41 = vector.broadcast %3 : vector<8x1xf32> to vector<8x8xf32>
    %42 = arith.mulf %40, %41 : vector<8x8xf32>
    %cst_15 = arith.constant dense<0xFF800000> : vector<8xf32>
    %43 = vector.multi_reduction <maximumf>, %42, %cst_15 [1] : vector<8x8xf32> to vector<8xf32>
    %44 = vector.shape_cast %43 : vector<8xf32> to vector<8x1xf32>
    %45 = vector.broadcast %44 : vector<8x1xf32> to vector<8x8xf32>
    %46 = arith.subf %42, %45 : vector<8x8xf32>
    %47 = math.exp %46 : vector<8x8xf32>
    %cst_16 = arith.constant dense<0.000000e+00> : vector<8xf32>
    %48 = vector.multi_reduction <add>, %47, %cst_16 [1] : vector<8x8xf32> to vector<8xf32>
    %49 = vector.shape_cast %48 : vector<8xf32> to vector<8x1xf32>
    %50 = tpu.reciprocal %49 {approx = true} : vector<8x1xf32> -> vector<8x1xf32>
    %51 = vector.broadcast %50 : vector<8x1xf32> to vector<8x8xf32>
    %52 = arith.mulf %47, %51 : vector<8x8xf32>
    %53 = arith.truncf %52 : vector<8x8xf32> to vector<8x8xbf16>
    %54 = vector.extract_strided_slice %10 {offsets = [0, 8], sizes = [8, 8], strides = [1, 1]} : vector<8x32xf32> to vector<8x8xf32>
    %55 = arith.truncf %54 : vector<8x8xf32> to vector<8x8xbf16>
    %cst_17 = arith.constant dense<0.000000e+00> : vector<8x8xf32>
    %56 = tpu.matmul %53, %55, %cst_17 {dimension_numbers = #tpu.dot_dimension_numbers<[1], [0], [0], [1], [0, 0, 1, 1], [], []>} : vector<8x8xbf16>, vector<8x8xbf16>, vector<8x8xf32> -> vector<8x8xf32>
    %57 = vector.extract_strided_slice %8 {offsets = [0, 16], sizes = [8, 8], strides = [1, 1]} : vector<8x32xf32> to vector<8x8xf32>
    %58 = arith.truncf %57 : vector<8x8xf32> to vector<8x8xbf16>
    %59 = vector.extract_strided_slice %9 {offsets = [0, 16], sizes = [8, 8], strides = [1, 1]} : vector<8x32xf32> to vector<8x8xf32>
    %60 = arith.truncf %59 : vector<8x8xf32> to vector<8x8xbf16>
    %cst_18 = arith.constant dense<0.000000e+00> : vector<8x8xf32>
    %61 = tpu.matmul %58, %60, %cst_18 {dimension_numbers = #tpu.dot_dimension_numbers<[1], [1], [0], [0], [0, 0, 1, 0], [], []>} : vector<8x8xbf16>, vector<8x8xbf16>, vector<8x8xf32> -> vector<8x8xf32>
    %cst_19 = arith.constant 0.353553385 : f32
    %62 = vector.broadcast %cst_19 : f32 to vector<8x8xf32>
    %63 = arith.mulf %61, %62 : vector<8x8xf32>
    %64 = vector.broadcast %3 : vector<8x1xf32> to vector<8x8xf32>
    %65 = arith.mulf %63, %64 : vector<8x8xf32>
    %cst_20 = arith.constant dense<0xFF800000> : vector<8xf32>
    %66 = vector.multi_reduction <maximumf>, %65, %cst_20 [1] : vector<8x8xf32> to vector<8xf32>
    %67 = vector.shape_cast %66 : vector<8xf32> to vector<8x1xf32>
    %68 = vector.broadcast %67 : vector<8x1xf32> to vector<8x8xf32>
    %69 = arith.subf %65, %68 : vector<8x8xf32>
    %70 = math.exp %69 : vector<8x8xf32>
    %cst_21 = arith.constant dense<0.000000e+00> : vector<8xf32>
    %71 = vector.multi_reduction <add>, %70, %cst_21 [1] : vector<8x8xf32> to vector<8xf32>
    %72 = vector.shape_cast %71 : vector<8xf32> to vector<8x1xf32>
    %73 = tpu.reciprocal %72 {approx = true} : vector<8x1xf32> -> vector<8x1xf32>
    %74 = vector.broadcast %73 : vector<8x1xf32> to vector<8x8xf32>
    %75 = arith.mulf %70, %74 : vector<8x8xf32>
    %76 = arith.truncf %75 : vector<8x8xf32> to vector<8x8xbf16>
    %77 = vector.extract_strided_slice %10 {offsets = [0, 16], sizes = [8, 8], strides = [1, 1]} : vector<8x32xf32> to vector<8x8xf32>
    %78 = arith.truncf %77 : vector<8x8xf32> to vector<8x8xbf16>
    %cst_22 = arith.constant dense<0.000000e+00> : vector<8x8xf32>
    %79 = tpu.matmul %76, %78, %cst_22 {dimension_numbers = #tpu.dot_dimension_numbers<[1], [0], [0], [1], [0, 0, 1, 1], [], []>} : vector<8x8xbf16>, vector<8x8xbf16>, vector<8x8xf32> -> vector<8x8xf32>
    %80 = vector.extract_strided_slice %8 {offsets = [0, 24], sizes = [8, 8], strides = [1, 1]} : vector<8x32xf32> to vector<8x8xf32>
    %81 = arith.truncf %80 : vector<8x8xf32> to vector<8x8xbf16>
    %82 = vector.extract_strided_slice %9 {offsets = [0, 24], sizes = [8, 8], strides = [1, 1]} : vector<8x32xf32> to vector<8x8xf32>
    %83 = arith.truncf %82 : vector<8x8xf32> to vector<8x8xbf16>
    %cst_23 = arith.constant dense<0.000000e+00> : vector<8x8xf32>
    %84 = tpu.matmul %81, %83, %cst_23 {dimension_numbers = #tpu.dot_dimension_numbers<[1], [1], [0], [0], [0, 0, 1, 0], [], []>} : vector<8x8xbf16>, vector<8x8xbf16>, vector<8x8xf32> -> vector<8x8xf32>
    %cst_24 = arith.constant 0.353553385 : f32
    %85 = vector.broadcast %cst_24 : f32 to vector<8x8xf32>
    %86 = arith.mulf %84, %85 : vector<8x8xf32>
    %87 = vector.broadcast %3 : vector<8x1xf32> to vector<8x8xf32>
    %88 = arith.mulf %86, %87 : vector<8x8xf32>
    %cst_25 = arith.constant dense<0xFF800000> : vector<8xf32>
    %89 = vector.multi_reduction <maximumf>, %88, %cst_25 [1] : vector<8x8xf32> to vector<8xf32>
    %90 = vector.shape_cast %89 : vector<8xf32> to vector<8x1xf32>
    %91 = vector.broadcast %90 : vector<8x1xf32> to vector<8x8xf32>
    %92 = arith.subf %88, %91 : vector<8x8xf32>
    %93 = math.exp %92 : vector<8x8xf32>
    %cst_26 = arith.constant dense<0.000000e+00> : vector<8xf32>
    %94 = vector.multi_reduction <add>, %93, %cst_26 [1] : vector<8x8xf32> to vector<8xf32>
    %95 = vector.shape_cast %94 : vector<8xf32> to vector<8x1xf32>
    %96 = tpu.reciprocal %95 {approx = true} : vector<8x1xf32> -> vector<8x1xf32>
    %97 = vector.broadcast %96 : vector<8x1xf32> to vector<8x8xf32>
    %98 = arith.mulf %93, %97 : vector<8x8xf32>
    %99 = arith.truncf %98 : vector<8x8xf32> to vector<8x8xbf16>
    %100 = vector.extract_strided_slice %10 {offsets = [0, 24], sizes = [8, 8], strides = [1, 1]} : vector<8x32xf32> to vector<8x8xf32>
    %101 = arith.truncf %100 : vector<8x8xf32> to vector<8x8xbf16>
    %cst_27 = arith.constant dense<0.000000e+00> : vector<8x8xf32>
    %102 = tpu.matmul %99, %101, %cst_27 {dimension_numbers = #tpu.dot_dimension_numbers<[1], [0], [0], [1], [0, 0, 1, 1], [], []>} : vector<8x8xbf16>, vector<8x8xbf16>, vector<8x8xf32> -> vector<8x8xf32>
    %103 = tpu.concatenate %33, %56, %79, %102 in 1 : vector<8x8xf32>, vector<8x8xf32>, vector<8x8xf32>, vector<8x8xf32> -> vector<8x32xf32>
    %c0_28 = arith.constant 0 : index
    %c0_29 = arith.constant 0 : index
    %c0_30 = arith.constant 0 : index
    %104 = vector.load %arg4[%c0_28, %c0_29, %c0_30] : memref<2x32x32xbf16, #tpu.memory_space<vmem>>, vector<1x32x32xbf16>
    %105 = vector.shape_cast %104 : vector<1x32x32xbf16> to vector<32x32xbf16>
    %106 = arith.truncf %103 : vector<8x32xf32> to vector<8x32xbf16>
    %cst_31 = arith.constant dense<0.000000e+00> : vector<8x32xf32>
    %107 = tpu.matmul %106, %105, %cst_31 {dimension_numbers = #tpu.dot_dimension_numbers<[1], [0], [0], [1], [0, 0, 1, 1], [], []>} : vector<8x32xbf16>, vector<32x32xbf16>, vector<8x32xf32> -> vector<8x32xf32>
    %c0_32 = arith.constant 0 : index
    %c0_33 = arith.constant 0 : index
    %c0_34 = arith.constant 0 : index
    %108 = vector.load %arg5[%c0_32, %c0_33, %c0_34] : memref<2x1x32xf32, #tpu.memory_space<vmem>>, vector<1x1x32xf32>
    %109 = vector.shape_cast %108 : vector<1x1x32xf32> to vector<1x32xf32>
    %110 = vector.broadcast %109 : vector<1x32xf32> to vector<8x32xf32>
    %111 = arith.addf %107, %110 : vector<8x32xf32>
    %112 = arith.addf %111, %1 : vector<8x32xf32>
    %c0_35 = arith.constant 0 : index
    %c0_36 = arith.constant 0 : index
    %c0_37 = arith.constant 0 : index
    %113 = vector.load %arg10[%c0_35, %c0_36, %c0_37] : memref<2x1x32xf32, #tpu.memory_space<vmem>>, vector<1x1x32xf32>
    %114 = vector.shape_cast %113 : vector<1x1x32xf32> to vector<1x32xf32>
    %c0_38 = arith.constant 0 : index
    %c0_39 = arith.constant 0 : index
    %c0_40 = arith.constant 0 : index
    %115 = vector.load %arg11[%c0_38, %c0_39, %c0_40] : memref<2x1x32xf32, #tpu.memory_space<vmem>>, vector<1x1x32xf32>
    %116 = vector.shape_cast %115 : vector<1x1x32xf32> to vector<1x32xf32>
    %cst_41 = arith.constant dense<0.000000e+00> : vector<8xf32>
    %117 = vector.multi_reduction <add>, %112, %cst_41 [1] : vector<8x32xf32> to vector<8xf32>
    %118 = vector.shape_cast %117 : vector<8xf32> to vector<8x1xf32>
    %cst_42 = arith.constant 3.200000e+01 : f32
    %119 = vector.broadcast %cst_42 : f32 to vector<8x1xf32>
    %120 = arith.divf %118, %119 : vector<8x1xf32>
    %121 = vector.broadcast %120 : vector<8x1xf32> to vector<8x32xf32>
    %122 = arith.subf %112, %121 : vector<8x32xf32>
    %123 = arith.mulf %122, %122 : vector<8x32xf32>
    %cst_43 = arith.constant dense<0.000000e+00> : vector<8xf32>
    %124 = vector.multi_reduction <add>, %123, %cst_43 [1] : vector<8x32xf32> to vector<8xf32>
    %125 = vector.shape_cast %124 : vector<8xf32> to vector<8x1xf32>
    %cst_44 = arith.constant 3.200000e+01 : f32
    %126 = vector.broadcast %cst_44 : f32 to vector<8x1xf32>
    %127 = arith.divf %125, %126 : vector<8x1xf32>
    %cst_45 = arith.constant 9.99999974E-6 : f32
    %128 = vector.broadcast %cst_45 : f32 to vector<8x1xf32>
    %129 = arith.addf %127, %128 : vector<8x1xf32>
    %130 = math.rsqrt %129 : vector<8x1xf32>
    %131 = vector.broadcast %130 : vector<8x1xf32> to vector<8x32xf32>
    %132 = arith.mulf %122, %131 : vector<8x32xf32>
    %133 = vector.broadcast %114 : vector<1x32xf32> to vector<8x32xf32>
    %134 = arith.mulf %132, %133 : vector<8x32xf32>
    %135 = vector.broadcast %116 : vector<1x32xf32> to vector<8x32xf32>
    %136 = arith.addf %134, %135 : vector<8x32xf32>
    %c0_46 = arith.constant 0 : index
    %c0_47 = arith.constant 0 : index
    %c0_48 = arith.constant 0 : index
    %137 = vector.load %arg6[%c0_46, %c0_47, %c0_48] : memref<2x32x128xbf16, #tpu.memory_space<vmem>>, vector<1x32x128xbf16>
    %138 = vector.shape_cast %137 : vector<1x32x128xbf16> to vector<32x128xbf16>
    %139 = arith.truncf %136 : vector<8x32xf32> to vector<8x32xbf16>
    %cst_49 = arith.constant dense<0.000000e+00> : vector<8x128xf32>
    %140 = tpu.matmul %139, %138, %cst_49 {dimension_numbers = #tpu.dot_dimension_numbers<[1], [0], [0], [1], [0, 0, 1, 1], [], []>} : vector<8x32xbf16>, vector<32x128xbf16>, vector<8x128xf32> -> vector<8x128xf32>
    %c0_50 = arith.constant 0 : index
    %c0_51 = arith.constant 0 : index
    %c0_52 = arith.constant 0 : index
    %141 = vector.load %arg7[%c0_50, %c0_51, %c0_52] : memref<2x1x128xf32, #tpu.memory_space<vmem>>, vector<1x1x128xf32>
    %142 = vector.shape_cast %141 : vector<1x1x128xf32> to vector<1x128xf32>
    %143 = vector.broadcast %142 : vector<1x128xf32> to vector<8x128xf32>
    %144 = arith.addf %140, %143 : vector<8x128xf32>
    %cst_53 = arith.constant 0.000000e+00 : f32
    %145 = vector.broadcast %cst_53 : f32 to vector<8x128xf32>
    %146 = arith.maximumf %144, %145 : vector<8x128xf32>
    %c0_54 = arith.constant 0 : index
    %c0_55 = arith.constant 0 : index
    %c0_56 = arith.constant 0 : index
    %147 = vector.load %arg8[%c0_54, %c0_55, %c0_56] : memref<2x128x32xbf16, #tpu.memory_space<vmem>>, vector<1x128x32xbf16>
    %148 = vector.shape_cast %147 : vector<1x128x32xbf16> to vector<128x32xbf16>
    %149 = arith.truncf %146 : vector<8x128xf32> to vector<8x128xbf16>
    %cst_57 = arith.constant dense<0.000000e+00> : vector<8x32xf32>
    %150 = tpu.matmul %149, %148, %cst_57 {dimension_numbers = #tpu.dot_dimension_numbers<[1], [0], [0], [1], [0, 0, 1, 1], [], []>} : vector<8x128xbf16>, vector<128x32xbf16>, vector<8x32xf32> -> vector<8x32xf32>
    %c0_58 = arith.constant 0 : index
    %c0_59 = arith.constant 0 : index
    %c0_60 = arith.constant 0 : index
    %151 = vector.load %arg9[%c0_58, %c0_59, %c0_60] : memref<2x1x32xf32, #tpu.memory_space<vmem>>, vector<1x1x32xf32>
    %152 = vector.shape_cast %151 : vector<1x1x32xf32> to vector<1x32xf32>
    %153 = vector.broadcast %152 : vector<1x32xf32> to vector<8x32xf32>
    %154 = arith.addf %150, %153 : vector<8x32xf32>
    %155 = arith.addf %154, %136 : vector<8x32xf32>
    %c0_61 = arith.constant 0 : index
    %c0_62 = arith.constant 0 : index
    %c0_63 = arith.constant 0 : index
    %156 = vector.load %arg10[%c0_61, %c0_62, %c0_63] : memref<2x1x32xf32, #tpu.memory_space<vmem>>, vector<1x1x32xf32>
    %157 = vector.shape_cast %156 : vector<1x1x32xf32> to vector<1x32xf32>
    %c0_64 = arith.constant 0 : index
    %c0_65 = arith.constant 0 : index
    %c0_66 = arith.constant 0 : index
    %158 = vector.load %arg11[%c0_64, %c0_65, %c0_66] : memref<2x1x32xf32, #tpu.memory_space<vmem>>, vector<1x1x32xf32>
    %159 = vector.shape_cast %158 : vector<1x1x32xf32> to vector<1x32xf32>
    %cst_67 = arith.constant dense<0.000000e+00> : vector<8xf32>
    %160 = vector.multi_reduction <add>, %155, %cst_67 [1] : vector<8x32xf32> to vector<8xf32>
    %161 = vector.shape_cast %160 : vector<8xf32> to vector<8x1xf32>
    %cst_68 = arith.constant 3.200000e+01 : f32
    %162 = vector.broadcast %cst_68 : f32 to vector<8x1xf32>
    %163 = arith.divf %161, %162 : vector<8x1xf32>
    %164 = vector.broadcast %163 : vector<8x1xf32> to vector<8x32xf32>
    %165 = arith.subf %155, %164 : vector<8x32xf32>
    %166 = arith.mulf %165, %165 : vector<8x32xf32>
    %cst_69 = arith.constant dense<0.000000e+00> : vector<8xf32>
    %167 = vector.multi_reduction <add>, %166, %cst_69 [1] : vector<8x32xf32> to vector<8xf32>
    %168 = vector.shape_cast %167 : vector<8xf32> to vector<8x1xf32>
    %cst_70 = arith.constant 3.200000e+01 : f32
    %169 = vector.broadcast %cst_70 : f32 to vector<8x1xf32>
    %170 = arith.divf %168, %169 : vector<8x1xf32>
    %cst_71 = arith.constant 9.99999974E-6 : f32
    %171 = vector.broadcast %cst_71 : f32 to vector<8x1xf32>
    %172 = arith.addf %170, %171 : vector<8x1xf32>
    %173 = math.rsqrt %172 : vector<8x1xf32>
    %174 = vector.broadcast %173 : vector<8x1xf32> to vector<8x32xf32>
    %175 = arith.mulf %165, %174 : vector<8x32xf32>
    %176 = vector.broadcast %157 : vector<1x32xf32> to vector<8x32xf32>
    %177 = arith.mulf %175, %176 : vector<8x32xf32>
    %178 = vector.broadcast %159 : vector<1x32xf32> to vector<8x32xf32>
    %179 = arith.addf %177, %178 : vector<8x32xf32>
    %c0_72 = arith.constant 0 : index
    %c0_73 = arith.constant 0 : index
    %c0_74 = arith.constant 0 : index
    %c0_75 = arith.constant 0 : index
    %180 = vector.load %arg12[%c0_72, %c0_73, %c0_74, %c0_75] : memref<2x1x8x32xf32, #tpu.memory_space<vmem>>, vector<1x1x8x32xf32>
    %181 = vector.shape_cast %180 : vector<1x1x8x32xf32> to vector<8x32xf32>
    %182 = vector.shape_cast %179 : vector<8x32xf32> to vector<1x1x8x32xf32>
    tpu.vector_store %arg12[%c0_72, %c0_73, %c0_74, %c0_75], %182 {strides = array<i32>} : memref<2x1x8x32xf32, #tpu.memory_space<vmem>>, vector<1x1x8x32xf32>,
    %c1 = arith.constant 1 : index
    %c0_76 = arith.constant 0 : index
    %c0_77 = arith.constant 0 : index
    %183 = vector.load %arg3[%c1, %c0_76, %c0_77] : memref<2x32x96xbf16, #tpu.memory_space<vmem>>, vector<1x32x96xbf16>
    %184 = vector.shape_cast %183 : vector<1x32x96xbf16> to vector<32x96xbf16>
    %185 = arith.truncf %179 : vector<8x32xf32> to vector<8x32xbf16>
    %cst_78 = arith.constant dense<0.000000e+00> : vector<8x96xf32>
    %186 = tpu.matmul %185, %184, %cst_78 {dimension_numbers = #tpu.dot_dimension_numbers<[1], [0], [0], [1], [0, 0, 1, 1], [], []>} : vector<8x32xbf16>, vector<32x96xbf16>, vector<8x96xf32> -> vector<8x96xf32>
    %187 = vector.extract_strided_slice %186 {offsets = [0, 0], sizes = [8, 32], strides = [1, 1]} : vector<8x96xf32> to vector<8x32xf32>
    %188 = vector.extract_strided_slice %186 {offsets = [0, 32], sizes = [8, 32], strides = [1, 1]} : vector<8x96xf32> to vector<8x32xf32>
    %189 = vector.extract_strided_slice %186 {offsets = [0, 64], sizes = [8, 32], strides = [1, 1]} : vector<8x96xf32> to vector<8x32xf32>
    %190 = vector.extract_strided_slice %187 {offsets = [0, 0], sizes = [8, 8], strides = [1, 1]} : vector<8x32xf32> to vector<8x8xf32>
    %191 = arith.truncf %190 : vector<8x8xf32> to vector<8x8xbf16>
    %192 = vector.extract_strided_slice %188 {offsets = [0, 0], sizes = [8, 8], strides = [1, 1]} : vector<8x32xf32> to vector<8x8xf32>
    %193 = arith.truncf %192 : vector<8x8xf32> to vector<8x8xbf16>
    %cst_79 = arith.constant dense<0.000000e+00> : vector<8x8xf32>
    %194 = tpu.matmul %191, %193, %cst_79 {dimension_numbers = #tpu.dot_dimension_numbers<[1], [1], [0], [0], [0, 0, 1, 0], [], []>} : vector<8x8xbf16>, vector<8x8xbf16>, vector<8x8xf32> -> vector<8x8xf32>
    %cst_80 = arith.constant 0.353553385 : f32
    %195 = vector.broadcast %cst_80 : f32 to vector<8x8xf32>
    %196 = arith.mulf %194, %195 : vector<8x8xf32>
    %197 = vector.broadcast %3 : vector<8x1xf32> to vector<8x8xf32>
    %198 = arith.mulf %196, %197 : vector<8x8xf32>
    %cst_81 = arith.constant dense<0xFF800000> : vector<8xf32>
    %199 = vector.multi_reduction <maximumf>, %198, %cst_81 [1] : vector<8x8xf32> to vector<8xf32>
    %200 = vector.shape_cast %199 : vector<8xf32> to vector<8x1xf32>
    %201 = vector.broadcast %200 : vector<8x1xf32> to vector<8x8xf32>
    %202 = arith.subf %198, %201 : vector<8x8xf32>
    %203 = math.exp %202 : vector<8x8xf32>
    %cst_82 = arith.constant dense<0.000000e+00> : vector<8xf32>
    %204 = vector.multi_reduction <add>, %203, %cst_82 [1] : vector<8x8xf32> to vector<8xf32>
    %205 = vector.shape_cast %204 : vector<8xf32> to vector<8x1xf32>
    %206 = tpu.reciprocal %205 {approx = true} : vector<8x1xf32> -> vector<8x1xf32>
    %207 = vector.broadcast %206 : vector<8x1xf32> to vector<8x8xf32>
    %208 = arith.mulf %203, %207 : vector<8x8xf32>
    %209 = arith.truncf %208 : vector<8x8xf32> to vector<8x8xbf16>
    %210 = vector.extract_strided_slice %189 {offsets = [0, 0], sizes = [8, 8], strides = [1, 1]} : vector<8x32xf32> to vector<8x8xf32>
    %211 = arith.truncf %210 : vector<8x8xf32> to vector<8x8xbf16>
    %cst_83 = arith.constant dense<0.000000e+00> : vector<8x8xf32>
    %212 = tpu.matmul %209, %211, %cst_83 {dimension_numbers = #tpu.dot_dimension_numbers<[1], [0], [0], [1], [0, 0, 1, 1], [], []>} : vector<8x8xbf16>, vector<8x8xbf16>, vector<8x8xf32> -> vector<8x8xf32>
    %213 = vector.extract_strided_slice %187 {offsets = [0, 8], sizes = [8, 8], strides = [1, 1]} : vector<8x32xf32> to vector<8x8xf32>
    %214 = arith.truncf %213 : vector<8x8xf32> to vector<8x8xbf16>
    %215 = vector.extract_strided_slice %188 {offsets = [0, 8], sizes = [8, 8], strides = [1, 1]} : vector<8x32xf32> to vector<8x8xf32>
    %216 = arith.truncf %215 : vector<8x8xf32> to vector<8x8xbf16>
    %cst_84 = arith.constant dense<0.000000e+00> : vector<8x8xf32>
    %217 = tpu.matmul %214, %216, %cst_84 {dimension_numbers = #tpu.dot_dimension_numbers<[1], [1], [0], [0], [0, 0, 1, 0], [], []>} : vector<8x8xbf16>, vector<8x8xbf16>, vector<8x8xf32> -> vector<8x8xf32>
    %cst_85 = arith.constant 0.353553385 : f32
    %218 = vector.broadcast %cst_85 : f32 to vector<8x8xf32>
    %219 = arith.mulf %217, %218 : vector<8x8xf32>
    %220 = vector.broadcast %3 : vector<8x1xf32> to vector<8x8xf32>
    %221 = arith.mulf %219, %220 : vector<8x8xf32>
    %cst_86 = arith.constant dense<0xFF800000> : vector<8xf32>
    %222 = vector.multi_reduction <maximumf>, %221, %cst_86 [1] : vector<8x8xf32> to vector<8xf32>
    %223 = vector.shape_cast %222 : vector<8xf32> to vector<8x1xf32>
    %224 = vector.broadcast %223 : vector<8x1xf32> to vector<8x8xf32>
    %225 = arith.subf %221, %224 : vector<8x8xf32>
    %226 = math.exp %225 : vector<8x8xf32>
    %cst_87 = arith.constant dense<0.000000e+00> : vector<8xf32>
    %227 = vector.multi_reduction <add>, %226, %cst_87 [1] : vector<8x8xf32> to vector<8xf32>
    %228 = vector.shape_cast %227 : vector<8xf32> to vector<8x1xf32>
    %229 = tpu.reciprocal %228 {approx = true} : vector<8x1xf32> -> vector<8x1xf32>
    %230 = vector.broadcast %229 : vector<8x1xf32> to vector<8x8xf32>
    %231 = arith.mulf %226, %230 : vector<8x8xf32>
    %232 = arith.truncf %231 : vector<8x8xf32> to vector<8x8xbf16>
    %233 = vector.extract_strided_slice %189 {offsets = [0, 8], sizes = [8, 8], strides = [1, 1]} : vector<8x32xf32> to vector<8x8xf32>
    %234 = arith.truncf %233 : vector<8x8xf32> to vector<8x8xbf16>
    %cst_88 = arith.constant dense<0.000000e+00> : vector<8x8xf32>
    %235 = tpu.matmul %232, %234, %cst_88 {dimension_numbers = #tpu.dot_dimension_numbers<[1], [0], [0], [1], [0, 0, 1, 1], [], []>} : vector<8x8xbf16>, vector<8x8xbf16>, vector<8x8xf32> -> vector<8x8xf32>
    %236 = vector.extract_strided_slice %187 {offsets = [0, 16], sizes = [8, 8], strides = [1, 1]} : vector<8x32xf32> to vector<8x8xf32>
    %237 = arith.truncf %236 : vector<8x8xf32> to vector<8x8xbf16>
    %238 = vector.extract_strided_slice %188 {offsets = [0, 16], sizes = [8, 8], strides = [1, 1]} : vector<8x32xf32> to vector<8x8xf32>
    %239 = arith.truncf %238 : vector<8x8xf32> to vector<8x8xbf16>
    %cst_89 = arith.constant dense<0.000000e+00> : vector<8x8xf32>
    %240 = tpu.matmul %237, %239, %cst_89 {dimension_numbers = #tpu.dot_dimension_numbers<[1], [1], [0], [0], [0, 0, 1, 0], [], []>} : vector<8x8xbf16>, vector<8x8xbf16>, vector<8x8xf32> -> vector<8x8xf32>
    %cst_90 = arith.constant 0.353553385 : f32
    %241 = vector.broadcast %cst_90 : f32 to vector<8x8xf32>
    %242 = arith.mulf %240, %241 : vector<8x8xf32>
    %243 = vector.broadcast %3 : vector<8x1xf32> to vector<8x8xf32>
    %244 = arith.mulf %242, %243 : vector<8x8xf32>
    %cst_91 = arith.constant dense<0xFF800000> : vector<8xf32>
    %245 = vector.multi_reduction <maximumf>, %244, %cst_91 [1] : vector<8x8xf32> to vector<8xf32>
    %246 = vector.shape_cast %245 : vector<8xf32> to vector<8x1xf32>
    %247 = vector.broadcast %246 : vector<8x1xf32> to vector<8x8xf32>
    %248 = arith.subf %244, %247 : vector<8x8xf32>
    %249 = math.exp %248 : vector<8x8xf32>
    %cst_92 = arith.constant dense<0.000000e+00> : vector<8xf32>
    %250 = vector.multi_reduction <add>, %249, %cst_92 [1] : vector<8x8xf32> to vector<8xf32>
    %251 = vector.shape_cast %250 : vector<8xf32> to vector<8x1xf32>
    %252 = tpu.reciprocal %251 {approx = true} : vector<8x1xf32> -> vector<8x1xf32>
    %253 = vector.broadcast %252 : vector<8x1xf32> to vector<8x8xf32>
    %254 = arith.mulf %249, %253 : vector<8x8xf32>
    %255 = arith.truncf %254 : vector<8x8xf32> to vector<8x8xbf16>
    %256 = vector.extract_strided_slice %189 {offsets = [0, 16], sizes = [8, 8], strides = [1, 1]} : vector<8x32xf32> to vector<8x8xf32>
    %257 = arith.truncf %256 : vector<8x8xf32> to vector<8x8xbf16>
    %cst_93 = arith.constant dense<0.000000e+00> : vector<8x8xf32>
    %258 = tpu.matmul %255, %257, %cst_93 {dimension_numbers = #tpu.dot_dimension_numbers<[1], [0], [0], [1], [0, 0, 1, 1], [], []>} : vector<8x8xbf16>, vector<8x8xbf16>, vector<8x8xf32> -> vector<8x8xf32>
    %259 = vector.extract_strided_slice %187 {offsets = [0, 24], sizes = [8, 8], strides = [1, 1]} : vector<8x32xf32> to vector<8x8xf32>
    %260 = arith.truncf %259 : vector<8x8xf32> to vector<8x8xbf16>
    %261 = vector.extract_strided_slice %188 {offsets = [0, 24], sizes = [8, 8], strides = [1, 1]} : vector<8x32xf32> to vector<8x8xf32>
    %262 = arith.truncf %261 : vector<8x8xf32> to vector<8x8xbf16>
    %cst_94 = arith.constant dense<0.000000e+00> : vector<8x8xf32>
    %263 = tpu.matmul %260, %262, %cst_94 {dimension_numbers = #tpu.dot_dimension_numbers<[1], [1], [0], [0], [0, 0, 1, 0], [], []>} : vector<8x8xbf16>, vector<8x8xbf16>, vector<8x8xf32> -> vector<8x8xf32>
    %cst_95 = arith.constant 0.353553385 : f32
    %264 = vector.broadcast %cst_95 : f32 to vector<8x8xf32>
    %265 = arith.mulf %263, %264 : vector<8x8xf32>
    %266 = vector.broadcast %3 : vector<8x1xf32> to vector<8x8xf32>
    %267 = arith.mulf %265, %266 : vector<8x8xf32>
    %cst_96 = arith.constant dense<0xFF800000> : vector<8xf32>
    %268 = vector.multi_reduction <maximumf>, %267, %cst_96 [1] : vector<8x8xf32> to vector<8xf32>
    %269 = vector.shape_cast %268 : vector<8xf32> to vector<8x1xf32>
    %270 = vector.broadcast %269 : vector<8x1xf32> to vector<8x8xf32>
    %271 = arith.subf %267, %270 : vector<8x8xf32>
    %272 = math.exp %271 : vector<8x8xf32>
    %cst_97 = arith.constant dense<0.000000e+00> : vector<8xf32>
    %273 = vector.multi_reduction <add>, %272, %cst_97 [1] : vector<8x8xf32> to vector<8xf32>
    %274 = vector.shape_cast %273 : vector<8xf32> to vector<8x1xf32>
    %275 = tpu.reciprocal %274 {approx = true} : vector<8x1xf32> -> vector<8x1xf32>
    %276 = vector.broadcast %275 : vector<8x1xf32> to vector<8x8xf32>
    %277 = arith.mulf %272, %276 : vector<8x8xf32>
    %278 = arith.truncf %277 : vector<8x8xf32> to vector<8x8xbf16>
    %279 = vector.extract_strided_slice %189 {offsets = [0, 24], sizes = [8, 8], strides = [1, 1]} : vector<8x32xf32> to vector<8x8xf32>
    %280 = arith.truncf %279 : vector<8x8xf32> to vector<8x8xbf16>
    %cst_98 = arith.constant dense<0.000000e+00> : vector<8x8xf32>
    %281 = tpu.matmul %278, %280, %cst_98 {dimension_numbers = #tpu.dot_dimension_numbers<[1], [0], [0], [1], [0, 0, 1, 1], [], []>} : vector<8x8xbf16>, vector<8x8xbf16>, vector<8x8xf32> -> vector<8x8xf32>
    %282 = tpu.concatenate %212, %235, %258, %281 in 1 : vector<8x8xf32>, vector<8x8xf32>, vector<8x8xf32>, vector<8x8xf32> -> vector<8x32xf32>
    %c1_99 = arith.constant 1 : index
    %c0_100 = arith.constant 0 : index
    %c0_101 = arith.constant 0 : index
    %283 = vector.load %arg4[%c1_99, %c0_100, %c0_101] : memref<2x32x32xbf16, #tpu.memory_space<vmem>>, vector<1x32x32xbf16>
    %284 = vector.shape_cast %283 : vector<1x32x32xbf16> to vector<32x32xbf16>
    %285 = arith.truncf %282 : vector<8x32xf32> to vector<8x32xbf16>
    %cst_102 = arith.constant dense<0.000000e+00> : vector<8x32xf32>
    %286 = tpu.matmul %285, %284, %cst_102 {dimension_numbers = #tpu.dot_dimension_numbers<[1], [0], [0], [1], [0, 0, 1, 1], [], []>} : vector<8x32xbf16>, vector<32x32xbf16>, vector<8x32xf32> -> vector<8x32xf32>
    %c1_103 = arith.constant 1 : index
    %c0_104 = arith.constant 0 : index
    %c0_105 = arith.constant 0 : index
    %287 = vector.load %arg5[%c1_103, %c0_104, %c0_105] : memref<2x1x32xf32, #tpu.memory_space<vmem>>, vector<1x1x32xf32>
    %288 = vector.shape_cast %287 : vector<1x1x32xf32> to vector<1x32xf32>
    %289 = vector.broadcast %288 : vector<1x32xf32> to vector<8x32xf32>
    %290 = arith.addf %286, %289 : vector<8x32xf32>
    %291 = arith.addf %290, %179 : vector<8x32xf32>
    %c1_106 = arith.constant 1 : index
    %c0_107 = arith.constant 0 : index
    %c0_108 = arith.constant 0 : index
    %292 = vector.load %arg10[%c1_106, %c0_107, %c0_108] : memref<2x1x32xf32, #tpu.memory_space<vmem>>, vector<1x1x32xf32>
    %293 = vector.shape_cast %292 : vector<1x1x32xf32> to vector<1x32xf32>
    %c1_109 = arith.constant 1 : index
    %c0_110 = arith.constant 0 : index
    %c0_111 = arith.constant 0 : index
    %294 = vector.load %arg11[%c1_109, %c0_110, %c0_111] : memref<2x1x32xf32, #tpu.memory_space<vmem>>, vector<1x1x32xf32>
    %295 = vector.shape_cast %294 : vector<1x1x32xf32> to vector<1x32xf32>
    %cst_112 = arith.constant dense<0.000000e+00> : vector<8xf32>
    %296 = vector.multi_reduction <add>, %291, %cst_112 [1] : vector<8x32xf32> to vector<8xf32>
    %297 = vector.shape_cast %296 : vector<8xf32> to vector<8x1xf32>
    %cst_113 = arith.constant 3.200000e+01 : f32
    %298 = vector.broadcast %cst_113 : f32 to vector<8x1xf32>
    %299 = arith.divf %297, %298 : vector<8x1xf32>
    %300 = vector.broadcast %299 : vector<8x1xf32> to vector<8x32xf32>
    %301 = arith.subf %291, %300 : vector<8x32xf32>
    %302 = arith.mulf %301, %301 : vector<8x32xf32>
    %cst_114 = arith.constant dense<0.000000e+00> : vector<8xf32>
    %303 = vector.multi_reduction <add>, %302, %cst_114 [1] : vector<8x32xf32> to vector<8xf32>
    %304 = vector.shape_cast %303 : vector<8xf32> to vector<8x1xf32>
    %cst_115 = arith.constant 3.200000e+01 : f32
    %305 = vector.broadcast %cst_115 : f32 to vector<8x1xf32>
    %306 = arith.divf %304, %305 : vector<8x1xf32>
    %cst_116 = arith.constant 9.99999974E-6 : f32
    %307 = vector.broadcast %cst_116 : f32 to vector<8x1xf32>
    %308 = arith.addf %306, %307 : vector<8x1xf32>
    %309 = math.rsqrt %308 : vector<8x1xf32>
    %310 = vector.broadcast %309 : vector<8x1xf32> to vector<8x32xf32>
    %311 = arith.mulf %301, %310 : vector<8x32xf32>
    %312 = vector.broadcast %293 : vector<1x32xf32> to vector<8x32xf32>
    %313 = arith.mulf %311, %312 : vector<8x32xf32>
    %314 = vector.broadcast %295 : vector<1x32xf32> to vector<8x32xf32>
    %315 = arith.addf %313, %314 : vector<8x32xf32>
    %c1_117 = arith.constant 1 : index
    %c0_118 = arith.constant 0 : index
    %c0_119 = arith.constant 0 : index
    %316 = vector.load %arg6[%c1_117, %c0_118, %c0_119] : memref<2x32x128xbf16, #tpu.memory_space<vmem>>, vector<1x32x128xbf16>
    %317 = vector.shape_cast %316 : vector<1x32x128xbf16> to vector<32x128xbf16>
    %318 = arith.truncf %315 : vector<8x32xf32> to vector<8x32xbf16>
    %cst_120 = arith.constant dense<0.000000e+00> : vector<8x128xf32>
    %319 = tpu.matmul %318, %317, %cst_120 {dimension_numbers = #tpu.dot_dimension_numbers<[1], [0], [0], [1], [0, 0, 1, 1], [], []>} : vector<8x32xbf16>, vector<32x128xbf16>, vector<8x128xf32> -> vector<8x128xf32>
    %c1_121 = arith.constant 1 : index
    %c0_122 = arith.constant 0 : index
    %c0_123 = arith.constant 0 : index
    %320 = vector.load %arg7[%c1_121, %c0_122, %c0_123] : memref<2x1x128xf32, #tpu.memory_space<vmem>>, vector<1x1x128xf32>
    %321 = vector.shape_cast %320 : vector<1x1x128xf32> to vector<1x128xf32>
    %322 = vector.broadcast %321 : vector<1x128xf32> to vector<8x128xf32>
    %323 = arith.addf %319, %322 : vector<8x128xf32>
    %cst_124 = arith.constant 0.000000e+00 : f32
    %324 = vector.broadcast %cst_124 : f32 to vector<8x128xf32>
    %325 = arith.maximumf %323, %324 : vector<8x128xf32>
    %c1_125 = arith.constant 1 : index
    %c0_126 = arith.constant 0 : index
    %c0_127 = arith.constant 0 : index
    %326 = vector.load %arg8[%c1_125, %c0_126, %c0_127] : memref<2x128x32xbf16, #tpu.memory_space<vmem>>, vector<1x128x32xbf16>
    %327 = vector.shape_cast %326 : vector<1x128x32xbf16> to vector<128x32xbf16>
    %328 = arith.truncf %325 : vector<8x128xf32> to vector<8x128xbf16>
    %cst_128 = arith.constant dense<0.000000e+00> : vector<8x32xf32>
    %329 = tpu.matmul %328, %327, %cst_128 {dimension_numbers = #tpu.dot_dimension_numbers<[1], [0], [0], [1], [0, 0, 1, 1], [], []>} : vector<8x128xbf16>, vector<128x32xbf16>, vector<8x32xf32> -> vector<8x32xf32>
    %c1_129 = arith.constant 1 : index
    %c0_130 = arith.constant 0 : index
    %c0_131 = arith.constant 0 : index
    %330 = vector.load %arg9[%c1_129, %c0_130, %c0_131] : memref<2x1x32xf32, #tpu.memory_space<vmem>>, vector<1x1x32xf32>
    %331 = vector.shape_cast %330 : vector<1x1x32xf32> to vector<1x32xf32>
    %332 = vector.broadcast %331 : vector<1x32xf32> to vector<8x32xf32>
    %333 = arith.addf %329, %332 : vector<8x32xf32>
    %334 = arith.addf %333, %315 : vector<8x32xf32>
    %c1_132 = arith.constant 1 : index
    %c0_133 = arith.constant 0 : index
    %c0_134 = arith.constant 0 : index
    %335 = vector.load %arg10[%c1_132, %c0_133, %c0_134] : memref<2x1x32xf32, #tpu.memory_space<vmem>>, vector<1x1x32xf32>
    %336 = vector.shape_cast %335 : vector<1x1x32xf32> to vector<1x32xf32>
    %c1_135 = arith.constant 1 : index
    %c0_136 = arith.constant 0 : index
    %c0_137 = arith.constant 0 : index
    %337 = vector.load %arg11[%c1_135, %c0_136, %c0_137] : memref<2x1x32xf32, #tpu.memory_space<vmem>>, vector<1x1x32xf32>
    %338 = vector.shape_cast %337 : vector<1x1x32xf32> to vector<1x32xf32>
    %cst_138 = arith.constant dense<0.000000e+00> : vector<8xf32>
    %339 = vector.multi_reduction <add>, %334, %cst_138 [1] : vector<8x32xf32> to vector<8xf32>
    %340 = vector.shape_cast %339 : vector<8xf32> to vector<8x1xf32>
    %cst_139 = arith.constant 3.200000e+01 : f32
    %341 = vector.broadcast %cst_139 : f32 to vector<8x1xf32>
    %342 = arith.divf %340, %341 : vector<8x1xf32>
    %343 = vector.broadcast %342 : vector<8x1xf32> to vector<8x32xf32>
    %344 = arith.subf %334, %343 : vector<8x32xf32>
    %345 = arith.mulf %344, %344 : vector<8x32xf32>
    %cst_140 = arith.constant dense<0.000000e+00> : vector<8xf32>
    %346 = vector.multi_reduction <add>, %345, %cst_140 [1] : vector<8x32xf32> to vector<8xf32>
    %347 = vector.shape_cast %346 : vector<8xf32> to vector<8x1xf32>
    %cst_141 = arith.constant 3.200000e+01 : f32
    %348 = vector.broadcast %cst_141 : f32 to vector<8x1xf32>
    %349 = arith.divf %347, %348 : vector<8x1xf32>
    %cst_142 = arith.constant 9.99999974E-6 : f32
    %350 = vector.broadcast %cst_142 : f32 to vector<8x1xf32>
    %351 = arith.addf %349, %350 : vector<8x1xf32>
    %352 = math.rsqrt %351 : vector<8x1xf32>
    %353 = vector.broadcast %352 : vector<8x1xf32> to vector<8x32xf32>
    %354 = arith.mulf %344, %353 : vector<8x32xf32>
    %355 = vector.broadcast %336 : vector<1x32xf32> to vector<8x32xf32>
    %356 = arith.mulf %354, %355 : vector<8x32xf32>
    %357 = vector.broadcast %338 : vector<1x32xf32> to vector<8x32xf32>
    %358 = arith.addf %356, %357 : vector<8x32xf32>
    %c1_143 = arith.constant 1 : index
    %c0_144 = arith.constant 0 : index
    %c0_145 = arith.constant 0 : index
    %c0_146 = arith.constant 0 : index
    %359 = vector.load %arg12[%c1_143, %c0_144, %c0_145, %c0_146] : memref<2x1x8x32xf32, #tpu.memory_space<vmem>>, vector<1x1x8x32xf32>
    %360 = vector.shape_cast %359 : vector<1x1x8x32xf32> to vector<8x32xf32>
    %361 = vector.shape_cast %358 : vector<8x32xf32> to vector<1x1x8x32xf32>
    tpu.vector_store %arg12[%c1_143, %c0_144, %c0_145, %c0_146], %361 {strides = array<i32>} : memref<2x1x8x32xf32, #tpu.memory_space<vmem>>, vector<1x1x8x32xf32>,
    return
  }
  func.func @transform_0(%arg0: i32) -> (i32, i32, i32) {
    %c0_i32 = arith.constant 0 : i32
    %c0_i32_0 = arith.constant 0 : i32
    %c0_i32_1 = arith.constant 0 : i32
    return %arg0, %c0_i32, %c0_i32_0 : i32, i32, i32
  }
  func.func @transform_1(%arg0: i32) -> (i32, i32, i32) {
    %c0_i32 = arith.constant 0 : i32
    %c0_i32_0 = arith.constant 0 : i32
    %c0_i32_1 = arith.constant 0 : i32
    return %arg0, %c0_i32, %c0_i32_0 : i32, i32, i32
  }
  func.func @transform_2(%arg0: i32) -> (i32, i32, i32) {
    %c0_i32 = arith.constant 0 : i32
    %c0_i32_0 = arith.constant 0 : i32
    %c0_i32_1 = arith.constant 0 : i32
    %c0_i32_2 = arith.constant 0 : i32
    return %c0_i32, %c0_i32_0, %c0_i32_1 : i32, i32, i32
  }
  func.func @transform_3(%arg0: i32) -> (i32, i32, i32) {
    %c0_i32 = arith.constant 0 : i32
    %c0_i32_0 = arith.constant 0 : i32
    %c0_i32_1 = arith.constant 0 : i32
    %c0_i32_2 = arith.constant 0 : i32
    return %c0_i32, %c0_i32_0, %c0_i32_1 : i32, i32, i32
  }
  func.func @transform_4(%arg0: i32) -> (i32, i32, i32) {
    %c0_i32 = arith.constant 0 : i32
    %c0_i32_0 = arith.constant 0 : i32
    %c0_i32_1 = arith.constant 0 : i32
    %c0_i32_2 = arith.constant 0 : i32
    return %c0_i32, %c0_i32_0, %c0_i32_1 : i32, i32, i32
  }
  func.func @transform_5(%arg0: i32) -> (i32, i32, i32) {
    %c0_i32 = arith.constant 0 : i32
    %c0_i32_0 = arith.constant 0 : i32
    %c0_i32_1 = arith.constant 0 : i32
    %c0_i32_2 = arith.constant 0 : i32
    return %c0_i32, %c0_i32_0, %c0_i32_1 : i32, i32, i32
  }
  func.func @transform_6(%arg0: i32) -> (i32, i32, i32) {
    %c0_i32 = arith.constant 0 : i32
    %c0_i32_0 = arith.constant 0 : i32
    %c0_i32_1 = arith.constant 0 : i32
    %c0_i32_2 = arith.constant 0 : i32
    return %c0_i32, %c0_i32_0, %c0_i32_1 : i32, i32, i32
  }
  func.func @transform_7(%arg0: i32) -> (i32, i32, i32) {
    %c0_i32 = arith.constant 0 : i32
    %c0_i32_0 = arith.constant 0 : i32
    %c0_i32_1 = arith.constant 0 : i32
    %c0_i32_2 = arith.constant 0 : i32
    return %c0_i32, %c0_i32_0, %c0_i32_1 : i32, i32, i32
  }
  func.func @transform_8(%arg0: i32) -> (i32, i32, i32) {
    %c0_i32 = arith.constant 0 : i32
    %c0_i32_0 = arith.constant 0 : i32
    %c0_i32_1 = arith.constant 0 : i32
    %c0_i32_2 = arith.constant 0 : i32
    return %c0_i32, %c0_i32_0, %c0_i32_1 : i32, i32, i32
  }
  func.func @transform_9(%arg0: i32) -> (i32, i32, i32) {
    %c0_i32 = arith.constant 0 : i32
    %c0_i32_0 = arith.constant 0 : i32
    %c0_i32_1 = arith.constant 0 : i32
    %c0_i32_2 = arith.constant 0 : i32
    return %c0_i32, %c0_i32_0, %c0_i32_1 : i32, i32, i32
  }
  func.func @transform_10(%arg0: i32) -> (i32, i32, i32) {
    %c0_i32 = arith.constant 0 : i32
    %c0_i32_0 = arith.constant 0 : i32
    %c0_i32_1 = arith.constant 0 : i32
    %c0_i32_2 = arith.constant 0 : i32
    return %c0_i32, %c0_i32_0, %c0_i32_1 : i32, i32, i32
  }
  func.func @transform_11(%arg0: i32) -> (i32, i32, i32, i32) {
    %c0_i32 = arith.constant 0 : i32
    %c0_i32_0 = arith.constant 0 : i32
    %c0_i32_1 = arith.constant 0 : i32
    %c0_i32_2 = arith.constant 0 : i32
    return %c0_i32, %arg0, %c0_i32_0, %c0_i32_1 : i32, i32, i32, i32
  }
}

module attributes {stable_mosaic.version = 11 : i64} {
  func.func @_decoder_step_kernel(%arg0: i32, %arg1: memref<1x8x32xf32, #tpu.memory_space<vmem>>, %arg2: memref<1x8x1xf32, #tpu.memory_space<vmem>>, %arg3: memref<2x1x8x32xf32, #tpu.memory_space<vmem>>, %arg4: memref<2x32x96xbf16, #tpu.memory_space<vmem>>, %arg5: memref<2x32x32xbf16, #tpu.memory_space<vmem>>, %arg6: memref<2x1x32xf32, #tpu.memory_space<vmem>>, %arg7: memref<2x32x64xbf16, #tpu.memory_space<vmem>>, %arg8: memref<2x32x32xbf16, #tpu.memory_space<vmem>>, %arg9: memref<2x32x32xbf16, #tpu.memory_space<vmem>>, %arg10: memref<2x1x32xf32, #tpu.memory_space<vmem>>, %arg11: memref<2x32x128xbf16, #tpu.memory_space<vmem>>, %arg12: memref<2x1x128xf32, #tpu.memory_space<vmem>>, %arg13: memref<2x128x32xbf16, #tpu.memory_space<vmem>>, %arg14: memref<2x1x32xf32, #tpu.memory_space<vmem>>, %arg15: memref<2x1x32xf32, #tpu.memory_space<vmem>>, %arg16: memref<2x1x32xf32, #tpu.memory_space<vmem>>, %arg17: memref<32x16xbf16, #tpu.memory_space<vmem>>, %arg18: memref<1x16xf32, #tpu.memory_space<vmem>>, %arg19: memref<1x8x16xf32, #tpu.memory_space<vmem>>) attributes {dimension_semantics = [#tpu.dimension_semantics<parallel>], iteration_bounds = array<i64: 2>, scalar_prefetch = 0 : i64, scratch_operands = 0 : i64, tpu.core_type = #tpu.core_type<tc>, window_params = [{transform_indices = @transform_0, window_bounds = array<i64: 1, 8, 32>}, {transform_indices = @transform_1, window_bounds = array<i64: 1, 8, 1>}, {transform_indices = @transform_2, window_bounds = array<i64: 2, 1, 8, 32>}, {pipeline_mode = #tpu.pipeline_mode<synchronous>, transform_indices = @transform_3, window_bounds = array<i64: 2, 32, 96>}, {pipeline_mode = #tpu.pipeline_mode<synchronous>, transform_indices = @transform_4, window_bounds = array<i64: 2, 32, 32>}, {pipeline_mode = #tpu.pipeline_mode<synchronous>, transform_indices = @transform_5, window_bounds = array<i64: 2, 1, 32>}, {pipeline_mode = #tpu.pipeline_mode<synchronous>, transform_indices = @transform_6, window_bounds = array<i64: 2, 32, 64>}, {pipeline_mode = #tpu.pipeline_mode<synchronous>, transform_indices = @transform_7, window_bounds = array<i64: 2, 32, 32>}, {pipeline_mode = #tpu.pipeline_mode<synchronous>, transform_indices = @transform_8, window_bounds = array<i64: 2, 32, 32>}, {pipeline_mode = #tpu.pipeline_mode<synchronous>, transform_indices = @transform_9, window_bounds = array<i64: 2, 1, 32>}, {pipeline_mode = #tpu.pipeline_mode<synchronous>, transform_indices = @transform_10, window_bounds = array<i64: 2, 32, 128>}, {pipeline_mode = #tpu.pipeline_mode<synchronous>, transform_indices = @transform_11, window_bounds = array<i64: 2, 1, 128>}, {pipeline_mode = #tpu.pipeline_mode<synchronous>, transform_indices = @transform_12, window_bounds = array<i64: 2, 128, 32>}, {pipeline_mode = #tpu.pipeline_mode<synchronous>, transform_indices = @transform_13, window_bounds = array<i64: 2, 1, 32>}, {pipeline_mode = #tpu.pipeline_mode<synchronous>, transform_indices = @transform_14, window_bounds = array<i64: 2, 1, 32>}, {pipeline_mode = #tpu.pipeline_mode<synchronous>, transform_indices = @transform_15, window_bounds = array<i64: 2, 1, 32>}, {pipeline_mode = #tpu.pipeline_mode<synchronous>, transform_indices = @transform_16, window_bounds = array<i64: 32, 16>}, {pipeline_mode = #tpu.pipeline_mode<synchronous>, transform_indices = @transform_17, window_bounds = array<i64: 1, 16>}, {transform_indices = @transform_18, window_bounds = array<i64: 1, 8, 16>}]} {
    %c0 = arith.constant 0 : index
    %c0_0 = arith.constant 0 : index
    %c0_1 = arith.constant 0 : index
    %0 = vector.load %arg1[%c0, %c0_0, %c0_1] : memref<1x8x32xf32, #tpu.memory_space<vmem>>, vector<1x8x32xf32>
    %1 = vector.shape_cast %0 : vector<1x8x32xf32> to vector<8x32xf32>
    %c0_2 = arith.constant 0 : index
    %c0_3 = arith.constant 0 : index
    %c0_4 = arith.constant 0 : index
    %2 = vector.load %arg2[%c0_2, %c0_3, %c0_4] : memref<1x8x1xf32, #tpu.memory_space<vmem>>, vector<1x8x1xf32>
    %3 = vector.shape_cast %2 : vector<1x8x1xf32> to vector<8x1xf32>
    %c0_5 = arith.constant 0 : index
    %c0_6 = arith.constant 0 : index
    %c0_7 = arith.constant 0 : index
    %4 = vector.load %arg4[%c0_5, %c0_6, %c0_7] : memref<2x32x96xbf16, #tpu.memory_space<vmem>>, vector<1x32x96xbf16>
    %5 = vector.shape_cast %4 : vector<1x32x96xbf16> to vector<32x96xbf16>
    %6 = arith.truncf %1 : vector<8x32xf32> to vector<8x32xbf16>
    %cst = arith.constant dense<0.000000e+00> : vector<8x96xf32>
    %7 = tpu.matmul %6, %5, %cst {dimension_numbers = #tpu.dot_dimension_numbers<[1], [0], [0], [1], [0, 0, 1, 1], [], []>} : vector<8x32xbf16>, vector<32x96xbf16>, vector<8x96xf32> -> vector<8x96xf32>
    %8 = vector.extract_strided_slice %7 {offsets = [0, 0], sizes = [8, 32], strides = [1, 1]} : vector<8x96xf32> to vector<8x32xf32>
    %9 = vector.extract_strided_slice %7 {offsets = [0, 32], sizes = [8, 32], strides = [1, 1]} : vector<8x96xf32> to vector<8x32xf32>
    %10 = vector.extract_strided_slice %7 {offsets = [0, 64], sizes = [8, 32], strides = [1, 1]} : vector<8x96xf32> to vector<8x32xf32>
    %11 = vector.extract_strided_slice %8 {offsets = [0, 0], sizes = [8, 8], strides = [1, 1]} : vector<8x32xf32> to vector<8x8xf32>
    %12 = arith.truncf %11 : vector<8x8xf32> to vector<8x8xbf16>
    %13 = vector.extract_strided_slice %9 {offsets = [0, 0], sizes = [8, 8], strides = [1, 1]} : vector<8x32xf32> to vector<8x8xf32>
    %14 = arith.truncf %13 : vector<8x8xf32> to vector<8x8xbf16>
    %cst_8 = arith.constant dense<0.000000e+00> : vector<8x8xf32>
    %15 = tpu.matmul %12, %14, %cst_8 {dimension_numbers = #tpu.dot_dimension_numbers<[1], [1], [0], [0], [0, 0, 1, 0], [], []>} : vector<8x8xbf16>, vector<8x8xbf16>, vector<8x8xf32> -> vector<8x8xf32>
    %cst_9 = arith.constant 0.353553385 : f32
    %16 = vector.broadcast %cst_9 : f32 to vector<8x8xf32>
    %17 = arith.mulf %15, %16 : vector<8x8xf32>
    %18 = vector.broadcast %3 : vector<8x1xf32> to vector<8x8xf32>
    %19 = arith.mulf %17, %18 : vector<8x8xf32>
    %cst_10 = arith.constant dense<0xFF800000> : vector<8xf32>
    %20 = vector.multi_reduction <maximumf>, %19, %cst_10 [1] : vector<8x8xf32> to vector<8xf32>
    %21 = vector.shape_cast %20 : vector<8xf32> to vector<8x1xf32>
    %22 = vector.broadcast %21 : vector<8x1xf32> to vector<8x8xf32>
    %23 = arith.subf %19, %22 : vector<8x8xf32>
    %24 = math.exp %23 : vector<8x8xf32>
    %cst_11 = arith.constant dense<0.000000e+00> : vector<8xf32>
    %25 = vector.multi_reduction <add>, %24, %cst_11 [1] : vector<8x8xf32> to vector<8xf32>
    %26 = vector.shape_cast %25 : vector<8xf32> to vector<8x1xf32>
    %27 = tpu.reciprocal %26 {approx = true} : vector<8x1xf32> -> vector<8x1xf32>
    %28 = vector.broadcast %27 : vector<8x1xf32> to vector<8x8xf32>
    %29 = arith.mulf %24, %28 : vector<8x8xf32>
    %30 = arith.truncf %29 : vector<8x8xf32> to vector<8x8xbf16>
    %31 = vector.extract_strided_slice %10 {offsets = [0, 0], sizes = [8, 8], strides = [1, 1]} : vector<8x32xf32> to vector<8x8xf32>
    %32 = arith.truncf %31 : vector<8x8xf32> to vector<8x8xbf16>
    %cst_12 = arith.constant dense<0.000000e+00> : vector<8x8xf32>
    %33 = tpu.matmul %30, %32, %cst_12 {dimension_numbers = #tpu.dot_dimension_numbers<[1], [0], [0], [1], [0, 0, 1, 1], [], []>} : vector<8x8xbf16>, vector<8x8xbf16>, vector<8x8xf32> -> vector<8x8xf32>
    %34 = vector.extract_strided_slice %8 {offsets = [0, 8], sizes = [8, 8], strides = [1, 1]} : vector<8x32xf32> to vector<8x8xf32>
    %35 = arith.truncf %34 : vector<8x8xf32> to vector<8x8xbf16>
    %36 = vector.extract_strided_slice %9 {offsets = [0, 8], sizes = [8, 8], strides = [1, 1]} : vector<8x32xf32> to vector<8x8xf32>
    %37 = arith.truncf %36 : vector<8x8xf32> to vector<8x8xbf16>
    %cst_13 = arith.constant dense<0.000000e+00> : vector<8x8xf32>
    %38 = tpu.matmul %35, %37, %cst_13 {dimension_numbers = #tpu.dot_dimension_numbers<[1], [1], [0], [0], [0, 0, 1, 0], [], []>} : vector<8x8xbf16>, vector<8x8xbf16>, vector<8x8xf32> -> vector<8x8xf32>
    %cst_14 = arith.constant 0.353553385 : f32
    %39 = vector.broadcast %cst_14 : f32 to vector<8x8xf32>
    %40 = arith.mulf %38, %39 : vector<8x8xf32>
    %41 = vector.broadcast %3 : vector<8x1xf32> to vector<8x8xf32>
    %42 = arith.mulf %40, %41 : vector<8x8xf32>
    %cst_15 = arith.constant dense<0xFF800000> : vector<8xf32>
    %43 = vector.multi_reduction <maximumf>, %42, %cst_15 [1] : vector<8x8xf32> to vector<8xf32>
    %44 = vector.shape_cast %43 : vector<8xf32> to vector<8x1xf32>
    %45 = vector.broadcast %44 : vector<8x1xf32> to vector<8x8xf32>
    %46 = arith.subf %42, %45 : vector<8x8xf32>
    %47 = math.exp %46 : vector<8x8xf32>
    %cst_16 = arith.constant dense<0.000000e+00> : vector<8xf32>
    %48 = vector.multi_reduction <add>, %47, %cst_16 [1] : vector<8x8xf32> to vector<8xf32>
    %49 = vector.shape_cast %48 : vector<8xf32> to vector<8x1xf32>
    %50 = tpu.reciprocal %49 {approx = true} : vector<8x1xf32> -> vector<8x1xf32>
    %51 = vector.broadcast %50 : vector<8x1xf32> to vector<8x8xf32>
    %52 = arith.mulf %47, %51 : vector<8x8xf32>
    %53 = arith.truncf %52 : vector<8x8xf32> to vector<8x8xbf16>
    %54 = vector.extract_strided_slice %10 {offsets = [0, 8], sizes = [8, 8], strides = [1, 1]} : vector<8x32xf32> to vector<8x8xf32>
    %55 = arith.truncf %54 : vector<8x8xf32> to vector<8x8xbf16>
    %cst_17 = arith.constant dense<0.000000e+00> : vector<8x8xf32>
    %56 = tpu.matmul %53, %55, %cst_17 {dimension_numbers = #tpu.dot_dimension_numbers<[1], [0], [0], [1], [0, 0, 1, 1], [], []>} : vector<8x8xbf16>, vector<8x8xbf16>, vector<8x8xf32> -> vector<8x8xf32>
    %57 = vector.extract_strided_slice %8 {offsets = [0, 16], sizes = [8, 8], strides = [1, 1]} : vector<8x32xf32> to vector<8x8xf32>
    %58 = arith.truncf %57 : vector<8x8xf32> to vector<8x8xbf16>
    %59 = vector.extract_strided_slice %9 {offsets = [0, 16], sizes = [8, 8], strides = [1, 1]} : vector<8x32xf32> to vector<8x8xf32>
    %60 = arith.truncf %59 : vector<8x8xf32> to vector<8x8xbf16>
    %cst_18 = arith.constant dense<0.000000e+00> : vector<8x8xf32>
    %61 = tpu.matmul %58, %60, %cst_18 {dimension_numbers = #tpu.dot_dimension_numbers<[1], [1], [0], [0], [0, 0, 1, 0], [], []>} : vector<8x8xbf16>, vector<8x8xbf16>, vector<8x8xf32> -> vector<8x8xf32>
    %cst_19 = arith.constant 0.353553385 : f32
    %62 = vector.broadcast %cst_19 : f32 to vector<8x8xf32>
    %63 = arith.mulf %61, %62 : vector<8x8xf32>
    %64 = vector.broadcast %3 : vector<8x1xf32> to vector<8x8xf32>
    %65 = arith.mulf %63, %64 : vector<8x8xf32>
    %cst_20 = arith.constant dense<0xFF800000> : vector<8xf32>
    %66 = vector.multi_reduction <maximumf>, %65, %cst_20 [1] : vector<8x8xf32> to vector<8xf32>
    %67 = vector.shape_cast %66 : vector<8xf32> to vector<8x1xf32>
    %68 = vector.broadcast %67 : vector<8x1xf32> to vector<8x8xf32>
    %69 = arith.subf %65, %68 : vector<8x8xf32>
    %70 = math.exp %69 : vector<8x8xf32>
    %cst_21 = arith.constant dense<0.000000e+00> : vector<8xf32>
    %71 = vector.multi_reduction <add>, %70, %cst_21 [1] : vector<8x8xf32> to vector<8xf32>
    %72 = vector.shape_cast %71 : vector<8xf32> to vector<8x1xf32>
    %73 = tpu.reciprocal %72 {approx = true} : vector<8x1xf32> -> vector<8x1xf32>
    %74 = vector.broadcast %73 : vector<8x1xf32> to vector<8x8xf32>
    %75 = arith.mulf %70, %74 : vector<8x8xf32>
    %76 = arith.truncf %75 : vector<8x8xf32> to vector<8x8xbf16>
    %77 = vector.extract_strided_slice %10 {offsets = [0, 16], sizes = [8, 8], strides = [1, 1]} : vector<8x32xf32> to vector<8x8xf32>
    %78 = arith.truncf %77 : vector<8x8xf32> to vector<8x8xbf16>
    %cst_22 = arith.constant dense<0.000000e+00> : vector<8x8xf32>
    %79 = tpu.matmul %76, %78, %cst_22 {dimension_numbers = #tpu.dot_dimension_numbers<[1], [0], [0], [1], [0, 0, 1, 1], [], []>} : vector<8x8xbf16>, vector<8x8xbf16>, vector<8x8xf32> -> vector<8x8xf32>
    %80 = vector.extract_strided_slice %8 {offsets = [0, 24], sizes = [8, 8], strides = [1, 1]} : vector<8x32xf32> to vector<8x8xf32>
    %81 = arith.truncf %80 : vector<8x8xf32> to vector<8x8xbf16>
    %82 = vector.extract_strided_slice %9 {offsets = [0, 24], sizes = [8, 8], strides = [1, 1]} : vector<8x32xf32> to vector<8x8xf32>
    %83 = arith.truncf %82 : vector<8x8xf32> to vector<8x8xbf16>
    %cst_23 = arith.constant dense<0.000000e+00> : vector<8x8xf32>
    %84 = tpu.matmul %81, %83, %cst_23 {dimension_numbers = #tpu.dot_dimension_numbers<[1], [1], [0], [0], [0, 0, 1, 0], [], []>} : vector<8x8xbf16>, vector<8x8xbf16>, vector<8x8xf32> -> vector<8x8xf32>
    %cst_24 = arith.constant 0.353553385 : f32
    %85 = vector.broadcast %cst_24 : f32 to vector<8x8xf32>
    %86 = arith.mulf %84, %85 : vector<8x8xf32>
    %87 = vector.broadcast %3 : vector<8x1xf32> to vector<8x8xf32>
    %88 = arith.mulf %86, %87 : vector<8x8xf32>
    %cst_25 = arith.constant dense<0xFF800000> : vector<8xf32>
    %89 = vector.multi_reduction <maximumf>, %88, %cst_25 [1] : vector<8x8xf32> to vector<8xf32>
    %90 = vector.shape_cast %89 : vector<8xf32> to vector<8x1xf32>
    %91 = vector.broadcast %90 : vector<8x1xf32> to vector<8x8xf32>
    %92 = arith.subf %88, %91 : vector<8x8xf32>
    %93 = math.exp %92 : vector<8x8xf32>
    %cst_26 = arith.constant dense<0.000000e+00> : vector<8xf32>
    %94 = vector.multi_reduction <add>, %93, %cst_26 [1] : vector<8x8xf32> to vector<8xf32>
    %95 = vector.shape_cast %94 : vector<8xf32> to vector<8x1xf32>
    %96 = tpu.reciprocal %95 {approx = true} : vector<8x1xf32> -> vector<8x1xf32>
    %97 = vector.broadcast %96 : vector<8x1xf32> to vector<8x8xf32>
    %98 = arith.mulf %93, %97 : vector<8x8xf32>
    %99 = arith.truncf %98 : vector<8x8xf32> to vector<8x8xbf16>
    %100 = vector.extract_strided_slice %10 {offsets = [0, 24], sizes = [8, 8], strides = [1, 1]} : vector<8x32xf32> to vector<8x8xf32>
    %101 = arith.truncf %100 : vector<8x8xf32> to vector<8x8xbf16>
    %cst_27 = arith.constant dense<0.000000e+00> : vector<8x8xf32>
    %102 = tpu.matmul %99, %101, %cst_27 {dimension_numbers = #tpu.dot_dimension_numbers<[1], [0], [0], [1], [0, 0, 1, 1], [], []>} : vector<8x8xbf16>, vector<8x8xbf16>, vector<8x8xf32> -> vector<8x8xf32>
    %103 = tpu.concatenate %33, %56, %79, %102 in 1 : vector<8x8xf32>, vector<8x8xf32>, vector<8x8xf32>, vector<8x8xf32> -> vector<8x32xf32>
    %c0_28 = arith.constant 0 : index
    %c0_29 = arith.constant 0 : index
    %c0_30 = arith.constant 0 : index
    %104 = vector.load %arg5[%c0_28, %c0_29, %c0_30] : memref<2x32x32xbf16, #tpu.memory_space<vmem>>, vector<1x32x32xbf16>
    %105 = vector.shape_cast %104 : vector<1x32x32xbf16> to vector<32x32xbf16>
    %106 = arith.truncf %103 : vector<8x32xf32> to vector<8x32xbf16>
    %cst_31 = arith.constant dense<0.000000e+00> : vector<8x32xf32>
    %107 = tpu.matmul %106, %105, %cst_31 {dimension_numbers = #tpu.dot_dimension_numbers<[1], [0], [0], [1], [0, 0, 1, 1], [], []>} : vector<8x32xbf16>, vector<32x32xbf16>, vector<8x32xf32> -> vector<8x32xf32>
    %c0_32 = arith.constant 0 : index
    %c0_33 = arith.constant 0 : index
    %c0_34 = arith.constant 0 : index
    %108 = vector.load %arg6[%c0_32, %c0_33, %c0_34] : memref<2x1x32xf32, #tpu.memory_space<vmem>>, vector<1x1x32xf32>
    %109 = vector.shape_cast %108 : vector<1x1x32xf32> to vector<1x32xf32>
    %110 = vector.broadcast %109 : vector<1x32xf32> to vector<8x32xf32>
    %111 = arith.addf %107, %110 : vector<8x32xf32>
    %112 = arith.addf %111, %1 : vector<8x32xf32>
    %c0_35 = arith.constant 0 : index
    %c0_36 = arith.constant 0 : index
    %c0_37 = arith.constant 0 : index
    %113 = vector.load %arg15[%c0_35, %c0_36, %c0_37] : memref<2x1x32xf32, #tpu.memory_space<vmem>>, vector<1x1x32xf32>
    %114 = vector.shape_cast %113 : vector<1x1x32xf32> to vector<1x32xf32>
    %c0_38 = arith.constant 0 : index
    %c0_39 = arith.constant 0 : index
    %c0_40 = arith.constant 0 : index
    %115 = vector.load %arg16[%c0_38, %c0_39, %c0_40] : memref<2x1x32xf32, #tpu.memory_space<vmem>>, vector<1x1x32xf32>
    %116 = vector.shape_cast %115 : vector<1x1x32xf32> to vector<1x32xf32>
    %cst_41 = arith.constant dense<0.000000e+00> : vector<8xf32>
    %117 = vector.multi_reduction <add>, %112, %cst_41 [1] : vector<8x32xf32> to vector<8xf32>
    %118 = vector.shape_cast %117 : vector<8xf32> to vector<8x1xf32>
    %cst_42 = arith.constant 3.200000e+01 : f32
    %119 = vector.broadcast %cst_42 : f32 to vector<8x1xf32>
    %120 = arith.divf %118, %119 : vector<8x1xf32>
    %121 = vector.broadcast %120 : vector<8x1xf32> to vector<8x32xf32>
    %122 = arith.subf %112, %121 : vector<8x32xf32>
    %123 = arith.mulf %122, %122 : vector<8x32xf32>
    %cst_43 = arith.constant dense<0.000000e+00> : vector<8xf32>
    %124 = vector.multi_reduction <add>, %123, %cst_43 [1] : vector<8x32xf32> to vector<8xf32>
    %125 = vector.shape_cast %124 : vector<8xf32> to vector<8x1xf32>
    %cst_44 = arith.constant 3.200000e+01 : f32
    %126 = vector.broadcast %cst_44 : f32 to vector<8x1xf32>
    %127 = arith.divf %125, %126 : vector<8x1xf32>
    %cst_45 = arith.constant 9.99999974E-6 : f32
    %128 = vector.broadcast %cst_45 : f32 to vector<8x1xf32>
    %129 = arith.addf %127, %128 : vector<8x1xf32>
    %130 = math.rsqrt %129 : vector<8x1xf32>
    %131 = vector.broadcast %130 : vector<8x1xf32> to vector<8x32xf32>
    %132 = arith.mulf %122, %131 : vector<8x32xf32>
    %133 = vector.broadcast %114 : vector<1x32xf32> to vector<8x32xf32>
    %134 = arith.mulf %132, %133 : vector<8x32xf32>
    %135 = vector.broadcast %116 : vector<1x32xf32> to vector<8x32xf32>
    %136 = arith.addf %134, %135 : vector<8x32xf32>
    %c0_46 = arith.constant 0 : index
    %c0_47 = arith.constant 0 : index
    %c0_48 = arith.constant 0 : index
    %c0_49 = arith.constant 0 : index
    %137 = vector.load %arg3[%c0_46, %c0_47, %c0_48, %c0_49] : memref<2x1x8x32xf32, #tpu.memory_space<vmem>>, vector<1x1x8x32xf32>
    %138 = vector.shape_cast %137 : vector<1x1x8x32xf32> to vector<8x32xf32>
    %c0_50 = arith.constant 0 : index
    %c0_51 = arith.constant 0 : index
    %c0_52 = arith.constant 0 : index
    %139 = vector.load %arg7[%c0_50, %c0_51, %c0_52] : memref<2x32x64xbf16, #tpu.memory_space<vmem>>, vector<1x32x64xbf16>
    %140 = vector.shape_cast %139 : vector<1x32x64xbf16> to vector<32x64xbf16>
    %141 = arith.truncf %138 : vector<8x32xf32> to vector<8x32xbf16>
    %cst_53 = arith.constant dense<0.000000e+00> : vector<8x64xf32>
    %142 = tpu.matmul %141, %140, %cst_53 {dimension_numbers = #tpu.dot_dimension_numbers<[1], [0], [0], [1], [0, 0, 1, 1], [], []>} : vector<8x32xbf16>, vector<32x64xbf16>, vector<8x64xf32> -> vector<8x64xf32>
    %c0_54 = arith.constant 0 : index
    %c0_55 = arith.constant 0 : index
    %c0_56 = arith.constant 0 : index
    %143 = vector.load %arg8[%c0_54, %c0_55, %c0_56] : memref<2x32x32xbf16, #tpu.memory_space<vmem>>, vector<1x32x32xbf16>
    %144 = vector.shape_cast %143 : vector<1x32x32xbf16> to vector<32x32xbf16>
    %145 = arith.truncf %136 : vector<8x32xf32> to vector<8x32xbf16>
    %cst_57 = arith.constant dense<0.000000e+00> : vector<8x32xf32>
    %146 = tpu.matmul %145, %144, %cst_57 {dimension_numbers = #tpu.dot_dimension_numbers<[1], [0], [0], [1], [0, 0, 1, 1], [], []>} : vector<8x32xbf16>, vector<32x32xbf16>, vector<8x32xf32> -> vector<8x32xf32>
    %147 = vector.extract_strided_slice %142 {offsets = [0, 0], sizes = [8, 32], strides = [1, 1]} : vector<8x64xf32> to vector<8x32xf32>
    %148 = vector.extract_strided_slice %142 {offsets = [0, 32], sizes = [8, 32], strides = [1, 1]} : vector<8x64xf32> to vector<8x32xf32>
    %149 = vector.extract_strided_slice %147 {offsets = [0, 0], sizes = [8, 8], strides = [1, 1]} : vector<8x32xf32> to vector<8x8xf32>
    %150 = arith.truncf %149 : vector<8x8xf32> to vector<8x8xbf16>
    %151 = vector.extract_strided_slice %148 {offsets = [0, 0], sizes = [8, 8], strides = [1, 1]} : vector<8x32xf32> to vector<8x8xf32>
    %152 = arith.truncf %151 : vector<8x8xf32> to vector<8x8xbf16>
    %cst_58 = arith.constant dense<0.000000e+00> : vector<8x8xf32>
    %153 = tpu.matmul %150, %152, %cst_58 {dimension_numbers = #tpu.dot_dimension_numbers<[1], [1], [0], [0], [0, 0, 1, 0], [], []>} : vector<8x8xbf16>, vector<8x8xbf16>, vector<8x8xf32> -> vector<8x8xf32>
    %cst_59 = arith.constant 0.353553385 : f32
    %154 = vector.broadcast %cst_59 : f32 to vector<8x8xf32>
    %155 = arith.mulf %153, %154 : vector<8x8xf32>
    %cst_60 = arith.constant dense<0xFF800000> : vector<8xf32>
    %156 = vector.multi_reduction <maximumf>, %155, %cst_60 [1] : vector<8x8xf32> to vector<8xf32>
    %157 = vector.shape_cast %156 : vector<8xf32> to vector<8x1xf32>
    %158 = vector.broadcast %157 : vector<8x1xf32> to vector<8x8xf32>
    %159 = arith.subf %155, %158 : vector<8x8xf32>
    %160 = math.exp %159 : vector<8x8xf32>
    %cst_61 = arith.constant dense<0.000000e+00> : vector<8xf32>
    %161 = vector.multi_reduction <add>, %160, %cst_61 [1] : vector<8x8xf32> to vector<8xf32>
    %162 = vector.shape_cast %161 : vector<8xf32> to vector<8x1xf32>
    %163 = tpu.reciprocal %162 {approx = true} : vector<8x1xf32> -> vector<8x1xf32>
    %164 = vector.broadcast %163 : vector<8x1xf32> to vector<8x8xf32>
    %165 = arith.mulf %160, %164 : vector<8x8xf32>
    %166 = arith.truncf %165 : vector<8x8xf32> to vector<8x8xbf16>
    %167 = vector.extract_strided_slice %146 {offsets = [0, 0], sizes = [8, 8], strides = [1, 1]} : vector<8x32xf32> to vector<8x8xf32>
    %168 = arith.truncf %167 : vector<8x8xf32> to vector<8x8xbf16>
    %cst_62 = arith.constant dense<0.000000e+00> : vector<8x8xf32>
    %169 = tpu.matmul %166, %168, %cst_62 {dimension_numbers = #tpu.dot_dimension_numbers<[1], [0], [0], [1], [0, 0, 1, 1], [], []>} : vector<8x8xbf16>, vector<8x8xbf16>, vector<8x8xf32> -> vector<8x8xf32>
    %170 = vector.extract_strided_slice %147 {offsets = [0, 8], sizes = [8, 8], strides = [1, 1]} : vector<8x32xf32> to vector<8x8xf32>
    %171 = arith.truncf %170 : vector<8x8xf32> to vector<8x8xbf16>
    %172 = vector.extract_strided_slice %148 {offsets = [0, 8], sizes = [8, 8], strides = [1, 1]} : vector<8x32xf32> to vector<8x8xf32>
    %173 = arith.truncf %172 : vector<8x8xf32> to vector<8x8xbf16>
    %cst_63 = arith.constant dense<0.000000e+00> : vector<8x8xf32>
    %174 = tpu.matmul %171, %173, %cst_63 {dimension_numbers = #tpu.dot_dimension_numbers<[1], [1], [0], [0], [0, 0, 1, 0], [], []>} : vector<8x8xbf16>, vector<8x8xbf16>, vector<8x8xf32> -> vector<8x8xf32>
    %cst_64 = arith.constant 0.353553385 : f32
    %175 = vector.broadcast %cst_64 : f32 to vector<8x8xf32>
    %176 = arith.mulf %174, %175 : vector<8x8xf32>
    %cst_65 = arith.constant dense<0xFF800000> : vector<8xf32>
    %177 = vector.multi_reduction <maximumf>, %176, %cst_65 [1] : vector<8x8xf32> to vector<8xf32>
    %178 = vector.shape_cast %177 : vector<8xf32> to vector<8x1xf32>
    %179 = vector.broadcast %178 : vector<8x1xf32> to vector<8x8xf32>
    %180 = arith.subf %176, %179 : vector<8x8xf32>
    %181 = math.exp %180 : vector<8x8xf32>
    %cst_66 = arith.constant dense<0.000000e+00> : vector<8xf32>
    %182 = vector.multi_reduction <add>, %181, %cst_66 [1] : vector<8x8xf32> to vector<8xf32>
    %183 = vector.shape_cast %182 : vector<8xf32> to vector<8x1xf32>
    %184 = tpu.reciprocal %183 {approx = true} : vector<8x1xf32> -> vector<8x1xf32>
    %185 = vector.broadcast %184 : vector<8x1xf32> to vector<8x8xf32>
    %186 = arith.mulf %181, %185 : vector<8x8xf32>
    %187 = arith.truncf %186 : vector<8x8xf32> to vector<8x8xbf16>
    %188 = vector.extract_strided_slice %146 {offsets = [0, 8], sizes = [8, 8], strides = [1, 1]} : vector<8x32xf32> to vector<8x8xf32>
    %189 = arith.truncf %188 : vector<8x8xf32> to vector<8x8xbf16>
    %cst_67 = arith.constant dense<0.000000e+00> : vector<8x8xf32>
    %190 = tpu.matmul %187, %189, %cst_67 {dimension_numbers = #tpu.dot_dimension_numbers<[1], [0], [0], [1], [0, 0, 1, 1], [], []>} : vector<8x8xbf16>, vector<8x8xbf16>, vector<8x8xf32> -> vector<8x8xf32>
    %191 = vector.extract_strided_slice %147 {offsets = [0, 16], sizes = [8, 8], strides = [1, 1]} : vector<8x32xf32> to vector<8x8xf32>
    %192 = arith.truncf %191 : vector<8x8xf32> to vector<8x8xbf16>
    %193 = vector.extract_strided_slice %148 {offsets = [0, 16], sizes = [8, 8], strides = [1, 1]} : vector<8x32xf32> to vector<8x8xf32>
    %194 = arith.truncf %193 : vector<8x8xf32> to vector<8x8xbf16>
    %cst_68 = arith.constant dense<0.000000e+00> : vector<8x8xf32>
    %195 = tpu.matmul %192, %194, %cst_68 {dimension_numbers = #tpu.dot_dimension_numbers<[1], [1], [0], [0], [0, 0, 1, 0], [], []>} : vector<8x8xbf16>, vector<8x8xbf16>, vector<8x8xf32> -> vector<8x8xf32>
    %cst_69 = arith.constant 0.353553385 : f32
    %196 = vector.broadcast %cst_69 : f32 to vector<8x8xf32>
    %197 = arith.mulf %195, %196 : vector<8x8xf32>
    %cst_70 = arith.constant dense<0xFF800000> : vector<8xf32>
    %198 = vector.multi_reduction <maximumf>, %197, %cst_70 [1] : vector<8x8xf32> to vector<8xf32>
    %199 = vector.shape_cast %198 : vector<8xf32> to vector<8x1xf32>
    %200 = vector.broadcast %199 : vector<8x1xf32> to vector<8x8xf32>
    %201 = arith.subf %197, %200 : vector<8x8xf32>
    %202 = math.exp %201 : vector<8x8xf32>
    %cst_71 = arith.constant dense<0.000000e+00> : vector<8xf32>
    %203 = vector.multi_reduction <add>, %202, %cst_71 [1] : vector<8x8xf32> to vector<8xf32>
    %204 = vector.shape_cast %203 : vector<8xf32> to vector<8x1xf32>
    %205 = tpu.reciprocal %204 {approx = true} : vector<8x1xf32> -> vector<8x1xf32>
    %206 = vector.broadcast %205 : vector<8x1xf32> to vector<8x8xf32>
    %207 = arith.mulf %202, %206 : vector<8x8xf32>
    %208 = arith.truncf %207 : vector<8x8xf32> to vector<8x8xbf16>
    %209 = vector.extract_strided_slice %146 {offsets = [0, 16], sizes = [8, 8], strides = [1, 1]} : vector<8x32xf32> to vector<8x8xf32>
    %210 = arith.truncf %209 : vector<8x8xf32> to vector<8x8xbf16>
    %cst_72 = arith.constant dense<0.000000e+00> : vector<8x8xf32>
    %211 = tpu.matmul %208, %210, %cst_72 {dimension_numbers = #tpu.dot_dimension_numbers<[1], [0], [0], [1], [0, 0, 1, 1], [], []>} : vector<8x8xbf16>, vector<8x8xbf16>, vector<8x8xf32> -> vector<8x8xf32>
    %212 = vector.extract_strided_slice %147 {offsets = [0, 24], sizes = [8, 8], strides = [1, 1]} : vector<8x32xf32> to vector<8x8xf32>
    %213 = arith.truncf %212 : vector<8x8xf32> to vector<8x8xbf16>
    %214 = vector.extract_strided_slice %148 {offsets = [0, 24], sizes = [8, 8], strides = [1, 1]} : vector<8x32xf32> to vector<8x8xf32>
    %215 = arith.truncf %214 : vector<8x8xf32> to vector<8x8xbf16>
    %cst_73 = arith.constant dense<0.000000e+00> : vector<8x8xf32>
    %216 = tpu.matmul %213, %215, %cst_73 {dimension_numbers = #tpu.dot_dimension_numbers<[1], [1], [0], [0], [0, 0, 1, 0], [], []>} : vector<8x8xbf16>, vector<8x8xbf16>, vector<8x8xf32> -> vector<8x8xf32>
    %cst_74 = arith.constant 0.353553385 : f32
    %217 = vector.broadcast %cst_74 : f32 to vector<8x8xf32>
    %218 = arith.mulf %216, %217 : vector<8x8xf32>
    %cst_75 = arith.constant dense<0xFF800000> : vector<8xf32>
    %219 = vector.multi_reduction <maximumf>, %218, %cst_75 [1] : vector<8x8xf32> to vector<8xf32>
    %220 = vector.shape_cast %219 : vector<8xf32> to vector<8x1xf32>
    %221 = vector.broadcast %220 : vector<8x1xf32> to vector<8x8xf32>
    %222 = arith.subf %218, %221 : vector<8x8xf32>
    %223 = math.exp %222 : vector<8x8xf32>
    %cst_76 = arith.constant dense<0.000000e+00> : vector<8xf32>
    %224 = vector.multi_reduction <add>, %223, %cst_76 [1] : vector<8x8xf32> to vector<8xf32>
    %225 = vector.shape_cast %224 : vector<8xf32> to vector<8x1xf32>
    %226 = tpu.reciprocal %225 {approx = true} : vector<8x1xf32> -> vector<8x1xf32>
    %227 = vector.broadcast %226 : vector<8x1xf32> to vector<8x8xf32>
    %228 = arith.mulf %223, %227 : vector<8x8xf32>
    %229 = arith.truncf %228 : vector<8x8xf32> to vector<8x8xbf16>
    %230 = vector.extract_strided_slice %146 {offsets = [0, 24], sizes = [8, 8], strides = [1, 1]} : vector<8x32xf32> to vector<8x8xf32>
    %231 = arith.truncf %230 : vector<8x8xf32> to vector<8x8xbf16>
    %cst_77 = arith.constant dense<0.000000e+00> : vector<8x8xf32>
    %232 = tpu.matmul %229, %231, %cst_77 {dimension_numbers = #tpu.dot_dimension_numbers<[1], [0], [0], [1], [0, 0, 1, 1], [], []>} : vector<8x8xbf16>, vector<8x8xbf16>, vector<8x8xf32> -> vector<8x8xf32>
    %233 = tpu.concatenate %169, %190, %211, %232 in 1 : vector<8x8xf32>, vector<8x8xf32>, vector<8x8xf32>, vector<8x8xf32> -> vector<8x32xf32>
    %c0_78 = arith.constant 0 : index
    %c0_79 = arith.constant 0 : index
    %c0_80 = arith.constant 0 : index
    %234 = vector.load %arg9[%c0_78, %c0_79, %c0_80] : memref<2x32x32xbf16, #tpu.memory_space<vmem>>, vector<1x32x32xbf16>
    %235 = vector.shape_cast %234 : vector<1x32x32xbf16> to vector<32x32xbf16>
    %236 = arith.truncf %233 : vector<8x32xf32> to vector<8x32xbf16>
    %cst_81 = arith.constant dense<0.000000e+00> : vector<8x32xf32>
    %237 = tpu.matmul %236, %235, %cst_81 {dimension_numbers = #tpu.dot_dimension_numbers<[1], [0], [0], [1], [0, 0, 1, 1], [], []>} : vector<8x32xbf16>, vector<32x32xbf16>, vector<8x32xf32> -> vector<8x32xf32>
    %c0_82 = arith.constant 0 : index
    %c0_83 = arith.constant 0 : index
    %c0_84 = arith.constant 0 : index
    %238 = vector.load %arg10[%c0_82, %c0_83, %c0_84] : memref<2x1x32xf32, #tpu.memory_space<vmem>>, vector<1x1x32xf32>
    %239 = vector.shape_cast %238 : vector<1x1x32xf32> to vector<1x32xf32>
    %240 = vector.broadcast %239 : vector<1x32xf32> to vector<8x32xf32>
    %241 = arith.addf %237, %240 : vector<8x32xf32>
    %242 = arith.addf %241, %136 : vector<8x32xf32>
    %c0_85 = arith.constant 0 : index
    %c0_86 = arith.constant 0 : index
    %c0_87 = arith.constant 0 : index
    %243 = vector.load %arg15[%c0_85, %c0_86, %c0_87] : memref<2x1x32xf32, #tpu.memory_space<vmem>>, vector<1x1x32xf32>
    %244 = vector.shape_cast %243 : vector<1x1x32xf32> to vector<1x32xf32>
    %c0_88 = arith.constant 0 : index
    %c0_89 = arith.constant 0 : index
    %c0_90 = arith.constant 0 : index
    %245 = vector.load %arg16[%c0_88, %c0_89, %c0_90] : memref<2x1x32xf32, #tpu.memory_space<vmem>>, vector<1x1x32xf32>
    %246 = vector.shape_cast %245 : vector<1x1x32xf32> to vector<1x32xf32>
    %cst_91 = arith.constant dense<0.000000e+00> : vector<8xf32>
    %247 = vector.multi_reduction <add>, %242, %cst_91 [1] : vector<8x32xf32> to vector<8xf32>
    %248 = vector.shape_cast %247 : vector<8xf32> to vector<8x1xf32>
    %cst_92 = arith.constant 3.200000e+01 : f32
    %249 = vector.broadcast %cst_92 : f32 to vector<8x1xf32>
    %250 = arith.divf %248, %249 : vector<8x1xf32>
    %251 = vector.broadcast %250 : vector<8x1xf32> to vector<8x32xf32>
    %252 = arith.subf %242, %251 : vector<8x32xf32>
    %253 = arith.mulf %252, %252 : vector<8x32xf32>
    %cst_93 = arith.constant dense<0.000000e+00> : vector<8xf32>
    %254 = vector.multi_reduction <add>, %253, %cst_93 [1] : vector<8x32xf32> to vector<8xf32>
    %255 = vector.shape_cast %254 : vector<8xf32> to vector<8x1xf32>
    %cst_94 = arith.constant 3.200000e+01 : f32
    %256 = vector.broadcast %cst_94 : f32 to vector<8x1xf32>
    %257 = arith.divf %255, %256 : vector<8x1xf32>
    %cst_95 = arith.constant 9.99999974E-6 : f32
    %258 = vector.broadcast %cst_95 : f32 to vector<8x1xf32>
    %259 = arith.addf %257, %258 : vector<8x1xf32>
    %260 = math.rsqrt %259 : vector<8x1xf32>
    %261 = vector.broadcast %260 : vector<8x1xf32> to vector<8x32xf32>
    %262 = arith.mulf %252, %261 : vector<8x32xf32>
    %263 = vector.broadcast %244 : vector<1x32xf32> to vector<8x32xf32>
    %264 = arith.mulf %262, %263 : vector<8x32xf32>
    %265 = vector.broadcast %246 : vector<1x32xf32> to vector<8x32xf32>
    %266 = arith.addf %264, %265 : vector<8x32xf32>
    %c0_96 = arith.constant 0 : index
    %c0_97 = arith.constant 0 : index
    %c0_98 = arith.constant 0 : index
    %267 = vector.load %arg11[%c0_96, %c0_97, %c0_98] : memref<2x32x128xbf16, #tpu.memory_space<vmem>>, vector<1x32x128xbf16>
    %268 = vector.shape_cast %267 : vector<1x32x128xbf16> to vector<32x128xbf16>
    %269 = arith.truncf %266 : vector<8x32xf32> to vector<8x32xbf16>
    %cst_99 = arith.constant dense<0.000000e+00> : vector<8x128xf32>
    %270 = tpu.matmul %269, %268, %cst_99 {dimension_numbers = #tpu.dot_dimension_numbers<[1], [0], [0], [1], [0, 0, 1, 1], [], []>} : vector<8x32xbf16>, vector<32x128xbf16>, vector<8x128xf32> -> vector<8x128xf32>
    %c0_100 = arith.constant 0 : index
    %c0_101 = arith.constant 0 : index
    %c0_102 = arith.constant 0 : index
    %271 = vector.load %arg12[%c0_100, %c0_101, %c0_102] : memref<2x1x128xf32, #tpu.memory_space<vmem>>, vector<1x1x128xf32>
    %272 = vector.shape_cast %271 : vector<1x1x128xf32> to vector<1x128xf32>
    %273 = vector.broadcast %272 : vector<1x128xf32> to vector<8x128xf32>
    %274 = arith.addf %270, %273 : vector<8x128xf32>
    %cst_103 = arith.constant 0.000000e+00 : f32
    %275 = vector.broadcast %cst_103 : f32 to vector<8x128xf32>
    %276 = arith.maximumf %274, %275 : vector<8x128xf32>
    %c0_104 = arith.constant 0 : index
    %c0_105 = arith.constant 0 : index
    %c0_106 = arith.constant 0 : index
    %277 = vector.load %arg13[%c0_104, %c0_105, %c0_106] : memref<2x128x32xbf16, #tpu.memory_space<vmem>>, vector<1x128x32xbf16>
    %278 = vector.shape_cast %277 : vector<1x128x32xbf16> to vector<128x32xbf16>
    %279 = arith.truncf %276 : vector<8x128xf32> to vector<8x128xbf16>
    %cst_107 = arith.constant dense<0.000000e+00> : vector<8x32xf32>
    %280 = tpu.matmul %279, %278, %cst_107 {dimension_numbers = #tpu.dot_dimension_numbers<[1], [0], [0], [1], [0, 0, 1, 1], [], []>} : vector<8x128xbf16>, vector<128x32xbf16>, vector<8x32xf32> -> vector<8x32xf32>
    %c0_108 = arith.constant 0 : index
    %c0_109 = arith.constant 0 : index
    %c0_110 = arith.constant 0 : index
    %281 = vector.load %arg14[%c0_108, %c0_109, %c0_110] : memref<2x1x32xf32, #tpu.memory_space<vmem>>, vector<1x1x32xf32>
    %282 = vector.shape_cast %281 : vector<1x1x32xf32> to vector<1x32xf32>
    %283 = vector.broadcast %282 : vector<1x32xf32> to vector<8x32xf32>
    %284 = arith.addf %280, %283 : vector<8x32xf32>
    %285 = arith.addf %284, %266 : vector<8x32xf32>
    %c0_111 = arith.constant 0 : index
    %c0_112 = arith.constant 0 : index
    %c0_113 = arith.constant 0 : index
    %286 = vector.load %arg15[%c0_111, %c0_112, %c0_113] : memref<2x1x32xf32, #tpu.memory_space<vmem>>, vector<1x1x32xf32>
    %287 = vector.shape_cast %286 : vector<1x1x32xf32> to vector<1x32xf32>
    %c0_114 = arith.constant 0 : index
    %c0_115 = arith.constant 0 : index
    %c0_116 = arith.constant 0 : index
    %288 = vector.load %arg16[%c0_114, %c0_115, %c0_116] : memref<2x1x32xf32, #tpu.memory_space<vmem>>, vector<1x1x32xf32>
    %289 = vector.shape_cast %288 : vector<1x1x32xf32> to vector<1x32xf32>
    %cst_117 = arith.constant dense<0.000000e+00> : vector<8xf32>
    %290 = vector.multi_reduction <add>, %285, %cst_117 [1] : vector<8x32xf32> to vector<8xf32>
    %291 = vector.shape_cast %290 : vector<8xf32> to vector<8x1xf32>
    %cst_118 = arith.constant 3.200000e+01 : f32
    %292 = vector.broadcast %cst_118 : f32 to vector<8x1xf32>
    %293 = arith.divf %291, %292 : vector<8x1xf32>
    %294 = vector.broadcast %293 : vector<8x1xf32> to vector<8x32xf32>
    %295 = arith.subf %285, %294 : vector<8x32xf32>
    %296 = arith.mulf %295, %295 : vector<8x32xf32>
    %cst_119 = arith.constant dense<0.000000e+00> : vector<8xf32>
    %297 = vector.multi_reduction <add>, %296, %cst_119 [1] : vector<8x32xf32> to vector<8xf32>
    %298 = vector.shape_cast %297 : vector<8xf32> to vector<8x1xf32>
    %cst_120 = arith.constant 3.200000e+01 : f32
    %299 = vector.broadcast %cst_120 : f32 to vector<8x1xf32>
    %300 = arith.divf %298, %299 : vector<8x1xf32>
    %cst_121 = arith.constant 9.99999974E-6 : f32
    %301 = vector.broadcast %cst_121 : f32 to vector<8x1xf32>
    %302 = arith.addf %300, %301 : vector<8x1xf32>
    %303 = math.rsqrt %302 : vector<8x1xf32>
    %304 = vector.broadcast %303 : vector<8x1xf32> to vector<8x32xf32>
    %305 = arith.mulf %295, %304 : vector<8x32xf32>
    %306 = vector.broadcast %287 : vector<1x32xf32> to vector<8x32xf32>
    %307 = arith.mulf %305, %306 : vector<8x32xf32>
    %308 = vector.broadcast %289 : vector<1x32xf32> to vector<8x32xf32>
    %309 = arith.addf %307, %308 : vector<8x32xf32>
    %c1 = arith.constant 1 : index
    %c0_122 = arith.constant 0 : index
    %c0_123 = arith.constant 0 : index
    %310 = vector.load %arg4[%c1, %c0_122, %c0_123] : memref<2x32x96xbf16, #tpu.memory_space<vmem>>, vector<1x32x96xbf16>
    %311 = vector.shape_cast %310 : vector<1x32x96xbf16> to vector<32x96xbf16>
    %312 = arith.truncf %309 : vector<8x32xf32> to vector<8x32xbf16>
    %cst_124 = arith.constant dense<0.000000e+00> : vector<8x96xf32>
    %313 = tpu.matmul %312, %311, %cst_124 {dimension_numbers = #tpu.dot_dimension_numbers<[1], [0], [0], [1], [0, 0, 1, 1], [], []>} : vector<8x32xbf16>, vector<32x96xbf16>, vector<8x96xf32> -> vector<8x96xf32>
    %314 = vector.extract_strided_slice %313 {offsets = [0, 0], sizes = [8, 32], strides = [1, 1]} : vector<8x96xf32> to vector<8x32xf32>
    %315 = vector.extract_strided_slice %313 {offsets = [0, 32], sizes = [8, 32], strides = [1, 1]} : vector<8x96xf32> to vector<8x32xf32>
    %316 = vector.extract_strided_slice %313 {offsets = [0, 64], sizes = [8, 32], strides = [1, 1]} : vector<8x96xf32> to vector<8x32xf32>
    %317 = vector.extract_strided_slice %314 {offsets = [0, 0], sizes = [8, 8], strides = [1, 1]} : vector<8x32xf32> to vector<8x8xf32>
    %318 = arith.truncf %317 : vector<8x8xf32> to vector<8x8xbf16>
    %319 = vector.extract_strided_slice %315 {offsets = [0, 0], sizes = [8, 8], strides = [1, 1]} : vector<8x32xf32> to vector<8x8xf32>
    %320 = arith.truncf %319 : vector<8x8xf32> to vector<8x8xbf16>
    %cst_125 = arith.constant dense<0.000000e+00> : vector<8x8xf32>
    %321 = tpu.matmul %318, %320, %cst_125 {dimension_numbers = #tpu.dot_dimension_numbers<[1], [1], [0], [0], [0, 0, 1, 0], [], []>} : vector<8x8xbf16>, vector<8x8xbf16>, vector<8x8xf32> -> vector<8x8xf32>
    %cst_126 = arith.constant 0.353553385 : f32
    %322 = vector.broadcast %cst_126 : f32 to vector<8x8xf32>
    %323 = arith.mulf %321, %322 : vector<8x8xf32>
    %324 = vector.broadcast %3 : vector<8x1xf32> to vector<8x8xf32>
    %325 = arith.mulf %323, %324 : vector<8x8xf32>
    %cst_127 = arith.constant dense<0xFF800000> : vector<8xf32>
    %326 = vector.multi_reduction <maximumf>, %325, %cst_127 [1] : vector<8x8xf32> to vector<8xf32>
    %327 = vector.shape_cast %326 : vector<8xf32> to vector<8x1xf32>
    %328 = vector.broadcast %327 : vector<8x1xf32> to vector<8x8xf32>
    %329 = arith.subf %325, %328 : vector<8x8xf32>
    %330 = math.exp %329 : vector<8x8xf32>
    %cst_128 = arith.constant dense<0.000000e+00> : vector<8xf32>
    %331 = vector.multi_reduction <add>, %330, %cst_128 [1] : vector<8x8xf32> to vector<8xf32>
    %332 = vector.shape_cast %331 : vector<8xf32> to vector<8x1xf32>
    %333 = tpu.reciprocal %332 {approx = true} : vector<8x1xf32> -> vector<8x1xf32>
    %334 = vector.broadcast %333 : vector<8x1xf32> to vector<8x8xf32>
    %335 = arith.mulf %330, %334 : vector<8x8xf32>
    %336 = arith.truncf %335 : vector<8x8xf32> to vector<8x8xbf16>
    %337 = vector.extract_strided_slice %316 {offsets = [0, 0], sizes = [8, 8], strides = [1, 1]} : vector<8x32xf32> to vector<8x8xf32>
    %338 = arith.truncf %337 : vector<8x8xf32> to vector<8x8xbf16>
    %cst_129 = arith.constant dense<0.000000e+00> : vector<8x8xf32>
    %339 = tpu.matmul %336, %338, %cst_129 {dimension_numbers = #tpu.dot_dimension_numbers<[1], [0], [0], [1], [0, 0, 1, 1], [], []>} : vector<8x8xbf16>, vector<8x8xbf16>, vector<8x8xf32> -> vector<8x8xf32>
    %340 = vector.extract_strided_slice %314 {offsets = [0, 8], sizes = [8, 8], strides = [1, 1]} : vector<8x32xf32> to vector<8x8xf32>
    %341 = arith.truncf %340 : vector<8x8xf32> to vector<8x8xbf16>
    %342 = vector.extract_strided_slice %315 {offsets = [0, 8], sizes = [8, 8], strides = [1, 1]} : vector<8x32xf32> to vector<8x8xf32>
    %343 = arith.truncf %342 : vector<8x8xf32> to vector<8x8xbf16>
    %cst_130 = arith.constant dense<0.000000e+00> : vector<8x8xf32>
    %344 = tpu.matmul %341, %343, %cst_130 {dimension_numbers = #tpu.dot_dimension_numbers<[1], [1], [0], [0], [0, 0, 1, 0], [], []>} : vector<8x8xbf16>, vector<8x8xbf16>, vector<8x8xf32> -> vector<8x8xf32>
    %cst_131 = arith.constant 0.353553385 : f32
    %345 = vector.broadcast %cst_131 : f32 to vector<8x8xf32>
    %346 = arith.mulf %344, %345 : vector<8x8xf32>
    %347 = vector.broadcast %3 : vector<8x1xf32> to vector<8x8xf32>
    %348 = arith.mulf %346, %347 : vector<8x8xf32>
    %cst_132 = arith.constant dense<0xFF800000> : vector<8xf32>
    %349 = vector.multi_reduction <maximumf>, %348, %cst_132 [1] : vector<8x8xf32> to vector<8xf32>
    %350 = vector.shape_cast %349 : vector<8xf32> to vector<8x1xf32>
    %351 = vector.broadcast %350 : vector<8x1xf32> to vector<8x8xf32>
    %352 = arith.subf %348, %351 : vector<8x8xf32>
    %353 = math.exp %352 : vector<8x8xf32>
    %cst_133 = arith.constant dense<0.000000e+00> : vector<8xf32>
    %354 = vector.multi_reduction <add>, %353, %cst_133 [1] : vector<8x8xf32> to vector<8xf32>
    %355 = vector.shape_cast %354 : vector<8xf32> to vector<8x1xf32>
    %356 = tpu.reciprocal %355 {approx = true} : vector<8x1xf32> -> vector<8x1xf32>
    %357 = vector.broadcast %356 : vector<8x1xf32> to vector<8x8xf32>
    %358 = arith.mulf %353, %357 : vector<8x8xf32>
    %359 = arith.truncf %358 : vector<8x8xf32> to vector<8x8xbf16>
    %360 = vector.extract_strided_slice %316 {offsets = [0, 8], sizes = [8, 8], strides = [1, 1]} : vector<8x32xf32> to vector<8x8xf32>
    %361 = arith.truncf %360 : vector<8x8xf32> to vector<8x8xbf16>
    %cst_134 = arith.constant dense<0.000000e+00> : vector<8x8xf32>
    %362 = tpu.matmul %359, %361, %cst_134 {dimension_numbers = #tpu.dot_dimension_numbers<[1], [0], [0], [1], [0, 0, 1, 1], [], []>} : vector<8x8xbf16>, vector<8x8xbf16>, vector<8x8xf32> -> vector<8x8xf32>
    %363 = vector.extract_strided_slice %314 {offsets = [0, 16], sizes = [8, 8], strides = [1, 1]} : vector<8x32xf32> to vector<8x8xf32>
    %364 = arith.truncf %363 : vector<8x8xf32> to vector<8x8xbf16>
    %365 = vector.extract_strided_slice %315 {offsets = [0, 16], sizes = [8, 8], strides = [1, 1]} : vector<8x32xf32> to vector<8x8xf32>
    %366 = arith.truncf %365 : vector<8x8xf32> to vector<8x8xbf16>
    %cst_135 = arith.constant dense<0.000000e+00> : vector<8x8xf32>
    %367 = tpu.matmul %364, %366, %cst_135 {dimension_numbers = #tpu.dot_dimension_numbers<[1], [1], [0], [0], [0, 0, 1, 0], [], []>} : vector<8x8xbf16>, vector<8x8xbf16>, vector<8x8xf32> -> vector<8x8xf32>
    %cst_136 = arith.constant 0.353553385 : f32
    %368 = vector.broadcast %cst_136 : f32 to vector<8x8xf32>
    %369 = arith.mulf %367, %368 : vector<8x8xf32>
    %370 = vector.broadcast %3 : vector<8x1xf32> to vector<8x8xf32>
    %371 = arith.mulf %369, %370 : vector<8x8xf32>
    %cst_137 = arith.constant dense<0xFF800000> : vector<8xf32>
    %372 = vector.multi_reduction <maximumf>, %371, %cst_137 [1] : vector<8x8xf32> to vector<8xf32>
    %373 = vector.shape_cast %372 : vector<8xf32> to vector<8x1xf32>
    %374 = vector.broadcast %373 : vector<8x1xf32> to vector<8x8xf32>
    %375 = arith.subf %371, %374 : vector<8x8xf32>
    %376 = math.exp %375 : vector<8x8xf32>
    %cst_138 = arith.constant dense<0.000000e+00> : vector<8xf32>
    %377 = vector.multi_reduction <add>, %376, %cst_138 [1] : vector<8x8xf32> to vector<8xf32>
    %378 = vector.shape_cast %377 : vector<8xf32> to vector<8x1xf32>
    %379 = tpu.reciprocal %378 {approx = true} : vector<8x1xf32> -> vector<8x1xf32>
    %380 = vector.broadcast %379 : vector<8x1xf32> to vector<8x8xf32>
    %381 = arith.mulf %376, %380 : vector<8x8xf32>
    %382 = arith.truncf %381 : vector<8x8xf32> to vector<8x8xbf16>
    %383 = vector.extract_strided_slice %316 {offsets = [0, 16], sizes = [8, 8], strides = [1, 1]} : vector<8x32xf32> to vector<8x8xf32>
    %384 = arith.truncf %383 : vector<8x8xf32> to vector<8x8xbf16>
    %cst_139 = arith.constant dense<0.000000e+00> : vector<8x8xf32>
    %385 = tpu.matmul %382, %384, %cst_139 {dimension_numbers = #tpu.dot_dimension_numbers<[1], [0], [0], [1], [0, 0, 1, 1], [], []>} : vector<8x8xbf16>, vector<8x8xbf16>, vector<8x8xf32> -> vector<8x8xf32>
    %386 = vector.extract_strided_slice %314 {offsets = [0, 24], sizes = [8, 8], strides = [1, 1]} : vector<8x32xf32> to vector<8x8xf32>
    %387 = arith.truncf %386 : vector<8x8xf32> to vector<8x8xbf16>
    %388 = vector.extract_strided_slice %315 {offsets = [0, 24], sizes = [8, 8], strides = [1, 1]} : vector<8x32xf32> to vector<8x8xf32>
    %389 = arith.truncf %388 : vector<8x8xf32> to vector<8x8xbf16>
    %cst_140 = arith.constant dense<0.000000e+00> : vector<8x8xf32>
    %390 = tpu.matmul %387, %389, %cst_140 {dimension_numbers = #tpu.dot_dimension_numbers<[1], [1], [0], [0], [0, 0, 1, 0], [], []>} : vector<8x8xbf16>, vector<8x8xbf16>, vector<8x8xf32> -> vector<8x8xf32>
    %cst_141 = arith.constant 0.353553385 : f32
    %391 = vector.broadcast %cst_141 : f32 to vector<8x8xf32>
    %392 = arith.mulf %390, %391 : vector<8x8xf32>
    %393 = vector.broadcast %3 : vector<8x1xf32> to vector<8x8xf32>
    %394 = arith.mulf %392, %393 : vector<8x8xf32>
    %cst_142 = arith.constant dense<0xFF800000> : vector<8xf32>
    %395 = vector.multi_reduction <maximumf>, %394, %cst_142 [1] : vector<8x8xf32> to vector<8xf32>
    %396 = vector.shape_cast %395 : vector<8xf32> to vector<8x1xf32>
    %397 = vector.broadcast %396 : vector<8x1xf32> to vector<8x8xf32>
    %398 = arith.subf %394, %397 : vector<8x8xf32>
    %399 = math.exp %398 : vector<8x8xf32>
    %cst_143 = arith.constant dense<0.000000e+00> : vector<8xf32>
    %400 = vector.multi_reduction <add>, %399, %cst_143 [1] : vector<8x8xf32> to vector<8xf32>
    %401 = vector.shape_cast %400 : vector<8xf32> to vector<8x1xf32>
    %402 = tpu.reciprocal %401 {approx = true} : vector<8x1xf32> -> vector<8x1xf32>
    %403 = vector.broadcast %402 : vector<8x1xf32> to vector<8x8xf32>
    %404 = arith.mulf %399, %403 : vector<8x8xf32>
    %405 = arith.truncf %404 : vector<8x8xf32> to vector<8x8xbf16>
    %406 = vector.extract_strided_slice %316 {offsets = [0, 24], sizes = [8, 8], strides = [1, 1]} : vector<8x32xf32> to vector<8x8xf32>
    %407 = arith.truncf %406 : vector<8x8xf32> to vector<8x8xbf16>
    %cst_144 = arith.constant dense<0.000000e+00> : vector<8x8xf32>
    %408 = tpu.matmul %405, %407, %cst_144 {dimension_numbers = #tpu.dot_dimension_numbers<[1], [0], [0], [1], [0, 0, 1, 1], [], []>} : vector<8x8xbf16>, vector<8x8xbf16>, vector<8x8xf32> -> vector<8x8xf32>
    %409 = tpu.concatenate %339, %362, %385, %408 in 1 : vector<8x8xf32>, vector<8x8xf32>, vector<8x8xf32>, vector<8x8xf32> -> vector<8x32xf32>
    %c1_145 = arith.constant 1 : index
    %c0_146 = arith.constant 0 : index
    %c0_147 = arith.constant 0 : index
    %410 = vector.load %arg5[%c1_145, %c0_146, %c0_147] : memref<2x32x32xbf16, #tpu.memory_space<vmem>>, vector<1x32x32xbf16>
    %411 = vector.shape_cast %410 : vector<1x32x32xbf16> to vector<32x32xbf16>
    %412 = arith.truncf %409 : vector<8x32xf32> to vector<8x32xbf16>
    %cst_148 = arith.constant dense<0.000000e+00> : vector<8x32xf32>
    %413 = tpu.matmul %412, %411, %cst_148 {dimension_numbers = #tpu.dot_dimension_numbers<[1], [0], [0], [1], [0, 0, 1, 1], [], []>} : vector<8x32xbf16>, vector<32x32xbf16>, vector<8x32xf32> -> vector<8x32xf32>
    %c1_149 = arith.constant 1 : index
    %c0_150 = arith.constant 0 : index
    %c0_151 = arith.constant 0 : index
    %414 = vector.load %arg6[%c1_149, %c0_150, %c0_151] : memref<2x1x32xf32, #tpu.memory_space<vmem>>, vector<1x1x32xf32>
    %415 = vector.shape_cast %414 : vector<1x1x32xf32> to vector<1x32xf32>
    %416 = vector.broadcast %415 : vector<1x32xf32> to vector<8x32xf32>
    %417 = arith.addf %413, %416 : vector<8x32xf32>
    %418 = arith.addf %417, %309 : vector<8x32xf32>
    %c1_152 = arith.constant 1 : index
    %c0_153 = arith.constant 0 : index
    %c0_154 = arith.constant 0 : index
    %419 = vector.load %arg15[%c1_152, %c0_153, %c0_154] : memref<2x1x32xf32, #tpu.memory_space<vmem>>, vector<1x1x32xf32>
    %420 = vector.shape_cast %419 : vector<1x1x32xf32> to vector<1x32xf32>
    %c1_155 = arith.constant 1 : index
    %c0_156 = arith.constant 0 : index
    %c0_157 = arith.constant 0 : index
    %421 = vector.load %arg16[%c1_155, %c0_156, %c0_157] : memref<2x1x32xf32, #tpu.memory_space<vmem>>, vector<1x1x32xf32>
    %422 = vector.shape_cast %421 : vector<1x1x32xf32> to vector<1x32xf32>
    %cst_158 = arith.constant dense<0.000000e+00> : vector<8xf32>
    %423 = vector.multi_reduction <add>, %418, %cst_158 [1] : vector<8x32xf32> to vector<8xf32>
    %424 = vector.shape_cast %423 : vector<8xf32> to vector<8x1xf32>
    %cst_159 = arith.constant 3.200000e+01 : f32
    %425 = vector.broadcast %cst_159 : f32 to vector<8x1xf32>
    %426 = arith.divf %424, %425 : vector<8x1xf32>
    %427 = vector.broadcast %426 : vector<8x1xf32> to vector<8x32xf32>
    %428 = arith.subf %418, %427 : vector<8x32xf32>
    %429 = arith.mulf %428, %428 : vector<8x32xf32>
    %cst_160 = arith.constant dense<0.000000e+00> : vector<8xf32>
    %430 = vector.multi_reduction <add>, %429, %cst_160 [1] : vector<8x32xf32> to vector<8xf32>
    %431 = vector.shape_cast %430 : vector<8xf32> to vector<8x1xf32>
    %cst_161 = arith.constant 3.200000e+01 : f32
    %432 = vector.broadcast %cst_161 : f32 to vector<8x1xf32>
    %433 = arith.divf %431, %432 : vector<8x1xf32>
    %cst_162 = arith.constant 9.99999974E-6 : f32
    %434 = vector.broadcast %cst_162 : f32 to vector<8x1xf32>
    %435 = arith.addf %433, %434 : vector<8x1xf32>
    %436 = math.rsqrt %435 : vector<8x1xf32>
    %437 = vector.broadcast %436 : vector<8x1xf32> to vector<8x32xf32>
    %438 = arith.mulf %428, %437 : vector<8x32xf32>
    %439 = vector.broadcast %420 : vector<1x32xf32> to vector<8x32xf32>
    %440 = arith.mulf %438, %439 : vector<8x32xf32>
    %441 = vector.broadcast %422 : vector<1x32xf32> to vector<8x32xf32>
    %442 = arith.addf %440, %441 : vector<8x32xf32>
    %c1_163 = arith.constant 1 : index
    %c0_164 = arith.constant 0 : index
    %c0_165 = arith.constant 0 : index
    %c0_166 = arith.constant 0 : index
    %443 = vector.load %arg3[%c1_163, %c0_164, %c0_165, %c0_166] : memref<2x1x8x32xf32, #tpu.memory_space<vmem>>, vector<1x1x8x32xf32>
    %444 = vector.shape_cast %443 : vector<1x1x8x32xf32> to vector<8x32xf32>
    %c1_167 = arith.constant 1 : index
    %c0_168 = arith.constant 0 : index
    %c0_169 = arith.constant 0 : index
    %445 = vector.load %arg7[%c1_167, %c0_168, %c0_169] : memref<2x32x64xbf16, #tpu.memory_space<vmem>>, vector<1x32x64xbf16>
    %446 = vector.shape_cast %445 : vector<1x32x64xbf16> to vector<32x64xbf16>
    %447 = arith.truncf %444 : vector<8x32xf32> to vector<8x32xbf16>
    %cst_170 = arith.constant dense<0.000000e+00> : vector<8x64xf32>
    %448 = tpu.matmul %447, %446, %cst_170 {dimension_numbers = #tpu.dot_dimension_numbers<[1], [0], [0], [1], [0, 0, 1, 1], [], []>} : vector<8x32xbf16>, vector<32x64xbf16>, vector<8x64xf32> -> vector<8x64xf32>
    %c1_171 = arith.constant 1 : index
    %c0_172 = arith.constant 0 : index
    %c0_173 = arith.constant 0 : index
    %449 = vector.load %arg8[%c1_171, %c0_172, %c0_173] : memref<2x32x32xbf16, #tpu.memory_space<vmem>>, vector<1x32x32xbf16>
    %450 = vector.shape_cast %449 : vector<1x32x32xbf16> to vector<32x32xbf16>
    %451 = arith.truncf %442 : vector<8x32xf32> to vector<8x32xbf16>
    %cst_174 = arith.constant dense<0.000000e+00> : vector<8x32xf32>
    %452 = tpu.matmul %451, %450, %cst_174 {dimension_numbers = #tpu.dot_dimension_numbers<[1], [0], [0], [1], [0, 0, 1, 1], [], []>} : vector<8x32xbf16>, vector<32x32xbf16>, vector<8x32xf32> -> vector<8x32xf32>
    %453 = vector.extract_strided_slice %448 {offsets = [0, 0], sizes = [8, 32], strides = [1, 1]} : vector<8x64xf32> to vector<8x32xf32>
    %454 = vector.extract_strided_slice %448 {offsets = [0, 32], sizes = [8, 32], strides = [1, 1]} : vector<8x64xf32> to vector<8x32xf32>
    %455 = vector.extract_strided_slice %453 {offsets = [0, 0], sizes = [8, 8], strides = [1, 1]} : vector<8x32xf32> to vector<8x8xf32>
    %456 = arith.truncf %455 : vector<8x8xf32> to vector<8x8xbf16>
    %457 = vector.extract_strided_slice %454 {offsets = [0, 0], sizes = [8, 8], strides = [1, 1]} : vector<8x32xf32> to vector<8x8xf32>
    %458 = arith.truncf %457 : vector<8x8xf32> to vector<8x8xbf16>
    %cst_175 = arith.constant dense<0.000000e+00> : vector<8x8xf32>
    %459 = tpu.matmul %456, %458, %cst_175 {dimension_numbers = #tpu.dot_dimension_numbers<[1], [1], [0], [0], [0, 0, 1, 0], [], []>} : vector<8x8xbf16>, vector<8x8xbf16>, vector<8x8xf32> -> vector<8x8xf32>
    %cst_176 = arith.constant 0.353553385 : f32
    %460 = vector.broadcast %cst_176 : f32 to vector<8x8xf32>
    %461 = arith.mulf %459, %460 : vector<8x8xf32>
    %cst_177 = arith.constant dense<0xFF800000> : vector<8xf32>
    %462 = vector.multi_reduction <maximumf>, %461, %cst_177 [1] : vector<8x8xf32> to vector<8xf32>
    %463 = vector.shape_cast %462 : vector<8xf32> to vector<8x1xf32>
    %464 = vector.broadcast %463 : vector<8x1xf32> to vector<8x8xf32>
    %465 = arith.subf %461, %464 : vector<8x8xf32>
    %466 = math.exp %465 : vector<8x8xf32>
    %cst_178 = arith.constant dense<0.000000e+00> : vector<8xf32>
    %467 = vector.multi_reduction <add>, %466, %cst_178 [1] : vector<8x8xf32> to vector<8xf32>
    %468 = vector.shape_cast %467 : vector<8xf32> to vector<8x1xf32>
    %469 = tpu.reciprocal %468 {approx = true} : vector<8x1xf32> -> vector<8x1xf32>
    %470 = vector.broadcast %469 : vector<8x1xf32> to vector<8x8xf32>
    %471 = arith.mulf %466, %470 : vector<8x8xf32>
    %472 = arith.truncf %471 : vector<8x8xf32> to vector<8x8xbf16>
    %473 = vector.extract_strided_slice %452 {offsets = [0, 0], sizes = [8, 8], strides = [1, 1]} : vector<8x32xf32> to vector<8x8xf32>
    %474 = arith.truncf %473 : vector<8x8xf32> to vector<8x8xbf16>
    %cst_179 = arith.constant dense<0.000000e+00> : vector<8x8xf32>
    %475 = tpu.matmul %472, %474, %cst_179 {dimension_numbers = #tpu.dot_dimension_numbers<[1], [0], [0], [1], [0, 0, 1, 1], [], []>} : vector<8x8xbf16>, vector<8x8xbf16>, vector<8x8xf32> -> vector<8x8xf32>
    %476 = vector.extract_strided_slice %453 {offsets = [0, 8], sizes = [8, 8], strides = [1, 1]} : vector<8x32xf32> to vector<8x8xf32>
    %477 = arith.truncf %476 : vector<8x8xf32> to vector<8x8xbf16>
    %478 = vector.extract_strided_slice %454 {offsets = [0, 8], sizes = [8, 8], strides = [1, 1]} : vector<8x32xf32> to vector<8x8xf32>
    %479 = arith.truncf %478 : vector<8x8xf32> to vector<8x8xbf16>
    %cst_180 = arith.constant dense<0.000000e+00> : vector<8x8xf32>
    %480 = tpu.matmul %477, %479, %cst_180 {dimension_numbers = #tpu.dot_dimension_numbers<[1], [1], [0], [0], [0, 0, 1, 0], [], []>} : vector<8x8xbf16>, vector<8x8xbf16>, vector<8x8xf32> -> vector<8x8xf32>
    %cst_181 = arith.constant 0.353553385 : f32
    %481 = vector.broadcast %cst_181 : f32 to vector<8x8xf32>
    %482 = arith.mulf %480, %481 : vector<8x8xf32>
    %cst_182 = arith.constant dense<0xFF800000> : vector<8xf32>
    %483 = vector.multi_reduction <maximumf>, %482, %cst_182 [1] : vector<8x8xf32> to vector<8xf32>
    %484 = vector.shape_cast %483 : vector<8xf32> to vector<8x1xf32>
    %485 = vector.broadcast %484 : vector<8x1xf32> to vector<8x8xf32>
    %486 = arith.subf %482, %485 : vector<8x8xf32>
    %487 = math.exp %486 : vector<8x8xf32>
    %cst_183 = arith.constant dense<0.000000e+00> : vector<8xf32>
    %488 = vector.multi_reduction <add>, %487, %cst_183 [1] : vector<8x8xf32> to vector<8xf32>
    %489 = vector.shape_cast %488 : vector<8xf32> to vector<8x1xf32>
    %490 = tpu.reciprocal %489 {approx = true} : vector<8x1xf32> -> vector<8x1xf32>
    %491 = vector.broadcast %490 : vector<8x1xf32> to vector<8x8xf32>
    %492 = arith.mulf %487, %491 : vector<8x8xf32>
    %493 = arith.truncf %492 : vector<8x8xf32> to vector<8x8xbf16>
    %494 = vector.extract_strided_slice %452 {offsets = [0, 8], sizes = [8, 8], strides = [1, 1]} : vector<8x32xf32> to vector<8x8xf32>
    %495 = arith.truncf %494 : vector<8x8xf32> to vector<8x8xbf16>
    %cst_184 = arith.constant dense<0.000000e+00> : vector<8x8xf32>
    %496 = tpu.matmul %493, %495, %cst_184 {dimension_numbers = #tpu.dot_dimension_numbers<[1], [0], [0], [1], [0, 0, 1, 1], [], []>} : vector<8x8xbf16>, vector<8x8xbf16>, vector<8x8xf32> -> vector<8x8xf32>
    %497 = vector.extract_strided_slice %453 {offsets = [0, 16], sizes = [8, 8], strides = [1, 1]} : vector<8x32xf32> to vector<8x8xf32>
    %498 = arith.truncf %497 : vector<8x8xf32> to vector<8x8xbf16>
    %499 = vector.extract_strided_slice %454 {offsets = [0, 16], sizes = [8, 8], strides = [1, 1]} : vector<8x32xf32> to vector<8x8xf32>
    %500 = arith.truncf %499 : vector<8x8xf32> to vector<8x8xbf16>
    %cst_185 = arith.constant dense<0.000000e+00> : vector<8x8xf32>
    %501 = tpu.matmul %498, %500, %cst_185 {dimension_numbers = #tpu.dot_dimension_numbers<[1], [1], [0], [0], [0, 0, 1, 0], [], []>} : vector<8x8xbf16>, vector<8x8xbf16>, vector<8x8xf32> -> vector<8x8xf32>
    %cst_186 = arith.constant 0.353553385 : f32
    %502 = vector.broadcast %cst_186 : f32 to vector<8x8xf32>
    %503 = arith.mulf %501, %502 : vector<8x8xf32>
    %cst_187 = arith.constant dense<0xFF800000> : vector<8xf32>
    %504 = vector.multi_reduction <maximumf>, %503, %cst_187 [1] : vector<8x8xf32> to vector<8xf32>
    %505 = vector.shape_cast %504 : vector<8xf32> to vector<8x1xf32>
    %506 = vector.broadcast %505 : vector<8x1xf32> to vector<8x8xf32>
    %507 = arith.subf %503, %506 : vector<8x8xf32>
    %508 = math.exp %507 : vector<8x8xf32>
    %cst_188 = arith.constant dense<0.000000e+00> : vector<8xf32>
    %509 = vector.multi_reduction <add>, %508, %cst_188 [1] : vector<8x8xf32> to vector<8xf32>
    %510 = vector.shape_cast %509 : vector<8xf32> to vector<8x1xf32>
    %511 = tpu.reciprocal %510 {approx = true} : vector<8x1xf32> -> vector<8x1xf32>
    %512 = vector.broadcast %511 : vector<8x1xf32> to vector<8x8xf32>
    %513 = arith.mulf %508, %512 : vector<8x8xf32>
    %514 = arith.truncf %513 : vector<8x8xf32> to vector<8x8xbf16>
    %515 = vector.extract_strided_slice %452 {offsets = [0, 16], sizes = [8, 8], strides = [1, 1]} : vector<8x32xf32> to vector<8x8xf32>
    %516 = arith.truncf %515 : vector<8x8xf32> to vector<8x8xbf16>
    %cst_189 = arith.constant dense<0.000000e+00> : vector<8x8xf32>
    %517 = tpu.matmul %514, %516, %cst_189 {dimension_numbers = #tpu.dot_dimension_numbers<[1], [0], [0], [1], [0, 0, 1, 1], [], []>} : vector<8x8xbf16>, vector<8x8xbf16>, vector<8x8xf32> -> vector<8x8xf32>
    %518 = vector.extract_strided_slice %453 {offsets = [0, 24], sizes = [8, 8], strides = [1, 1]} : vector<8x32xf32> to vector<8x8xf32>
    %519 = arith.truncf %518 : vector<8x8xf32> to vector<8x8xbf16>
    %520 = vector.extract_strided_slice %454 {offsets = [0, 24], sizes = [8, 8], strides = [1, 1]} : vector<8x32xf32> to vector<8x8xf32>
    %521 = arith.truncf %520 : vector<8x8xf32> to vector<8x8xbf16>
    %cst_190 = arith.constant dense<0.000000e+00> : vector<8x8xf32>
    %522 = tpu.matmul %519, %521, %cst_190 {dimension_numbers = #tpu.dot_dimension_numbers<[1], [1], [0], [0], [0, 0, 1, 0], [], []>} : vector<8x8xbf16>, vector<8x8xbf16>, vector<8x8xf32> -> vector<8x8xf32>
    %cst_191 = arith.constant 0.353553385 : f32
    %523 = vector.broadcast %cst_191 : f32 to vector<8x8xf32>
    %524 = arith.mulf %522, %523 : vector<8x8xf32>
    %cst_192 = arith.constant dense<0xFF800000> : vector<8xf32>
    %525 = vector.multi_reduction <maximumf>, %524, %cst_192 [1] : vector<8x8xf32> to vector<8xf32>
    %526 = vector.shape_cast %525 : vector<8xf32> to vector<8x1xf32>
    %527 = vector.broadcast %526 : vector<8x1xf32> to vector<8x8xf32>
    %528 = arith.subf %524, %527 : vector<8x8xf32>
    %529 = math.exp %528 : vector<8x8xf32>
    %cst_193 = arith.constant dense<0.000000e+00> : vector<8xf32>
    %530 = vector.multi_reduction <add>, %529, %cst_193 [1] : vector<8x8xf32> to vector<8xf32>
    %531 = vector.shape_cast %530 : vector<8xf32> to vector<8x1xf32>
    %532 = tpu.reciprocal %531 {approx = true} : vector<8x1xf32> -> vector<8x1xf32>
    %533 = vector.broadcast %532 : vector<8x1xf32> to vector<8x8xf32>
    %534 = arith.mulf %529, %533 : vector<8x8xf32>
    %535 = arith.truncf %534 : vector<8x8xf32> to vector<8x8xbf16>
    %536 = vector.extract_strided_slice %452 {offsets = [0, 24], sizes = [8, 8], strides = [1, 1]} : vector<8x32xf32> to vector<8x8xf32>
    %537 = arith.truncf %536 : vector<8x8xf32> to vector<8x8xbf16>
    %cst_194 = arith.constant dense<0.000000e+00> : vector<8x8xf32>
    %538 = tpu.matmul %535, %537, %cst_194 {dimension_numbers = #tpu.dot_dimension_numbers<[1], [0], [0], [1], [0, 0, 1, 1], [], []>} : vector<8x8xbf16>, vector<8x8xbf16>, vector<8x8xf32> -> vector<8x8xf32>
    %539 = tpu.concatenate %475, %496, %517, %538 in 1 : vector<8x8xf32>, vector<8x8xf32>, vector<8x8xf32>, vector<8x8xf32> -> vector<8x32xf32>
    %c1_195 = arith.constant 1 : index
    %c0_196 = arith.constant 0 : index
    %c0_197 = arith.constant 0 : index
    %540 = vector.load %arg9[%c1_195, %c0_196, %c0_197] : memref<2x32x32xbf16, #tpu.memory_space<vmem>>, vector<1x32x32xbf16>
    %541 = vector.shape_cast %540 : vector<1x32x32xbf16> to vector<32x32xbf16>
    %542 = arith.truncf %539 : vector<8x32xf32> to vector<8x32xbf16>
    %cst_198 = arith.constant dense<0.000000e+00> : vector<8x32xf32>
    %543 = tpu.matmul %542, %541, %cst_198 {dimension_numbers = #tpu.dot_dimension_numbers<[1], [0], [0], [1], [0, 0, 1, 1], [], []>} : vector<8x32xbf16>, vector<32x32xbf16>, vector<8x32xf32> -> vector<8x32xf32>
    %c1_199 = arith.constant 1 : index
    %c0_200 = arith.constant 0 : index
    %c0_201 = arith.constant 0 : index
    %544 = vector.load %arg10[%c1_199, %c0_200, %c0_201] : memref<2x1x32xf32, #tpu.memory_space<vmem>>, vector<1x1x32xf32>
    %545 = vector.shape_cast %544 : vector<1x1x32xf32> to vector<1x32xf32>
    %546 = vector.broadcast %545 : vector<1x32xf32> to vector<8x32xf32>
    %547 = arith.addf %543, %546 : vector<8x32xf32>
    %548 = arith.addf %547, %442 : vector<8x32xf32>
    %c1_202 = arith.constant 1 : index
    %c0_203 = arith.constant 0 : index
    %c0_204 = arith.constant 0 : index
    %549 = vector.load %arg15[%c1_202, %c0_203, %c0_204] : memref<2x1x32xf32, #tpu.memory_space<vmem>>, vector<1x1x32xf32>
    %550 = vector.shape_cast %549 : vector<1x1x32xf32> to vector<1x32xf32>
    %c1_205 = arith.constant 1 : index
    %c0_206 = arith.constant 0 : index
    %c0_207 = arith.constant 0 : index
    %551 = vector.load %arg16[%c1_205, %c0_206, %c0_207] : memref<2x1x32xf32, #tpu.memory_space<vmem>>, vector<1x1x32xf32>
    %552 = vector.shape_cast %551 : vector<1x1x32xf32> to vector<1x32xf32>
    %cst_208 = arith.constant dense<0.000000e+00> : vector<8xf32>
    %553 = vector.multi_reduction <add>, %548, %cst_208 [1] : vector<8x32xf32> to vector<8xf32>
    %554 = vector.shape_cast %553 : vector<8xf32> to vector<8x1xf32>
    %cst_209 = arith.constant 3.200000e+01 : f32
    %555 = vector.broadcast %cst_209 : f32 to vector<8x1xf32>
    %556 = arith.divf %554, %555 : vector<8x1xf32>
    %557 = vector.broadcast %556 : vector<8x1xf32> to vector<8x32xf32>
    %558 = arith.subf %548, %557 : vector<8x32xf32>
    %559 = arith.mulf %558, %558 : vector<8x32xf32>
    %cst_210 = arith.constant dense<0.000000e+00> : vector<8xf32>
    %560 = vector.multi_reduction <add>, %559, %cst_210 [1] : vector<8x32xf32> to vector<8xf32>
    %561 = vector.shape_cast %560 : vector<8xf32> to vector<8x1xf32>
    %cst_211 = arith.constant 3.200000e+01 : f32
    %562 = vector.broadcast %cst_211 : f32 to vector<8x1xf32>
    %563 = arith.divf %561, %562 : vector<8x1xf32>
    %cst_212 = arith.constant 9.99999974E-6 : f32
    %564 = vector.broadcast %cst_212 : f32 to vector<8x1xf32>
    %565 = arith.addf %563, %564 : vector<8x1xf32>
    %566 = math.rsqrt %565 : vector<8x1xf32>
    %567 = vector.broadcast %566 : vector<8x1xf32> to vector<8x32xf32>
    %568 = arith.mulf %558, %567 : vector<8x32xf32>
    %569 = vector.broadcast %550 : vector<1x32xf32> to vector<8x32xf32>
    %570 = arith.mulf %568, %569 : vector<8x32xf32>
    %571 = vector.broadcast %552 : vector<1x32xf32> to vector<8x32xf32>
    %572 = arith.addf %570, %571 : vector<8x32xf32>
    %c1_213 = arith.constant 1 : index
    %c0_214 = arith.constant 0 : index
    %c0_215 = arith.constant 0 : index
    %573 = vector.load %arg11[%c1_213, %c0_214, %c0_215] : memref<2x32x128xbf16, #tpu.memory_space<vmem>>, vector<1x32x128xbf16>
    %574 = vector.shape_cast %573 : vector<1x32x128xbf16> to vector<32x128xbf16>
    %575 = arith.truncf %572 : vector<8x32xf32> to vector<8x32xbf16>
    %cst_216 = arith.constant dense<0.000000e+00> : vector<8x128xf32>
    %576 = tpu.matmul %575, %574, %cst_216 {dimension_numbers = #tpu.dot_dimension_numbers<[1], [0], [0], [1], [0, 0, 1, 1], [], []>} : vector<8x32xbf16>, vector<32x128xbf16>, vector<8x128xf32> -> vector<8x128xf32>
    %c1_217 = arith.constant 1 : index
    %c0_218 = arith.constant 0 : index
    %c0_219 = arith.constant 0 : index
    %577 = vector.load %arg12[%c1_217, %c0_218, %c0_219] : memref<2x1x128xf32, #tpu.memory_space<vmem>>, vector<1x1x128xf32>
    %578 = vector.shape_cast %577 : vector<1x1x128xf32> to vector<1x128xf32>
    %579 = vector.broadcast %578 : vector<1x128xf32> to vector<8x128xf32>
    %580 = arith.addf %576, %579 : vector<8x128xf32>
    %cst_220 = arith.constant 0.000000e+00 : f32
    %581 = vector.broadcast %cst_220 : f32 to vector<8x128xf32>
    %582 = arith.maximumf %580, %581 : vector<8x128xf32>
    %c1_221 = arith.constant 1 : index
    %c0_222 = arith.constant 0 : index
    %c0_223 = arith.constant 0 : index
    %583 = vector.load %arg13[%c1_221, %c0_222, %c0_223] : memref<2x128x32xbf16, #tpu.memory_space<vmem>>, vector<1x128x32xbf16>
    %584 = vector.shape_cast %583 : vector<1x128x32xbf16> to vector<128x32xbf16>
    %585 = arith.truncf %582 : vector<8x128xf32> to vector<8x128xbf16>
    %cst_224 = arith.constant dense<0.000000e+00> : vector<8x32xf32>
    %586 = tpu.matmul %585, %584, %cst_224 {dimension_numbers = #tpu.dot_dimension_numbers<[1], [0], [0], [1], [0, 0, 1, 1], [], []>} : vector<8x128xbf16>, vector<128x32xbf16>, vector<8x32xf32> -> vector<8x32xf32>
    %c1_225 = arith.constant 1 : index
    %c0_226 = arith.constant 0 : index
    %c0_227 = arith.constant 0 : index
    %587 = vector.load %arg14[%c1_225, %c0_226, %c0_227] : memref<2x1x32xf32, #tpu.memory_space<vmem>>, vector<1x1x32xf32>
    %588 = vector.shape_cast %587 : vector<1x1x32xf32> to vector<1x32xf32>
    %589 = vector.broadcast %588 : vector<1x32xf32> to vector<8x32xf32>
    %590 = arith.addf %586, %589 : vector<8x32xf32>
    %591 = arith.addf %590, %572 : vector<8x32xf32>
    %c1_228 = arith.constant 1 : index
    %c0_229 = arith.constant 0 : index
    %c0_230 = arith.constant 0 : index
    %592 = vector.load %arg15[%c1_228, %c0_229, %c0_230] : memref<2x1x32xf32, #tpu.memory_space<vmem>>, vector<1x1x32xf32>
    %593 = vector.shape_cast %592 : vector<1x1x32xf32> to vector<1x32xf32>
    %c1_231 = arith.constant 1 : index
    %c0_232 = arith.constant 0 : index
    %c0_233 = arith.constant 0 : index
    %594 = vector.load %arg16[%c1_231, %c0_232, %c0_233] : memref<2x1x32xf32, #tpu.memory_space<vmem>>, vector<1x1x32xf32>
    %595 = vector.shape_cast %594 : vector<1x1x32xf32> to vector<1x32xf32>
    %cst_234 = arith.constant dense<0.000000e+00> : vector<8xf32>
    %596 = vector.multi_reduction <add>, %591, %cst_234 [1] : vector<8x32xf32> to vector<8xf32>
    %597 = vector.shape_cast %596 : vector<8xf32> to vector<8x1xf32>
    %cst_235 = arith.constant 3.200000e+01 : f32
    %598 = vector.broadcast %cst_235 : f32 to vector<8x1xf32>
    %599 = arith.divf %597, %598 : vector<8x1xf32>
    %600 = vector.broadcast %599 : vector<8x1xf32> to vector<8x32xf32>
    %601 = arith.subf %591, %600 : vector<8x32xf32>
    %602 = arith.mulf %601, %601 : vector<8x32xf32>
    %cst_236 = arith.constant dense<0.000000e+00> : vector<8xf32>
    %603 = vector.multi_reduction <add>, %602, %cst_236 [1] : vector<8x32xf32> to vector<8xf32>
    %604 = vector.shape_cast %603 : vector<8xf32> to vector<8x1xf32>
    %cst_237 = arith.constant 3.200000e+01 : f32
    %605 = vector.broadcast %cst_237 : f32 to vector<8x1xf32>
    %606 = arith.divf %604, %605 : vector<8x1xf32>
    %cst_238 = arith.constant 9.99999974E-6 : f32
    %607 = vector.broadcast %cst_238 : f32 to vector<8x1xf32>
    %608 = arith.addf %606, %607 : vector<8x1xf32>
    %609 = math.rsqrt %608 : vector<8x1xf32>
    %610 = vector.broadcast %609 : vector<8x1xf32> to vector<8x32xf32>
    %611 = arith.mulf %601, %610 : vector<8x32xf32>
    %612 = vector.broadcast %593 : vector<1x32xf32> to vector<8x32xf32>
    %613 = arith.mulf %611, %612 : vector<8x32xf32>
    %614 = vector.broadcast %595 : vector<1x32xf32> to vector<8x32xf32>
    %615 = arith.addf %613, %614 : vector<8x32xf32>
    %c0_239 = arith.constant 0 : index
    %c0_240 = arith.constant 0 : index
    %616 = vector.load %arg17[%c0_239, %c0_240] : memref<32x16xbf16, #tpu.memory_space<vmem>>, vector<32x16xbf16>
    %617 = arith.truncf %615 : vector<8x32xf32> to vector<8x32xbf16>
    %cst_241 = arith.constant dense<0.000000e+00> : vector<8x16xf32>
    %618 = tpu.matmul %617, %616, %cst_241 {dimension_numbers = #tpu.dot_dimension_numbers<[1], [0], [0], [1], [0, 0, 1, 1], [], []>} : vector<8x32xbf16>, vector<32x16xbf16>, vector<8x16xf32> -> vector<8x16xf32>
    %c0_242 = arith.constant 0 : index
    %c0_243 = arith.constant 0 : index
    %619 = vector.load %arg18[%c0_242, %c0_243] : memref<1x16xf32, #tpu.memory_space<vmem>>, vector<1x16xf32>
    %620 = vector.broadcast %619 : vector<1x16xf32> to vector<8x16xf32>
    %621 = arith.addf %618, %620 : vector<8x16xf32>
    %cst_244 = arith.constant dense<0xFF800000> : vector<8xf32>
    %622 = vector.multi_reduction <maximumf>, %621, %cst_244 [1] : vector<8x16xf32> to vector<8xf32>
    %623 = vector.shape_cast %622 : vector<8xf32> to vector<8x1xf32>
    %624 = vector.broadcast %623 : vector<8x1xf32> to vector<8x16xf32>
    %625 = arith.subf %621, %624 : vector<8x16xf32>
    %626 = math.exp %625 : vector<8x16xf32>
    %cst_245 = arith.constant dense<0.000000e+00> : vector<8xf32>
    %627 = vector.multi_reduction <add>, %626, %cst_245 [1] : vector<8x16xf32> to vector<8xf32>
    %628 = vector.shape_cast %627 : vector<8xf32> to vector<8x1xf32>
    %629 = tpu.reciprocal %628 {approx = true} : vector<8x1xf32> -> vector<8x1xf32>
    %630 = vector.broadcast %629 : vector<8x1xf32> to vector<8x16xf32>
    %631 = arith.mulf %626, %630 : vector<8x16xf32>
    %c0_246 = arith.constant 0 : index
    %c0_247 = arith.constant 0 : index
    %c0_248 = arith.constant 0 : index
    %632 = vector.load %arg19[%c0_246, %c0_247, %c0_248] : memref<1x8x16xf32, #tpu.memory_space<vmem>>, vector<1x8x16xf32>
    %633 = vector.shape_cast %632 : vector<1x8x16xf32> to vector<8x16xf32>
    %634 = vector.shape_cast %631 : vector<8x16xf32> to vector<1x8x16xf32>
    tpu.vector_store %arg19[%c0_246, %c0_247, %c0_248], %634 {strides = array<i32>} : memref<1x8x16xf32, #tpu.memory_space<vmem>>, vector<1x8x16xf32>,
    return
  }
  func.func @transform_0(%arg0: i32) -> (i32, i32, i32) {
    %c0_i32 = arith.constant 0 : i32
    %c0_i32_0 = arith.constant 0 : i32
    %c0_i32_1 = arith.constant 0 : i32
    return %arg0, %c0_i32, %c0_i32_0 : i32, i32, i32
  }
  func.func @transform_1(%arg0: i32) -> (i32, i32, i32) {
    %c0_i32 = arith.constant 0 : i32
    %c0_i32_0 = arith.constant 0 : i32
    %c0_i32_1 = arith.constant 0 : i32
    return %arg0, %c0_i32, %c0_i32_0 : i32, i32, i32
  }
  func.func @transform_2(%arg0: i32) -> (i32, i32, i32, i32) {
    %c0_i32 = arith.constant 0 : i32
    %c0_i32_0 = arith.constant 0 : i32
    %c0_i32_1 = arith.constant 0 : i32
    %c0_i32_2 = arith.constant 0 : i32
    return %c0_i32, %arg0, %c0_i32_0, %c0_i32_1 : i32, i32, i32, i32
  }
  func.func @transform_3(%arg0: i32) -> (i32, i32, i32) {
    %c0_i32 = arith.constant 0 : i32
    %c0_i32_0 = arith.constant 0 : i32
    %c0_i32_1 = arith.constant 0 : i32
    %c0_i32_2 = arith.constant 0 : i32
    return %c0_i32, %c0_i32_0, %c0_i32_1 : i32, i32, i32
  }
  func.func @transform_4(%arg0: i32) -> (i32, i32, i32) {
    %c0_i32 = arith.constant 0 : i32
    %c0_i32_0 = arith.constant 0 : i32
    %c0_i32_1 = arith.constant 0 : i32
    %c0_i32_2 = arith.constant 0 : i32
    return %c0_i32, %c0_i32_0, %c0_i32_1 : i32, i32, i32
  }
  func.func @transform_5(%arg0: i32) -> (i32, i32, i32) {
    %c0_i32 = arith.constant 0 : i32
    %c0_i32_0 = arith.constant 0 : i32
    %c0_i32_1 = arith.constant 0 : i32
    %c0_i32_2 = arith.constant 0 : i32
    return %c0_i32, %c0_i32_0, %c0_i32_1 : i32, i32, i32
  }
  func.func @transform_6(%arg0: i32) -> (i32, i32, i32) {
    %c0_i32 = arith.constant 0 : i32
    %c0_i32_0 = arith.constant 0 : i32
    %c0_i32_1 = arith.constant 0 : i32
    %c0_i32_2 = arith.constant 0 : i32
    return %c0_i32, %c0_i32_0, %c0_i32_1 : i32, i32, i32
  }
  func.func @transform_7(%arg0: i32) -> (i32, i32, i32) {
    %c0_i32 = arith.constant 0 : i32
    %c0_i32_0 = arith.constant 0 : i32
    %c0_i32_1 = arith.constant 0 : i32
    %c0_i32_2 = arith.constant 0 : i32
    return %c0_i32, %c0_i32_0, %c0_i32_1 : i32, i32, i32
  }
  func.func @transform_8(%arg0: i32) -> (i32, i32, i32) {
    %c0_i32 = arith.constant 0 : i32
    %c0_i32_0 = arith.constant 0 : i32
    %c0_i32_1 = arith.constant 0 : i32
    %c0_i32_2 = arith.constant 0 : i32
    return %c0_i32, %c0_i32_0, %c0_i32_1 : i32, i32, i32
  }
  func.func @transform_9(%arg0: i32) -> (i32, i32, i32) {
    %c0_i32 = arith.constant 0 : i32
    %c0_i32_0 = arith.constant 0 : i32
    %c0_i32_1 = arith.constant 0 : i32
    %c0_i32_2 = arith.constant 0 : i32
    return %c0_i32, %c0_i32_0, %c0_i32_1 : i32, i32, i32
  }
  func.func @transform_10(%arg0: i32) -> (i32, i32, i32) {
    %c0_i32 = arith.constant 0 : i32
    %c0_i32_0 = arith.constant 0 : i32
    %c0_i32_1 = arith.constant 0 : i32
    %c0_i32_2 = arith.constant 0 : i32
    return %c0_i32, %c0_i32_0, %c0_i32_1 : i32, i32, i32
  }
  func.func @transform_11(%arg0: i32) -> (i32, i32, i32) {
    %c0_i32 = arith.constant 0 : i32
    %c0_i32_0 = arith.constant 0 : i32
    %c0_i32_1 = arith.constant 0 : i32
    %c0_i32_2 = arith.constant 0 : i32
    return %c0_i32, %c0_i32_0, %c0_i32_1 : i32, i32, i32
  }
  func.func @transform_12(%arg0: i32) -> (i32, i32, i32) {
    %c0_i32 = arith.constant 0 : i32
    %c0_i32_0 = arith.constant 0 : i32
    %c0_i32_1 = arith.constant 0 : i32
    %c0_i32_2 = arith.constant 0 : i32
    return %c0_i32, %c0_i32_0, %c0_i32_1 : i32, i32, i32
  }
  func.func @transform_13(%arg0: i32) -> (i32, i32, i32) {
    %c0_i32 = arith.constant 0 : i32
    %c0_i32_0 = arith.constant 0 : i32
    %c0_i32_1 = arith.constant 0 : i32
    %c0_i32_2 = arith.constant 0 : i32
    return %c0_i32, %c0_i32_0, %c0_i32_1 : i32, i32, i32
  }
  func.func @transform_14(%arg0: i32) -> (i32, i32, i32) {
    %c0_i32 = arith.constant 0 : i32
    %c0_i32_0 = arith.constant 0 : i32
    %c0_i32_1 = arith.constant 0 : i32
    %c0_i32_2 = arith.constant 0 : i32
    return %c0_i32, %c0_i32_0, %c0_i32_1 : i32, i32, i32
  }
  func.func @transform_15(%arg0: i32) -> (i32, i32, i32) {
    %c0_i32 = arith.constant 0 : i32
    %c0_i32_0 = arith.constant 0 : i32
    %c0_i32_1 = arith.constant 0 : i32
    %c0_i32_2 = arith.constant 0 : i32
    return %c0_i32, %c0_i32_0, %c0_i32_1 : i32, i32, i32
  }
  func.func @transform_16(%arg0: i32) -> (i32, i32) {
    %c0_i32 = arith.constant 0 : i32
    %c0_i32_0 = arith.constant 0 : i32
    %c0_i32_1 = arith.constant 0 : i32
    return %c0_i32, %c0_i32_0 : i32, i32
  }
  func.func @transform_17(%arg0: i32) -> (i32, i32) {
    %c0_i32 = arith.constant 0 : i32
    %c0_i32_0 = arith.constant 0 : i32
    %c0_i32_1 = arith.constant 0 : i32
    return %c0_i32, %c0_i32_0 : i32, i32
  }
  func.func @transform_18(%arg0: i32) -> (i32, i32, i32) {
    %c0_i32 = arith.constant 0 : i32
    %c0_i32_0 = arith.constant 0 : i32
    %c0_i32_1 = arith.constant 0 : i32
    return %arg0, %c0_i32, %c0_i32_0 : i32, i32, i32
  }
}

</mosaic_0001>

<bundles_post_ra>
// kernel: transformer_forward_eval.1
= control target key start
LH: loop header
LB: loop body
LE: loop exit
PB: predicated region body
PF: predicated region fallthrough
CT: control target
= control target key end

     0   :  { %s1926_s17 = smov 0   ;;  %s1928_s18 = smov 0   ;;  %s2263_s0 = inlined_call_operand.vmem [shape: f32[2,8,32], index: 0, kind: input, shape index: {}]   ;;  %s2264_s1 = inlined_call_operand.vmem [shape: f32[2,8,1], index: 1, kind: input, shape index: {}]   ;;  %s2265_s2 = inlined_call_operand.vmem [shape: bf16[2,32,96], index: 2, kind: input, shape index: {}]   ;;  %s2266_s3 = inlined_call_operand.vmem [shape: bf16[2,32,32], index: 3, kind: input, shape index: {}]   ;;  %s2267_s4 = inlined_call_operand.vmem [shape: f32[2,1,32], index: 4, kind: input, shape index: {}]   ;;  %s2268_s5 = inlined_call_operand.vmem [shape: bf16[2,32,128], index: 5, kind: input, shape index: {}]   ;;  %s2269_s6 = inlined_call_operand.vmem [shape: f32[2,1,128], index: 6, kind: input, shape index: {}]   ;;  %s2270_s7 = inlined_call_operand.vmem [shape: bf16[2,128,32], index: 7, kind: input, shape index: {}]   ;;  %s2271_s8 = inlined_call_operand.vmem [shape: f32[2,1,32], index: 8, kind: input, shape index: {}]   ;;  %s2272_s9 = inlined_call_operand.vmem [shape: f32[2,1,32], index: 9, kind: input, shape index: {}]   ;;  %s2273_s10 = inlined_call_operand.vmem [shape: f32[2,1,32], index: 10, kind: input, shape index: {}]   ;;  %s2274_s11 = inlined_call_operand.vmem [shape: f32[2,2,8,32], index: 11, kind: output, shape index: {}]  }
   0x1   :  { %s1930_s19 = smov 0  }
   0x2 LB: > { %s1939_s20 = sadd.s32 4294967295, %s1848_s19   ;;  %s1941_s21 = sadd.s32 1, %s1848_s19   ;;  %s1848_s19 = sphi %s1930_s19, %s2296_s19   ;;  %s1844_s18 = sphi %s1928_s18, %s2295_s18   ;;  %s1840_s17 = sphi %s1926_s17, %s2294_s17  }
   0x3   : > { %s266_s22 = ssub.s32 %s1848_s19, %s1941_s21  ;;  %s269_s23 = sadd.s32 1, %s1844_s18 }
   0x4   : > { %p267_p0 = scmp.eq.s32.totalorder %s266_s22, 0  ;;  %p279_p1 = scmp.ne.s32.totalorder %s1844_s18, %s1840_s17 }
   0x5   : > { %p280_p2 = scmp.eq.s32.totalorder %s1939_s20, 1  ;;  %p1529_p3 = scmp.ge.s32.totalorder %s1848_s19, 1 }
   0x6   : > { %s1949_s24 = scalar_select %p267_p0, %s1844_s18, %s269_s23  }
   0x7   : > { %p1951_p4 = por %p280_p2, %p279_p1  ;;  %p345_p5 = scmp.lt.s32.totalorder %s1848_s19, 3 }
   0x9   : > { %p346_p6 = pnand %p1529_p3, %p345_p5 }
   0xa   : > { %p387_p7 = scmp.lt.s32.totalorder (!%p346_p6), %s1939_s20, 1  ;;  %s1851_s16 = smov (!%p346_p6), 120  }
   0xb   : > { %349 = sbr.rel (%p346_p6) target bundleno = 4517 (0x11a5), region = 64  ;;  %s1852_s19 = smov (!%p346_p6), 96  }
   0xc   : > { %s1853_s27 = smov (!%p346_p6), 64   ;;  %s1854_s28 = smov (!%p346_p6), 72  }
   0xd   : > { %s2278_s29 = smov (!%p346_p6), 112   ;;  %s2279_s13 = smov (!%p346_p6), 104  }
   0xe   : > { %s2277_s14 = smov (!%p346_p6), 56   ;;  %s2275_s22 = smov (!%p346_p6), 48  }
   0xf   : > { %s2282_s23 = smov (!%p346_p6), 8  }
  0x10   : > { %v1706_v0 = vld [vmem:[%s2265_s2 + $0x8] sm:$0xff]  ;;  %v1705_v1 = vld [vmem:[%s2265_s2] sm:$0xff]  ;;  %s388_s30 = scalar_select %p387_p7, %s1939_s20, 1  ;;  %vm415_vm0 = vcmask 261120   ;;  %v1850_v4 = vmov 0   ;;  %vm436_vm1 = vcmask 64512  }
  0x11   : > { %425 = vmatpush.bf16.msra.mxu0 %v1706_v0  ;;  %1773 = vset.pattern.permute.xlu0 %v1850_v4  ;;  %vm480_vm2 = vcmask 1043456   ;;  %vm684_vm3 = vcmask 130048   ;;  %vm686_vm4 = vcmask 195584  }
  0x12   : > { %s1531_s12 = sshll.u32 %s388_s30, 3  ;;  %s1856_s30 = smov 88  }
  0x13   : > { %s390_s15 = scalar_lea.vmem %s2263_s0, %s1531_s12  ;;  %s394_s26 = scalar_lea.vmem %s2264_s1, %s1531_s12 }
  0x14   : > { %v1966_v2 = vld [vmem:[%s390_s15] sm:$0xff]  ;;  %s2283_s12 = smov 80   ;;  %s2276_s15 = smov 40  }
  0x15   : > { %426 = vmatpush.bf16.msra.mxu0 %v1705_v1  ;;  %v402_v3 = vpack.c.bf16 %v1966_v2, %v1966_v2  ;;  %v397_v8 = vld [vmem:[%s394_s26] sm:$0xff]  ;;  %s2281_s26 = smov 24  }
  0x18   : > { %1541 = vmatmul.msk.bf16.vlgmr.msra.gmra.mxu0 %vm415_vm0, %v402_v3 }
  0x95   : > { %v428_v5 = vpop.f32.mrf.mxu0 }
  0x96   : > { %v1971_v6 = vpack.c.bf16 %v428_v5, %v428_v5 }
  0x98   : > { %497 = vrot.lane.b32.xlu2 %v1971_v6, %s1851_s16  ;;  %434 = vrot.lane.b32.xlu0 %v1971_v6, %s1852_s19 }
  0x9d   : > { %v430_v7 = vpop.f32.mrf.mxu0 }
  0xa0   : > { %459 = vperm.xlu0 %1773, %v397_v8  }
  0xa8   : > { %475 = vrot.lane.b32.xlu0 %v1971_v6, %s1853_s27 }
  0xb0   : > { %615 = vrot.lane.b32.xlu0 %v1971_v6, %s1854_s28 }
  0xb8   : > { %555 = vrot.lane.b32.xlu0 %v1971_v6, %s2278_s29  ;;  %s384_s29 = sand.u32 1, %s1840_s17   ;;  %s2285_s17 = smov 80  }
  0xf2   : > { %v498_v28 = vpop.permute.xlu2 %497 }
 0x10a   : > { %v435_v9 = vpop.permute.xlu0 %434 }
 0x10b   : > { %v441_v10 = vsel %vm436_vm1, %v435_v9, 0 }
 0x10c   : > { %450 = vmatpush.bf16.xpose.msra.mxu1 %v441_v10 }
 0x112   : > { %v1987_v11 = vpop.permute.xlu0 %459 }
 0x113   : > { %1542 = vmatmul.msk.bf16.vlgmr.msra.gmra.mxu1 %vm436_vm1, %v1971_v6 }
 0x11a   : > { %v476_v12 = vpop.permute.xlu0 %475 }
 0x11b   : > { %v482_v13 = vsel %vm480_vm2, %v476_v12, 0 }
 0x11c   : > { %491 = vmatpush.bf16.msrb.mxu0 %v482_v13 }
 0x122   : > { %v616_v24 = vpop.permute.xlu0 %615 }
 0x123   : > { %v621_v27 = vsel %vm436_vm1, %v616_v24, 0 }
 0x12a   : > { %v556_v36 = vpop.permute.xlu0 %555 }
 0x190   : > { %v452_v14 = vpop.f32.mrf.mxu1 }
 0x191   : > { %v456_v15 = vmul.f32 0.35355338, %v452_v14 }
 0x193   : > { %v462_v16 = vmul.f32 %v1987_v11, %v456_v15 }
 0x195   : > { %v463_v17 = vsel %vm436_vm1, %v462_v16, -inf }
 0x196   : > { %464 = vmax.xlane.f32.xlu1 %v463_v17 }
 0x198   : > { %v454_v18 = vpop.f32.mrf.mxu1 }
 0x1af   : > { %499 = vrot.lane.b32.xlu1 %v1971_v6, %s1856_s30 }
 0x1b7   : > { %557 = vrot.lane.b32.xlu1 %v1971_v6, %s2283_s12 }
 0x209   : > { %v465_v19 = vpop.xlane.xlu1 %464 }
 0x20a   : > { %v466_v20 = vsub.f32 %v462_v16, %v465_v19 }
 0x20c   : > { %v467_v21 = vmul.f32 1.442695, %v466_v20 }
 0x20e   : > { %1784 = vpow2.f32 %v467_v21 }
 0x214   : > { %v1785_v22 = vpop.eup %1784 }
 0x215   : > { %v469_v23 = vsel %vm436_vm1, %v1785_v22, 0.0 }
 0x216   : > { %470 = vadd.xlane.f32.xlu2 %v469_v23 }
 0x221   : > { %v500_v25 = vpop.permute.xlu1 %499 }
 0x222   : > { %v505_v26 = vsel %vm436_vm1, %v500_v25, 0 }
 0x223   : > { %514 = vmatpush.bf16.xpose.msra.mxu3 %v505_v26 }
 0x229   : > { %v558_v29 = vpop.permute.xlu1 %557 }
 0x22a   : > { %v563_v30 = vsel %vm436_vm1, %v558_v29, 0  ;;  %1544 = vmatmul.msk.bf16.vlgmr.msra.gmra.mxu3 %vm436_vm1, %v498_v28 }
 0x22b   : > { %630 = vmatpush.bf16.xpose.msrb.mxu3 %v621_v27  ;;  %572 = vmatpush.bf16.xpose.msra.mxu0 %v563_v30 }
 0x22e   : > { %613 = vrot.lane.b32.xlu2 %v1971_v6, %s2279_s13  ;;  %s1530_s13 = sshll.u32 %s384_s29, 4 }
 0x289   : > { %v471_v31 = vpop.xlane.xlu2 %470 }
 0x28a   : > { %1786 = vrcp.f32 %v471_v31  ;;  %v1708_v31 = vld [vmem:[%s2266_s3 + $0x8] sm:$0xff] }
 0x290   : > { %v1787_v32 = vpop.eup %1786 }
 0x291   : > { %v473_v33 = vmul.f32 %v1787_v32, %v1785_v22  ;;  %v614_v34 = vpop.permute.xlu2 %613  ;;  %v1707_v32 = vld [vmem:[%s2266_s3] sm:$0xff] }
 0x292   : > { %1548 = vmatmul.msk.bf16.vlgmr.msrb.gmra.mxu3 %vm436_vm1, %v614_v34 }
 0x293   : > { %v474_v35 = vpack.c.bf16 %v473_v33, %v473_v33 }
 0x295   : > { %1543 = vmatmul.msk.bf16.vlgmr.msrb.gmra.mxu0 %vm436_vm1, %v474_v35 }
 0x296   : > { %718 = vmatpush.bf16.msrb.mxu0 %v1708_v31 }
 0x29a   : > { %719 = vmatpush.bf16.msrb.mxu0 %v1707_v32 }
 0x2a5   : > { %1546 = vmatmul.msk.bf16.vlgmr.msra.gmra.mxu0 %vm436_vm1, %v556_v36 }
 0x2ad   : > { %v516_v37 = vpop.f32.mrf.mxu3 }
 0x2ae   : > { %v520_v38 = vmul.f32 0.35355338, %v516_v37 }
 0x2b0   : > { %v521_v39 = vmul.f32 %v520_v38, %v1987_v11 }
 0x2b2   : > { %v522_v40 = vsel %vm436_vm1, %v521_v39, -inf }
 0x2b3   : > { %523 = vmax.xlane.f32.xlu2 %v522_v40  ;;  %v1774_v40 = vld [vmem:[%s2267_s4] ss:$0 sm:$0xff] }
 0x2b5   : > { %v518_v41 = vpop.f32.mrf.mxu3 }
 0x312   : > { %v2010_v42 = vpop.f32.mrf.mxu0 }
 0x315   : > { %v632_v43 = vpop.f32.mrf.mxu3 }
 0x316   : > { %v636_v44 = vmul.f32 0.35355338, %v632_v43 }
 0x318   : > { %v637_v45 = vmul.f32 %v636_v44, %v1987_v11 }
 0x31a   : > { %v495_v46 = vpop.f32.mrf.mxu0  ;;  %v638_v47 = vsel %vm436_vm1, %v637_v45, -inf }
 0x31b   : > { %639 = vmax.xlane.f32.xlu1 %v638_v47  ;;  %v1865_v46 = vmov 32.0  }
 0x31d   : > { %v634_v48 = vpop.f32.mrf.mxu3 }
 0x322   : > { %v574_v49 = vpop.f32.mrf.mxu0 }
 0x323   : > { %v578_v50 = vmul.f32 0.35355338, %v574_v49 }
 0x325   : > { %v579_v51 = vmul.f32 %v578_v50, %v1987_v11 }
 0x326   : > { %v524_v52 = vpop.xlane.xlu2 %523 }
 0x327   : > { %v525_v53 = vsub.f32 %v521_v39, %v524_v52  ;;  %v580_v54 = vsel %vm436_vm1, %v579_v51, -inf }
 0x328   : > { %581 = vmax.xlane.f32.xlu0 %v580_v54 }
 0x329   : > { %v526_v55 = vmul.f32 1.442695, %v525_v53 }
 0x32a   : > { %v576_v56 = vpop.f32.mrf.mxu0 }
 0x32b   : > { %1788 = vpow2.f32 %v526_v55 }
 0x331   : > { %v1789_v57 = vpop.eup %1788 }
 0x332   : > { %v528_v58 = vsel %vm436_vm1, %v1789_v57, 0.0 }
 0x333   : > { %529 = vadd.xlane.f32.xlu2 %v528_v58  ;;  %v1709_v58 = vld [vmem:[%s2268_s5] sm:$0xff] }
 0x334   : > { %534 = vrot.lane.b32.xlu1 %v1971_v6, %s2277_s14  ;;  %s2111_s14 = scalar_lea.vmem [#allocation2], %s1530_s13 }
 0x38e   : > { %v640_v59 = vpop.xlane.xlu1 %639 }
 0x38f   : > { %v641_v60 = vsub.f32 %v637_v45, %v640_v59  ;;  %v1718_v59 = vld [vmem:[%s2270_s7 + $0x38] sm:$0xff] }
 0x390   : > { %872 = vmatpush.bf16.msra.mxu3 %v1718_v59 }
 0x391   : > { %v642_v61 = vmul.f32 1.442695, %v641_v60 }
 0x393   : > { %1790 = vpow2.f32 %v642_v61 }
 0x399   : > { %v1791_v62 = vpop.eup %1790 }
 0x39a   : > { %v644_v63 = vsel %vm436_vm1, %v1791_v62, 0.0 }
 0x39b   : > { %645 = vadd.xlane.f32.xlu2 %v644_v63  ;;  %v582_v0 = vpop.xlane.xlu0 %581 }
 0x39c   : > { %v583_v1 = vsub.f32 %v579_v51, %v582_v0  ;;  %v1716_v0 = vld [vmem:[%s2270_s7 + $0x28] sm:$0xff] }
 0x39e   : > { %v584_v3 = vmul.f32 1.442695, %v583_v1  ;;  %v1715_v1 = vld [vmem:[%s2270_s7 + $0x20] sm:$0xff] }
 0x3a0   : > { %1792 = vpow2.f32 %v584_v3 }
 0x3a6   : > { %v1793_v4 = vpop.eup %1792  ;;  %v530_v5 = vpop.xlane.xlu2 %529 }
 0x3a7   : > { %v535_v7 = vpop.permute.xlu1 %534  ;;  %1794 = vrcp.f32 %v530_v5  ;;  %v586_v9 = vsel %vm436_vm1, %v1793_v4, 0.0  ;;  %v1714_v5 = vld [vmem:[%s2270_s7 + $0x18] sm:$0xff] }
 0x3a8   : > { %v540_v8 = vsel %vm480_vm2, %v535_v7, 0  ;;  %587 = vadd.xlane.f32.xlu0 %v586_v9  ;;  %v1713_v9 = vld [vmem:[%s2270_s7 + $0x10] sm:$0xff] }
 0x3a9   : > { %549 = vmatpush.bf16.msra.mxu2 %v540_v8 }
 0x3ad   : > { %v1795_v10 = vpop.eup %1794 }
 0x3ae   : > { %v532_v12 = vmul.f32 %v1795_v10, %v1789_v57  ;;  %v1710_v57 = vld [vmem:[%s2268_s5 + $0x8] sm:$0xff] }
 0x3b0   : > { %v533_v13 = vpack.c.bf16 %v532_v12, %v532_v12 }
 0x3b2   : > { %1545 = vmatmul.msk.bf16.vlgmr.msra.gmra.mxu2 %vm436_vm1, %v533_v13  ;;  %v1775_v13 = vld [vmem:[%s2272_s9] ss:$0 sm:$0xff] }
 0x3b3   : > { %650 = vrot.lane.b32.xlu2 %v1971_v6, %s2276_s15  ;;  %s2291_s15 = smov 8  }
 0x3bc   : > { %592 = vrot.lane.b32.xlu0 %v1971_v6, %s2275_s22  ;;  %s2280_s22 = smov 16  }
 0x40e   : > { %v646_v14 = vpop.xlane.xlu2 %645 }
 0x40f   : > { %1796 = vrcp.f32 %v646_v14 }
 0x415   : > { %v1797_v15 = vpop.eup %1796 }
 0x416   : > { %v648_v16 = vmul.f32 %v1797_v15, %v1791_v62  ;;  %v651_v17 = vpop.permute.xlu2 %650  ;;  %v1717_v62 = vld [vmem:[%s2270_s7 + $0x30] sm:$0xff]  ;;  %v1776_v15 = vld [vmem:[%s2273_s10] ss:$0 sm:$0xff] }
 0x417   : > { %v656_v18 = vsel %vm480_vm2, %v651_v17, 0  ;;  %873 = vmatpush.bf16.msra.mxu3 %v1717_v62 }
 0x418   : > { %665 = vmatpush.bf16.msrb.mxu2 %v656_v18  ;;  %v649_v19 = vpack.c.bf16 %v648_v16, %v648_v16 }
 0x41b   : > { %1549 = vmatmul.msk.bf16.vlgmr.msrb.gmra.mxu2 %vm436_vm1, %v649_v19  ;;  %v588_v20 = vpop.xlane.xlu0 %587  ;;  %874 = vmatpush.bf16.msra.mxu3 %v1716_v0 }
 0x41c   : > { %1798 = vrcp.f32 %v588_v20  ;;  %v1712_v20 = vld [vmem:[%s2270_s7 + $0x8] sm:$0xff] }
 0x41d   : > { %1800 = vrcp.f32 %v1865_v46 }
 0x41f   : > { %875 = vmatpush.bf16.msra.mxu3 %v1715_v1 }
 0x422   : > { %v1799_v21 = vpop.eup %1798 }
 0x423   : > { %v590_v22 = vmul.f32 %v1799_v21, %v1793_v4  ;;  %v1801_v47 = vpop.eup %1800  ;;  %876 = vmatpush.bf16.msra.mxu3 %v1714_v5  ;;  %v1711_v21 = vld [vmem:[%s2270_s7] sm:$0xff] }
 0x424   : > { %v732_v48 = vmul.f32 32.0, %v1801_v47  ;;  %vm736_vm5 = vweird.f32 %v1801_v47 }
 0x425   : > { %v591_v6 = vpack.c.bf16 %v590_v22, %v590_v22  ;;  %v1777_v22 = vld [vmem:[%s2269_s6] ss:$0 sm:$0xff] }
 0x426   : > { %v733_v49 = vsub.f32 1.0, %v732_v48 }
 0x427   : > { %877 = vmatpush.bf16.msra.mxu3 %v1713_v9 }
 0x428   : > { %v734_v50 = vmul.f32 %v1801_v47, %v733_v49 }
 0x42a   : > { %v735_v51 = vadd.f32 %v1801_v47, %v734_v50 }
 0x42b   : > { %878 = vmatpush.bf16.msra.mxu3 %v1712_v20 }
 0x42c   : > { %v2050_v52 = vsel %vm736_vm5, %v1801_v47, %v735_v51 }
 0x42e   : > { %v593_v23 = vpop.permute.xlu0 %592 }
 0x42f   : > { %v598_v24 = vsel %vm480_vm2, %v593_v23, 0  ;;  %879 = vmatpush.bf16.msra.mxu3 %v1711_v21 }
 0x430   : > { %607 = vmatpush.bf16.msrb.mxu1 %v598_v24 }
 0x433   : > { %1547 = vmatmul.msk.bf16.vlgmr.msrb.gmra.mxu1 %vm436_vm1, %v591_v6 }
 0x434   : > { %795 = vmatpush.bf16.msra.mxu1 %v1710_v57 }
 0x435   : > { %v551_v25 = vpop.f32.mrf.mxu2 }
 0x436   : > { %672 = vrot.lane.b32.xlu1 %v551_v25, %s2282_s23  ;;  %s2293_s23 = smov 16  }
 0x438   : > { %796 = vmatpush.bf16.msra.mxu1 %v1709_v58 }
 0x43d   : > { %v553_v26 = vpop.f32.mrf.mxu2 }
 0x49e   : > { %v667_v27 = vpop.f32.mrf.mxu2 }
 0x49f   : > { %680 = vrot.lane.b32.xlu0 %v667_v27, %s2281_s26  ;;  %v1778_v27 = vld [vmem:[%s2271_s8] ss:$0 sm:$0xff] }
 0x4a6   : > { %v669_v28 = vpop.f32.mrf.mxu2 }
 0x4a8   : > { %v673_v33 = vpop.permute.xlu1 %672 }
 0x4a9   : > { %v683_v34 = vsel %vm436_vm1, %v2010_v42, %v673_v33 }
 0x4b0   : > { %v609_v29 = vpop.f32.mrf.mxu1 }
 0x4b1   : > { %676 = vrot.lane.b32.xlu1 %v609_v29, %s2280_s22  ;;  %s2292_s22 = smov 24  }
 0x4b8   : > { %v611_v30 = vpop.f32.mrf.mxu1 }
 0x511   : > { %v681_v36 = vpop.permute.xlu0 %680 }
 0x523   : > { %v677_v35 = vpop.permute.xlu1 %676 }
 0x524   : > { %v685_v37 = vsel %vm684_vm3, %v683_v34, %v677_v35 }
 0x525   : > { %v687_v38 = vsel %vm686_vm4, %v685_v37, %v681_v36 }
 0x526   : > { %v692_v39 = vpack.c.bf16 %v687_v38, %v687_v38  ;;  %v1720_v38 = vld [vmem:[%s2265_s2 + $0x18] sm:$0xff] }
 0x527   : > { %938 = vmatpush.bf16.msra.mxu2 %v1720_v38 }
 0x528   : > { %1558 = vmatmul.msk.bf16.vlgmr.msrb.gmra.mxu0 %vm415_vm0, %v692_v39  ;;  %v1719_v39 = vld [vmem:[%s2265_s2 + $0x10] sm:$0xff] }
 0x52b   : > { %939 = vmatpush.bf16.msra.mxu2 %v1719_v39 }
 0x5a5   : > { %v721_v41 = vpop.f32.mrf.mxu0 }
 0x5a6   : > { %v722_v43 = vadd.f32 %v1774_v40, %v721_v41 }
 0x5a8   : > { %v725_v44 = vadd.f32 %v722_v43, %v1966_v2 }
 0x5aa   : > { %v728_v45 = vsel %vm415_vm0, %v725_v44, 0.0 }
 0x5ab   : > { %729 = vadd.xlane.f32.xlu2 %v728_v45 }
 0x5ad   : > { %v723_v42 = vpop.f32.mrf.mxu0 }
 0x61e   : > { %v730_v53 = vpop.xlane.xlu2 %729 }
 0x61f   : > { %v738_v54 = vmul.f32 %v2050_v52, %v730_v53 }
 0x621   : > { %v739_v55 = vsub.f32 %v725_v44, %v738_v54 }
 0x623   : > { %v740_v56 = vmul.f32 %v739_v55, %v739_v55 }
 0x625   : > { %v741_v2 = vsel %vm415_vm0, %v740_v56, 0.0 }
 0x626   : > { %742 = vadd.xlane.f32.xlu1 %v741_v2 }
 0x699   : > { %v743_v60 = vpop.xlane.xlu1 %742 }
 0x69a   : > { %v744_v61 = vmul.f32 %v743_v60, %v2050_v52 }
 0x69c   : > { %v745_v63 = vadd.f32 1e-05, %v744_v61 }
 0x69e   : > { %1802 = vrsqrt.f32 %v745_v63  ;;  %vm752_vm7 = vweird.f32 %v745_v63 }
 0x6a4   : > { %v1803_v3 = vpop.eup %1802 }
 0x6a5   : > { %v747_v4 = vmul.f32 %v1803_v3, %v745_v63  ;;  %vm753_vm6 = vweird.f32 %v1803_v3 }
 0x6a6   : > { %vm754_vm8 = vmor %vm752_vm7, %vm753_vm6 }
 0x6a7   : > { %v748_v7 = vmul.f32 %v1803_v3, %v747_v4 }
 0x6a9   : > { %v749_v8 = vmul.f32 0.5, %v748_v7 }
 0x6ab   : > { %v750_v10 = vsub.f32 1.5, %v749_v8 }
 0x6ad   : > { %v751_v12 = vmul.f32 %v1803_v3, %v750_v10 }
 0x6af   : > { %v755_v14 = vsel %vm754_vm8, %v1803_v3, %v751_v12 }
 0x6b0   : > { %v756_v16 = vmul.f32 %v755_v14, %v739_v55 }
 0x6b2   : > { %v760_v17 = vmul.f32 %v1775_v13, %v756_v16 }
 0x6b4   : > { %v764_v18 = vadd.f32 %v1776_v15, %v760_v17 }
 0x6b6   : > { %v769_v19 = vpack.c.bf16 %v764_v18, %v764_v18 }
 0x6b8   : > { %1567 = vmatmul.msk.bf16.vlgmr.msra.gmra.mxu1 %vm415_vm0, %v769_v19 }
 0x735   : > { %v798_v23 = vpop.f32.mrf.mxu1 }
 0x736   : > { %v799_v24 = vadd.f32 %v1777_v22, %v798_v23 }
 0x738   : > { %v802_v6 = vmax.f32 %v799_v24, 0.0 }
 0x73a   : > { %v819_v25 = vpack.c.bf16 %v802_v6, %v802_v6 }
 0x73c   : > { %880 = vmatmul.bf16.vlgmr.msra.gmra.mxu3 %v819_v25 }
 0x73d   : > { %v800_v26 = vpop.f32.mrf.mxu1 }
 0x7bf   : > { %v881_v28 = vpop.f32.mrf.mxu3 }
 0x7c0   : > { %v882_v29 = vadd.f32 %v1778_v27, %v881_v28 }
 0x7c2   : > { %v885_v30 = vadd.f32 %v882_v29, %v764_v18 }
 0x7c4   : > { %v886_v31 = vsel %vm415_vm0, %v885_v30, 0.0 }
 0x7c5   : > { %887 = vadd.xlane.f32.xlu0 %v886_v31 }
 0x7c7   : > { %v883_v32 = vpop.f32.mrf.mxu3 }
 0x838   : > { %v888_v33 = vpop.xlane.xlu0 %887 }
 0x839   : > { %v889_v34 = vmul.f32 %v888_v33, %v2050_v52 }
 0x83b   : > { %v890_v35 = vsub.f32 %v885_v30, %v889_v34 }
 0x83d   : > { %v891_v36 = vmul.f32 %v890_v35, %v890_v35 }
 0x83f   : > { %v892_v37 = vsel %vm415_vm0, %v891_v36, 0.0 }
 0x840   : > { %893 = vadd.xlane.f32.xlu2 %v892_v37 }
 0x8b3   : > { %v894_v40 = vpop.xlane.xlu2 %893 }
 0x8b4   : > { %v895_v41 = vmul.f32 %v894_v40, %v2050_v52 }
 0x8b6   : > { %v896_v43 = vadd.f32 1e-05, %v895_v41 }
 0x8b8   : > { %1804 = vrsqrt.f32 %v896_v43  ;;  %vm903_vm10 = vweird.f32 %v896_v43 }
 0x8be   : > { %v1805_v44 = vpop.eup %1804 }
 0x8bf   : > { %v898_v45 = vmul.f32 %v1805_v44, %v896_v43  ;;  %vm904_vm9 = vweird.f32 %v1805_v44 }
 0x8c0   : > { %vm905_vm11 = vmor %vm903_vm10, %vm904_vm9 }
 0x8c1   : > { %v899_v42 = vmul.f32 %v1805_v44, %v898_v45 }
 0x8c3   : > { %v900_v46 = vmul.f32 0.5, %v899_v42 }
 0x8c5   : > { %v901_v47 = vsub.f32 1.5, %v900_v46 }
 0x8c7   : > { %v902_v48 = vmul.f32 %v1805_v44, %v901_v47 }
 0x8c9   : > { %v906_v49 = vsel %vm905_vm11, %v1805_v44, %v902_v48 }
 0x8ca   : > { %v907_v50 = vmul.f32 %v906_v49, %v890_v35 }
 0x8cc   : > { %v908_v51 = vmul.f32 %v1775_v13, %v907_v50 }
 0x8ce   : > { %v2109_v53 = vadd.f32 %v1776_v15, %v908_v51 }
 0x8d0   : > { %910 = vst.msk [vmem:[%s2111_s14] sm:$0xff] %vm415_vm0, %v2109_v53  ;;  %v916_v54 = vpack.c.bf16 %v2109_v53, %v2109_v53 }
 0x8d2   : > { %1612 = vmatmul.msk.bf16.vlgmr.msra.gmra.mxu2 %vm415_vm0, %v916_v54 }
 0x955   : > { %v941_v55 = vpop.f32.mrf.mxu2 }
 0x956   : > { %v2119_v56 = vpack.c.bf16 %v941_v55, %v941_v55 }
 0x958   : > { %982 = vrot.lane.b32.xlu2 %v2119_v56, %s1853_s27  ;;  %947 = vrot.lane.b32.xlu1 %v2119_v56, %s1852_s19  ;;  %s2287_s19 = smov 112   ;;  %s2288_s27 = smov 56  }
 0x95d   : > { %v943_v2 = vpop.f32.mrf.mxu2 }
 0x960   : > { %1003 = vrot.lane.b32.xlu1 %v2119_v56, %s1851_s16  ;;  %s2286_s16 = smov 104  }
 0x968   : > { %1121 = vrot.lane.b32.xlu1 %v2119_v56, %s1854_s28  ;;  %s2289_s28 = smov 40  }
 0x9b2   : > { %v983_v57 = vpop.permute.xlu2 %982 }
 0x9b3   : > { %v988_v58 = vsel %vm480_vm2, %v983_v57, 0 }
 0x9b4   : > { %997 = vmatpush.bf16.msrb.mxu1 %v988_v58 }
 0x9ca   : > { %v948_v59 = vpop.permute.xlu1 %947 }
 0x9cb   : > { %v953_v60 = vsel %vm436_vm1, %v948_v59, 0 }
 0x9cc   : > { %962 = vmatpush.bf16.xpose.msra.mxu0 %v953_v60 }
 0x9d2   : > { %v1004_v7 = vpop.permute.xlu1 %1003 }
 0x9d3   : > { %1613 = vmatmul.msk.bf16.vlgmr.msra.gmra.mxu0 %vm436_vm1, %v2119_v56 }
 0x9da   : > { %v1122_v10 = vpop.permute.xlu1 %1121 }
 0x9db   : > { %v1127_v14 = vsel %vm436_vm1, %v1122_v10, 0 }
 0xa50   : > { %v964_v61 = vpop.f32.mrf.mxu0 }
 0xa51   : > { %v968_v62 = vmul.f32 0.35355338, %v964_v61 }
 0xa53   : > { %v969_v63 = vmul.f32 %v968_v62, %v1987_v11 }
 0xa55   : > { %v970_v0 = vsel %vm436_vm1, %v969_v63, -inf }
 0xa56   : > { %971 = vmax.xlane.f32.xlu0 %v970_v0 }
 0xa58   : > { %v966_v1 = vpop.f32.mrf.mxu0 }
 0xa6a   : > { %1005 = vrot.lane.b32.xlu0 %v2119_v56, %s1856_s30  ;;  %s2290_s30 = smov 48  }
 0xa72   : > { %1063 = vrot.lane.b32.xlu0 %v2119_v56, %s2285_s17 }
 0xa7a   : > { %1119 = vrot.lane.b32.xlu0 %v2119_v56, %s2286_s16 }
 0xac9   : > { %v972_v3 = vpop.xlane.xlu0 %971 }
 0xaca   : > { %v973_v4 = vsub.f32 %v969_v63, %v972_v3 }
 0xacc   : > { %v974_v5 = vmul.f32 1.442695, %v973_v4 }
 0xace   : > { %1806 = vpow2.f32 %v974_v5 }
 0xad4   : > { %v1807_v8 = vpop.eup %1806 }
 0xad5   : > { %v976_v9 = vsel %vm436_vm1, %v1807_v8, 0.0 }
 0xad6   : > { %977 = vadd.xlane.f32.xlu2 %v976_v9 }
 0xadc   : > { %v1006_v12 = vpop.permute.xlu0 %1005 }
 0xadd   : > { %v1011_v13 = vsel %vm436_vm1, %v1006_v12, 0 }
 0xade   : > { %1020 = vmatpush.bf16.xpose.msrb.mxu2 %v1011_v13 }
 0xae4   : > { %v1064_v15 = vpop.permute.xlu0 %1063 }
 0xae5   : > { %v1069_v16 = vsel %vm436_vm1, %v1064_v15, 0  ;;  %1615 = vmatmul.msk.bf16.vlgmr.msrb.gmra.mxu2 %vm436_vm1, %v1004_v7  ;;  %v1722_v15 = vld [vmem:[%s2266_s3 + $0x18] sm:$0xff] }
 0xae6   : > { %1136 = vmatpush.bf16.xpose.msra.mxu2 %v1127_v14  ;;  %1078 = vmatpush.bf16.xpose.msra.mxu1 %v1069_v16 }
 0xaec   : > { %v1120_v17 = vpop.permute.xlu0 %1119 }
 0xaee   : > { %1061 = vrot.lane.b32.xlu2 %v2119_v56, %s2287_s19 }
 0xaf5   : > { %1619 = vmatmul.msk.bf16.vlgmr.msra.gmra.mxu2 %vm436_vm1, %v1120_v17 }
 0xb49   : > { %v978_v18 = vpop.xlane.xlu2 %977 }
 0xb4a   : > { %1808 = vrcp.f32 %v978_v18  ;;  %v1721_v18 = vld [vmem:[%s2266_s3 + $0x10] sm:$0xff] }
 0xb50   : > { %v1809_v19 = vpop.eup %1808 }
 0xb51   : > { %v980_v20 = vmul.f32 %v1809_v19, %v1807_v8  ;;  %v1062_v22 = vpop.permute.xlu2 %1061 }
 0xb53   : > { %v981_v21 = vpack.c.bf16 %v980_v20, %v980_v20 }
 0xb55   : > { %1614 = vmatmul.msk.bf16.vlgmr.msrb.gmra.mxu1 %vm436_vm1, %v981_v21 }
 0xb56   : > { %1224 = vmatpush.bf16.msrb.mxu1 %v1722_v15 }
 0xb5a   : > { %1225 = vmatpush.bf16.msrb.mxu1 %v1721_v18 }
 0xb65   : > { %1617 = vmatmul.msk.bf16.vlgmr.msra.gmra.mxu1 %vm436_vm1, %v1062_v22 }
 0xb68   : > { %v1022_v23 = vpop.f32.mrf.mxu2 }
 0xb69   : > { %v1026_v24 = vmul.f32 0.35355338, %v1022_v23 }
 0xb6b   : > { %v1027_v6 = vmul.f32 %v1026_v24, %v1987_v11 }
 0xb6d   : > { %v1028_v25 = vsel %vm436_vm1, %v1027_v6, -inf }
 0xb6e   : > { %1029 = vmax.xlane.f32.xlu1 %v1028_v25  ;;  %v1779_v25 = vld [vmem:[%s2267_s4 + $0x1] ss:$0 sm:$0xff] }
 0xb70   : > { %v1024_v26 = vpop.f32.mrf.mxu2 }
 0xb78   : > { %v1138_v27 = vpop.f32.mrf.mxu2 }
 0xb79   : > { %v1142_v28 = vmul.f32 0.35355338, %v1138_v27 }
 0xb7b   : > { %v1143_v29 = vmul.f32 %v1142_v28, %v1987_v11 }
 0xb7d   : > { %v1144_v30 = vsel %vm436_vm1, %v1143_v29, -inf }
 0xb7e   : > { %1145 = vmax.xlane.f32.xlu0 %v1144_v30 }
 0xb80   : > { %v1140_v31 = vpop.f32.mrf.mxu2 }
 0xbd2   : > { %v2155_v32 = vpop.f32.mrf.mxu1 }
 0xbda   : > { %v1001_v33 = vpop.f32.mrf.mxu1 }
 0xbe1   : > { %v1030_v34 = vpop.xlane.xlu1 %1029 }
 0xbe2   : > { %v1031_v35 = vsub.f32 %v1027_v6, %v1030_v34  ;;  %v1080_v36 = vpop.f32.mrf.mxu1 }
 0xbe3   : > { %v1084_v37 = vmul.f32 0.35355338, %v1080_v36  ;;  %v1724_v36 = vld [vmem:[%s2268_s5 + $0x18] sm:$0xff] }
 0xbe4   : > { %v1032_v38 = vmul.f32 1.442695, %v1031_v35 }
 0xbe5   : > { %v1085_v39 = vmul.f32 %v1084_v37, %v1987_v11  ;;  %v1732_v37 = vld [vmem:[%s2270_s7 + $0x78] sm:$0xff] }
 0xbe6   : > { %1810 = vpow2.f32 %v1032_v38  ;;  %1377 = vmatpush.bf16.msrb.mxu2 %v1732_v37 }
 0xbe7   : > { %v1086_v40 = vsel %vm436_vm1, %v1085_v39, -inf }
 0xbe8   : > { %1087 = vmax.xlane.f32.xlu2 %v1086_v40  ;;  %v1731_v40 = vld [vmem:[%s2270_s7 + $0x70] sm:$0xff] }
 0xbea   : > { %v1082_v41 = vpop.f32.mrf.mxu1  ;;  %1378 = vmatpush.bf16.msrb.mxu2 %v1731_v40 }
 0xbec   : > { %v1811_v43 = vpop.eup %1810 }
 0xbed   : > { %v1034_v44 = vsel %vm436_vm1, %v1811_v43, 0.0 }
 0xbee   : > { %1035 = vadd.xlane.f32.xlu1 %v1034_v44  ;;  %v1729_v44 = vld [vmem:[%s2270_s7 + $0x60] sm:$0xff] }
 0xbf1   : > { %v1146_v45 = vpop.xlane.xlu0 %1145 }
 0xbf2   : > { %v1147_v42 = vsub.f32 %v1143_v29, %v1146_v45 }
 0xbf4   : > { %v1148_v46 = vmul.f32 1.442695, %v1147_v42 }
 0xbf6   : > { %1812 = vpow2.f32 %v1148_v46  ;;  %v1728_v46 = vld [vmem:[%s2270_s7 + $0x58] sm:$0xff] }
 0xbfc   : > { %v1813_v47 = vpop.eup %1812 }
 0xbfd   : > { %v1150_v48 = vsel %vm436_vm1, %v1813_v47, 0.0 }
 0xbfe   : > { %1151 = vadd.xlane.f32.xlu1 %v1150_v48 }
 0xc00   : > { %1040 = vrot.lane.b32.xlu2 %v2119_v56, %s2288_s27 }
 0xc17   : > { %1156 = vrot.lane.b32.xlu1 %v2119_v56, %s2289_s28  ;;  %s1702_s28 = sshll.u32 (%p1951_p4), %s1939_s20, 3 }
 0xc5b   : > { %v1088_v11 = vpop.xlane.xlu2 %1087 }
 0xc5c   : > { %v1089_v49 = vsub.f32 %v1085_v39, %v1088_v11  ;;  %v1727_v11 = vld [vmem:[%s2270_s7 + $0x50] sm:$0xff] }
 0xc5e   : > { %v1090_v50 = vmul.f32 1.442695, %v1089_v49 }
 0xc60   : > { %1814 = vpow2.f32 %v1090_v50 }
 0xc61   : > { %v1036_v51 = vpop.xlane.xlu1 %1035 }
 0xc62   : > { %1816 = vrcp.f32 %v1036_v51  ;;  %v1780_v51 = vld [vmem:[%s2272_s9 + $0x1] ss:$0 sm:$0xff] }
 0xc63   : > { %v1041_v54 = vpop.permute.xlu2 %1040 }
 0xc64   : > { %v1046_v55 = vsel %vm480_vm2, %v1041_v54, 0 }
 0xc65   : > { %1055 = vmatpush.bf16.msrb.mxu0 %v1046_v55  ;;  %v1781_v55 = vld [vmem:[%s2273_s10 + $0x1] ss:$0 sm:$0xff] }
 0xc66   : > { %v1815_v2 = vpop.eup %1814 }
 0xc67   : > { %v1092_v57 = vsel %vm436_vm1, %v1815_v2, 0.0 }
 0xc68   : > { %v1817_v58 = vpop.eup %1816  ;;  %1093 = vadd.xlane.f32.xlu0 %v1092_v57 }
 0xc69   : > { %v1038_v59 = vmul.f32 %v1817_v58, %v1811_v43  ;;  %v1730_v43 = vld [vmem:[%s2270_s7 + $0x68] sm:$0xff] }
 0xc6a   : > { %1379 = vmatpush.bf16.msrb.mxu2 %v1730_v43 }
 0xc6b   : > { %v1039_v60 = vpack.c.bf16 %v1038_v59, %v1038_v59 }
 0xc6d   : > { %1616 = vmatmul.msk.bf16.vlgmr.msrb.gmra.mxu0 %vm436_vm1, %v1039_v60  ;;  %v1726_v60 = vld [vmem:[%s2270_s7 + $0x48] sm:$0xff] }
 0xc6e   : > { %1380 = vmatpush.bf16.msrb.mxu2 %v1729_v44 }
 0xc71   : > { %v1152_v61 = vpop.xlane.xlu1 %1151 }
 0xc72   : > { %1818 = vrcp.f32 %v1152_v61  ;;  %1381 = vmatpush.bf16.msrb.mxu2 %v1728_v46  ;;  %v1725_v61 = vld [vmem:[%s2270_s7 + $0x40] sm:$0xff] }
 0xc76   : > { %1382 = vmatpush.bf16.msrb.mxu2 %v1727_v11 }
 0xc78   : > { %v1819_v62 = vpop.eup %1818 }
 0xc79   : > { %v1154_v63 = vmul.f32 %v1819_v62, %v1813_v47  ;;  %v1782_v62 = vld [vmem:[%s2269_s6 + $0x1] ss:$0 sm:$0xff] }
 0xc7a   : > { %1383 = vmatpush.bf16.msrb.mxu2 %v1726_v60 }
 0xc7b   : > { %v1155_v3 = vpack.c.bf16 %v1154_v63, %v1154_v63 }
 0xc7c   : > { %1098 = vrot.lane.b32.xlu0 %v2119_v56, %s2290_s30 }
 0xc7e   : > { %1384 = vmatpush.bf16.msrb.mxu2 %v1725_v61 }
 0xc89   : > { %v1157_v0 = vpop.permute.xlu1 %1156 }
 0xc8a   : > { %v1162_v1 = vsel %vm480_vm2, %v1157_v0, 0 }
 0xc8b   : > { %1171 = vmatpush.bf16.msra.mxu0 %v1162_v1 }
 0xc8e   : > { %1620 = vmatmul.msk.bf16.vlgmr.msra.gmra.mxu0 %vm436_vm1, %v1155_v3 }
 0xcdb   : > { %v1094_v4 = vpop.xlane.xlu0 %1093 }
 0xcdc   : > { %1820 = vrcp.f32 %v1094_v4 }
 0xce2   : > { %v1821_v5 = vpop.eup %1820 }
 0xce3   : > { %v1096_v8 = vmul.f32 %v1821_v5, %v1815_v2  ;;  %v1783_v5 = vld [vmem:[%s2271_s8 + $0x1] ss:$0 sm:$0xff] }
 0xce5   : > { %v1097_v10 = vpack.c.bf16 %v1096_v8, %v1096_v8 }
 0xcea   : > { %v1057_v7 = vpop.f32.mrf.mxu0 }
 0xceb   : > { %1178 = vrot.lane.b32.xlu2 %v1057_v7, %s2291_s15 }
 0xcee   : > { %v1099_v9 = vpop.permute.xlu0 %1098 }
 0xcef   : > { %v1104_v56 = vsel %vm480_vm2, %v1099_v9, 0 }
 0xcf0   : > { %1113 = vmatpush.bf16.msrb.mxu3 %v1104_v56 }
 0xcf2   : > { %v1059_v12 = vpop.f32.mrf.mxu0 }
 0xcf3   : > { %1618 = vmatmul.msk.bf16.vlgmr.msrb.gmra.mxu3 %vm436_vm1, %v1097_v10 }
 0xcf4   : > { %1298 = vmatpush.bf16.msra.mxu3 %v1724_v36 }
 0xd0b   : > { %v1173_v13 = vpop.f32.mrf.mxu0 }
 0xd0c   : > { %1186 = vrot.lane.b32.xlu2 %v1173_v13, %s2292_s22  ;;  %s1425_s22 = scalar_lea.vmem (%p1951_p4), %s2274_s11, %s1702_s28 }
 0xd13   : > { %v1175_v14 = vpop.f32.mrf.mxu0 }
 0xd45   : > { %v1179_v19 = vpop.permute.xlu2 %1178 }
 0xd46   : > { %v1189_v20 = vsel %vm436_vm1, %v2155_v32, %v1179_v19 }
 0xd66   : > { %v1187_v22 = vpop.permute.xlu2 %1186 }
 0xd76   : > { %v1115_v16 = vpop.f32.mrf.mxu3 }
 0xd77   : > { %1182 = vrot.lane.b32.xlu0 %v1115_v16, %s2293_s23 }
 0xd7e   : > { %v1117_v17 = vpop.f32.mrf.mxu3 }
 0xde9   : > { %v1183_v21 = vpop.permute.xlu0 %1182 }
 0xdea   : > { %v1190_v23 = vsel %vm684_vm3, %v1189_v20, %v1183_v21 }
 0xdeb   : > { %v1191_v24 = vsel %vm686_vm4, %v1190_v23, %v1187_v22 }
 0xdec   : > { %v1197_v6 = vpack.c.bf16 %v1191_v24, %v1191_v24 }
 0xdee   : > { %1634 = vmatmul.msk.bf16.vlgmr.msrb.gmra.mxu1 %vm415_vm0, %v1197_v6 }
 0xe6b   : > { %v1227_v26 = vpop.f32.mrf.mxu1 }
 0xe6c   : > { %v1228_v27 = vadd.f32 %v1779_v25, %v1227_v26 }
 0xe6e   : > { %v1231_v28 = vadd.f32 %v1228_v27, %v2109_v53  ;;  %v1723_v53 = vld [vmem:[%s2268_s5 + $0x10] sm:$0xff] }
 0xe6f   : > { %1299 = vmatpush.bf16.msra.mxu3 %v1723_v53 }
 0xe70   : > { %v1236_v29 = vsel %vm415_vm0, %v1231_v28, 0.0 }
 0xe71   : > { %1237 = vadd.xlane.f32.xlu0 %v1236_v29 }
 0xe73   : > { %v1229_v30 = vpop.f32.mrf.mxu1 }
 0xee4   : > { %v1238_v31 = vpop.xlane.xlu0 %1237 }
 0xee5   : > { %v1239_v32 = vmul.f32 %v1238_v31, %v2050_v52 }
 0xee7   : > { %v1240_v33 = vsub.f32 %v1231_v28, %v1239_v32 }
 0xee9   : > { %v1241_v34 = vmul.f32 %v1240_v33, %v1240_v33 }
 0xeeb   : > { %v1242_v35 = vsel %vm415_vm0, %v1241_v34, 0.0 }
 0xeec   : > { %1243 = vadd.xlane.f32.xlu1 %v1242_v35 }
 0xf5f   : > { %v1244_v38 = vpop.xlane.xlu1 %1243 }
 0xf60   : > { %v1245_v39 = vmul.f32 %v1244_v38, %v2050_v52 }
 0xf62   : > { %v1246_v41 = vadd.f32 1e-05, %v1245_v39 }
 0xf64   : > { %1822 = vrsqrt.f32 %v1246_v41  ;;  %vm1253_vm13 = vweird.f32 %v1246_v41 }
 0xf6a   : > { %v1823_v45 = vpop.eup %1822 }
 0xf6b   : > { %v1248_v42 = vmul.f32 %v1823_v45, %v1246_v41  ;;  %vm1254_vm12 = vweird.f32 %v1823_v45 }
 0xf6c   : > { %vm1255_vm14 = vmor %vm1253_vm13, %vm1254_vm12 }
 0xf6d   : > { %v1249_v47 = vmul.f32 %v1823_v45, %v1248_v42 }
 0xf6f   : > { %v1250_v48 = vmul.f32 0.5, %v1249_v47 }
 0xf71   : > { %v1251_v49 = vsub.f32 1.5, %v1250_v48 }
 0xf73   : > { %v1252_v50 = vmul.f32 %v1823_v45, %v1251_v49 }
 0xf75   : > { %v1256_v54 = vsel %vm1255_vm14, %v1823_v45, %v1252_v50 }
 0xf76   : > { %v1257_v2 = vmul.f32 %v1256_v54, %v1240_v33 }
 0xf78   : > { %v1261_v57 = vmul.f32 %v1780_v51, %v1257_v2 }
 0xf7a   : > { %v1265_v58 = vadd.f32 %v1781_v55, %v1261_v57 }
 0xf7c   : > { %v1271_v59 = vpack.c.bf16 %v1265_v58, %v1265_v58 }
 0xf7e   : > { %1650 = vmatmul.msk.bf16.vlgmr.msra.gmra.mxu3 %vm415_vm0, %v1271_v59 }
0x1001   : > { %v1301_v63 = vpop.f32.mrf.mxu3 }
0x1002   : > { %v1302_v0 = vadd.f32 %v1782_v62, %v1301_v63 }
0x1004   : > { %v1305_v1 = vmax.f32 %v1302_v0, 0.0 }
0x1006   : > { %v1323_v3 = vpack.c.bf16 %v1305_v1, %v1305_v1 }
0x1008   : > { %1385 = vmatmul.bf16.vlgmr.msrb.gmra.mxu2 %v1323_v3 }
0x1009   : > { %v1303_v4 = vpop.f32.mrf.mxu3 }
0x108b   : > { %v1386_v7 = vpop.f32.mrf.mxu2 }
0x108c   : > { %v1387_v8 = vadd.f32 %v1783_v5, %v1386_v7 }
0x108e   : > { %v1390_v9 = vadd.f32 %v1387_v8, %v1265_v58 }
0x1090   : > { %v1391_v56 = vsel %vm415_vm0, %v1390_v9, 0.0 }
0x1091   : > { %1392 = vadd.xlane.f32.xlu2 %v1391_v56 }
0x1093   : > { %v1388_v10 = vpop.f32.mrf.mxu2 }
0x1104   : > { %v1393_v12 = vpop.xlane.xlu2 %1392 }
0x1105   : > { %v1394_v13 = vmul.f32 %v1393_v12, %v2050_v52 }
0x1107   : > { %v1395_v14 = vsub.f32 %v1390_v9, %v1394_v13 }
0x1109   : > { %v1396_v15 = vmul.f32 %v1395_v14, %v1395_v14 }
0x110b   : > { %v1397_v16 = vsel %vm415_vm0, %v1396_v15, 0.0 }
0x110c   : > { %1398 = vadd.xlane.f32.xlu0 %v1397_v16 }
0x117f   : > { %v1399_v17 = vpop.xlane.xlu0 %1398 }
0x1180   : > { %v1400_v18 = vmul.f32 %v1399_v17, %v2050_v52  ;;  %v1456_v52 = vld [vmem:[%s2111_s14] sm:$0xff] (%p1951_p4) }
0x1181   : > { %1457 = vst [vmem:[%s1425_s22] sm:$0xff] (%p1951_p4), %v1456_v52 }
0x1182   : > { %v1401_v19 = vadd.f32 1e-05, %v1400_v18 }
0x1184   : > { %1824 = vrsqrt.f32 %v1401_v19  ;;  %vm1408_vm1 = vweird.f32 %v1401_v19 }
0x118a   : > { %v1825_v20 = vpop.eup %1824 }
0x118b   : > { %v1403_v21 = vmul.f32 %v1825_v20, %v1401_v19  ;;  %vm1409_vm15 = vweird.f32 %v1825_v20 }
0x118c   : > { %vm1410_vm2 = vmor %vm1408_vm1, %vm1409_vm15 }
0x118d   : > { %v1404_v22 = vmul.f32 %v1825_v20, %v1403_v21 }
0x118f   : > { %v1405_v23 = vmul.f32 0.5, %v1404_v22 }
0x1191   : > { %v1406_v24 = vsub.f32 1.5, %v1405_v23 }
0x1193   : > { %v1407_v6 = vmul.f32 %v1825_v20, %v1406_v24 }
0x1195   : > { %v1411_v25 = vsel %vm1410_vm2, %v1825_v20, %v1407_v6 }
0x1196   : > { %v1412_v26 = vmul.f32 %v1411_v25, %v1395_v14 }
0x1198   : > { %v1413_v27 = vmul.f32 %v1780_v51, %v1412_v26  ;;  %1423 = sbr.rel (!%p1951_p4) target bundleno = 4517 (0x11a5), region = 68 }
0x119a   : > { %v1414_v28 = vadd.f32 %v1781_v55, %v1413_v27 }
0x119c   : > { %1700 = vst.msk [vmem:[%s2111_s14 + $0x8] sm:$0xff] %vm415_vm0, %v1414_v28 }
0x11a3   : > { %v1458_v29 = vld [vmem:[%s2111_s14 + $0x8] sm:$0xff] }
0x11a4   : > { %1459 = vst [vmem:[%s1425_s22 + $0x10] sm:$0xff] %v1458_v29 }
0x11a5 PF: > { %p18_p8 = scmp.ge.s32.totalorder %s1941_s21, 4   ;;  %s2294_s17 = smov %s1844_s18 }
0x11a6   : > { %s2295_s18 = smov %s1949_s24  ;;  %s2296_s19 = smov %s1941_s21 }
0x11a7   :  { %20 = sbr.rel (!%p18_p8) target bundleno = 2 (0x2), region = 145 }

// kernel: closed_call.17
= control target key start
LH: loop header
LB: loop body
LE: loop exit
PB: predicated region body
PF: predicated region fallthrough
CT: control target
= control target key end

     0   :  { %s3672_s0 = inlined_call_operand.vmem [shape: f32[2,8,32], index: 0, kind: input, shape index: {}]   ;;  %s3673_s1 = inlined_call_operand.vmem [shape: f32[2,8,1], index: 1, kind: input, shape index: {}]   ;;  %s3674_s2 = inlined_call_operand.vmem [shape: f32[2,2,8,32], index: 2, kind: input, shape index: {}]   ;;  %s3675_s3 = inlined_call_operand.vmem [shape: bf16[2,32,96], index: 3, kind: input, shape index: {}]   ;;  %s3676_s4 = inlined_call_operand.vmem [shape: bf16[2,32,32], index: 4, kind: input, shape index: {}]   ;;  %s3677_s5 = inlined_call_operand.vmem [shape: f32[2,1,32], index: 5, kind: input, shape index: {}]   ;;  %s3678_s6 = inlined_call_operand.vmem [shape: bf16[2,32,64], index: 6, kind: input, shape index: {}]   ;;  %s3679_s7 = inlined_call_operand.vmem [shape: bf16[2,32,32], index: 7, kind: input, shape index: {}]   ;;  %s3680_s8 = inlined_call_operand.vmem [shape: bf16[2,32,32], index: 8, kind: input, shape index: {}]   ;;  %s3681_s9 = inlined_call_operand.vmem [shape: f32[2,1,32], index: 9, kind: input, shape index: {}]   ;;  %s3682_s10 = inlined_call_operand.vmem [shape: bf16[2,32,128], index: 10, kind: input, shape index: {}]   ;;  %s3683_s11 = inlined_call_operand.vmem [shape: f32[2,1,128], index: 11, kind: input, shape index: {}]   ;;  %s3684_s12 = inlined_call_operand.vmem [shape: bf16[2,128,32], index: 12, kind: input, shape index: {}]   ;;  %s3685_s13 = inlined_call_operand.vmem [shape: f32[2,1,32], index: 13, kind: input, shape index: {}]   ;;  %s3686_s14 = inlined_call_operand.vmem [shape: f32[2,1,32], index: 14, kind: input, shape index: {}]   ;;  %s3687_s15 = inlined_call_operand.vmem [shape: f32[2,1,32], index: 15, kind: input, shape index: {}]   ;;  %s3688_s16 = inlined_call_operand.vmem [shape: bf16[32,16], index: 16, kind: input, shape index: {}]   ;;  %s3689_s17 = inlined_call_operand.vmem [shape: f32[1,16], index: 17, kind: input, shape index: {}]   ;;  %s3690_s18 = inlined_call_operand.vmem [shape: f32[2,8,16], index: 18, kind: output, shape index: {}]  }
   0x1   :  { %3719 = sst [smem:[#allocation6_spill]] %s3672_s0 }
   0x2   :  { %3720 = sst [smem:[#allocation7_spill]] %s3673_s1 }
   0x3   :  { %3721 = sst [smem:[#allocation8_spill]] %s3674_s2 }
   0x4   :  { %3722 = sst [smem:[#allocation9_spill]] %s3675_s3 }
   0x5   :  { %3723 = sst [smem:[#allocation10_spill]] %s3690_s18 }
   0x6   :  { %s3134_s27 = smov 0   ;;  %s3136_s28 = smov 0  }
   0x7   :  { %s3138_s29 = smov 0  }
   0x8 LB: > { %3724 = sst [smem:[#allocation3_spill]] %s3017_s28  ;;  %s3151_s0 = sadd.s32 1, %s3021_s29   ;;  %s3021_s29 = sphi %s3138_s29, %s3749_s29   ;;  %s3017_s28 = sphi %s3136_s28, %s3751_s28   ;;  %s3013_s27 = sphi %s3134_s27, %s3750_s27  }
   0x9   : > { %3725 = sst [smem:[#allocation4_spill]] %s3151_s0  ;;  %s84_s19 = ssub.s32 %s3021_s29, %s3151_s0 }
   0xa   : > { %s87_s1 = sadd.s32 1, %s3017_s28  ;;  %p85_p0 = scmp.eq.s32.totalorder %s84_s19, 0 }
   0xb   : > { %p94_p1 = scmp.ne.s32.totalorder %s3017_s28, %s3013_s27  ;;  %p95_p2 = scmp.eq.s32.totalorder %s3021_s29, 0 }
   0xc   : > { %s3160_s20 = scalar_select %p85_p0, %s3017_s28, %s87_s1  }
   0xd   : > { %p96_p3 = por %p95_p2, %p94_p1  ;;  %p2550_p4 = scmp.ge.s32.totalorder %s3021_s29, 2 }
   0xe   : > { %3726 = sst [smem:[#allocation5_spill]] %s3160_s20 }
   0xf   : > { %506 = sbr.rel (%p2550_p4) target bundleno = 32 (0x20), region = 76 }
  0x14   : > { %523 = sbr.rel (!%p96_p3) target bundleno = 32 (0x20), region = 88  ;;  %s525_s21 = sand.u32 (%p96_p3), 1, %s3017_s28  }
  0x15   : > { %s2552_s22 = sshll.u32 (%p96_p3), %s3021_s29, 3  ;;  %s2551_s2 = sshll.u32 (%p96_p3), %s525_s21, 4 }
  0x16   : > { %s3727_s25 = sld [smem:[#allocation8_spill]] (%p96_p3)  ;;  %s527_s19 = scalar_lea.vmem (%p96_p3), [#allocation2], %s2551_s2 }
  0x1c   : > { %s529_s26 = scalar_lea.vmem %s3727_s25, %s2552_s22 }
  0x1d   : > { %v560_v0 = vld [vmem:[%s529_s26] sm:$0xff]  ;;  %v562_v1 = vld [vmem:[%s529_s26 + $0x10] sm:$0xff] }
  0x1e   : > { %561 = vst [vmem:[%s527_s19] sm:$0xff] %v560_v0 }
  0x1f   : > { %563 = vst [vmem:[%s527_s19 + $0x8] sm:$0xff] %v562_v1 }
  0x20 PF: > { %p2553_p5 = scmp.ge.s32.totalorder %s3021_s29, 1  ;;  %p568_p6 = scmp.lt.s32.totalorder %s3021_s29, 3 }
  0x22   : > { %p569_p7 = pnand %p2553_p5, %p568_p6 }
  0x23   : > { %s3728_s3 = sld [smem:[#allocation9_spill]] (!%p569_p7)  ;;  %s3729_s21 = sadd.s32 (!%p569_p7), 4294967295, %s3021_s29  }
  0x24   : > { %572 = sbr.rel (%p569_p7) target bundleno = 6399 (0x18ff), region = 126  ;;  %p635_p8 = scmp.lt.s32.totalorder (!%p569_p7), %s3729_s21, 1 }
  0x25   : > { %s3730_s23 = smov (!%p569_p7), %s3729_s21  ;;  %s3731_s19 = sld [smem:[#allocation6_spill]] (!%p569_p7) }
  0x26   : > { %s3708_s29 = smov (!%p569_p7), 112   ;;  %s3712_s30 = smov (!%p569_p7), 120  }
  0x27   : > { %s3697_s1 = smov (!%p569_p7), 72   ;;  %s3706_s21 = smov (!%p569_p7), 80  }
  0x28   : > { %s3700_s22 = smov (!%p569_p7), 88   ;;  %s3694_s2 = smov (!%p569_p7), 104  }
  0x29   : > { %v2821_v2 = vld [vmem:[%s3728_s3 + $0x8] sm:$0xff]  ;;  %v2820_v3 = vld [vmem:[%s3728_s3] sm:$0xff]  ;;  %s3753_s23 = smov (!%p635_p8, %s3730_s23), 1  ;;  %vm667_vm0 = vcmask 261120   ;;  %s3732_s26 = sld [smem:[#allocation7_spill]]  ;;  %v3030_v10 = vmov 0  }
  0x2a   : > { %677 = vmatpush.bf16.msra.mxu0 %v2821_v2  ;;  %s3180_s24 = sshll.u32 %s3753_s23, 3  ;;  %2902 = vset.pattern.permute.xlu1 %v3030_v10  ;;  %vm688_vm1 = vcmask 64512   ;;  %s3691_s23 = smov 64   ;;  %vm732_vm2 = vcmask 1043456   ;;  %vm936_vm3 = vcmask 130048   ;;  %vm938_vm4 = vcmask 195584  }
  0x2b   : > { %s638_s20 = scalar_lea.vmem %s3731_s19, %s3180_s24  ;;  %2903 = vset.pattern.permute.xlu0 %v3030_v10  ;;  %s3692_s25 = smov 56   ;;  %v2824_v10 = vld [vmem:[%s3678_s6] sm:$0xff] }
  0x2c   : > { %v3186_v4 = vld [vmem:[%s638_s20] sm:$0xff]  ;;  %s3714_s20 = smov 96   ;;  %s3739_s28 = smov 120  }
  0x2d   : > { %v654_v5 = vpack.c.bf16 %v3186_v4, %v3186_v4 }
  0x2e   : > { %678 = vmatpush.bf16.msra.mxu0 %v2820_v3 }
  0x2f   : > { %s642_s19 = scalar_lea.vmem %s3732_s26, %s3180_s24  ;;  %s3693_s26 = smov 40  }
  0x30   : > { %v649_v9 = vld [vmem:[%s642_s19] sm:$0xff]  ;;  %s3696_s19 = smov 48  }
  0x31   : > { %2566 = vmatmul.msk.bf16.vlgmr.msra.gmra.mxu0 %vm667_vm0, %v654_v5 }
  0xae   : > { %v680_v6 = vpop.f32.mrf.mxu0 }
  0xaf   : > { %v3191_v7 = vpack.c.bf16 %v680_v6, %v680_v6 }
  0xb1   : > { %807 = vrot.lane.b32.xlu2 %v3191_v7, %s3708_s29  ;;  %749 = vrot.lane.b32.xlu1 %v3191_v7, %s3712_s30 }
  0xb2   : > { %686 = vrot.lane.b32.xlu0 %v3191_v7, %s3714_s20 }
  0xb6   : > { %v682_v8 = vpop.f32.mrf.mxu0 }
  0xb9   : > { %867 = vrot.lane.b32.xlu2 %v3191_v7, %s3697_s1  ;;  %809 = vrot.lane.b32.xlu1 %v3191_v7, %s3706_s21 }
  0xba   : > { %751 = vrot.lane.b32.xlu0 %v3191_v7, %s3700_s22 }
  0xc1   : > { %711 = vperm.xlu1 %2902, %v649_v9  }
  0xc2   : > { %865 = vrot.lane.b32.xlu0 %v3191_v7, %s3694_s2  ;;  %s3702_s2 = smov 8  }
 0x10b   : > { %v808_v11 = vpop.permute.xlu2 %807 }
 0x113   : > { %v868_v15 = vpop.permute.xlu2 %867 }
 0x114   : > { %v873_v20 = vsel %vm688_vm1, %v868_v15, 0 }
 0x123   : > { %v750_v12 = vpop.permute.xlu1 %749 }
 0x124   : > { %v687_v13 = vpop.permute.xlu0 %686 }
 0x125   : > { %v693_v14 = vsel %vm688_vm1, %v687_v13, 0 }
 0x126   : > { %702 = vmatpush.bf16.xpose.msra.mxu1 %v693_v14 }
 0x12b   : > { %v810_v16 = vpop.permute.xlu1 %809 }
 0x12c   : > { %v752_v17 = vpop.permute.xlu0 %751  ;;  %v815_v18 = vsel %vm688_vm1, %v810_v16, 0 }
 0x12d   : > { %2567 = vmatmul.msk.bf16.vlgmr.msra.gmra.mxu1 %vm688_vm1, %v3191_v7  ;;  %v757_v19 = vsel %vm688_vm1, %v752_v17, 0  ;;  %824 = vmatpush.bf16.xpose.msrb.mxu0 %v815_v18 }
 0x12e   : > { %766 = vmatpush.bf16.xpose.msra.mxu3 %v757_v19 }
 0x133   : > { %v3220_v23 = vpop.permute.xlu1 %711 }
 0x134   : > { %2571 = vmatmul.msk.bf16.vlgmr.msrb.gmra.mxu0 %vm688_vm1, %v808_v11  ;;  %v866_v21 = vpop.permute.xlu0 %865 }
 0x135   : > { %2569 = vmatmul.msk.bf16.vlgmr.msra.gmra.mxu3 %vm688_vm1, %v750_v12 }
 0x136   : > { %882 = vmatpush.bf16.xpose.msrb.mxu3 %v873_v20 }
 0x145   : > { %2573 = vmatmul.msk.bf16.vlgmr.msrb.gmra.mxu3 %vm688_vm1, %v866_v21 }
 0x1aa   : > { %v704_v22 = vpop.f32.mrf.mxu1 }
 0x1ab   : > { %v708_v24 = vmul.f32 0.35355338, %v704_v22 }
 0x1ad   : > { %v714_v25 = vmul.f32 %v3220_v23, %v708_v24 }
 0x1af   : > { %v715_v26 = vsel %vm688_vm1, %v714_v25, -inf }
 0x1b0   : > { %716 = vmax.xlane.f32.xlu2 %v715_v26 }
 0x1b1   : > { %v826_v27 = vpop.f32.mrf.mxu0 }
 0x1b2   : > { %v706_v28 = vpop.f32.mrf.mxu1  ;;  %v830_v29 = vmul.f32 0.35355338, %v826_v27 }
 0x1b4   : > { %v831_v30 = vmul.f32 %v830_v29, %v3220_v23 }
 0x1b6   : > { %v832_v31 = vsel %vm688_vm1, %v831_v30, -inf }
 0x1b7   : > { %833 = vmax.xlane.f32.xlu1 %v832_v31 }
 0x1b8   : > { %v768_v32 = vpop.f32.mrf.mxu3 }
 0x1b9   : > { %v772_v33 = vmul.f32 0.35355338, %v768_v32  ;;  %v828_v34 = vpop.f32.mrf.mxu0 }
 0x1bb   : > { %v773_v35 = vmul.f32 %v772_v33, %v3220_v23 }
 0x1bd   : > { %v774_v36 = vsel %vm688_vm1, %v773_v35, -inf }
 0x1be   : > { %775 = vmax.xlane.f32.xlu0 %v774_v36 }
 0x1c0   : > { %v770_v37 = vpop.f32.mrf.mxu3 }
 0x1c8   : > { %v884_v38 = vpop.f32.mrf.mxu3 }
 0x1c9   : > { %v888_v39 = vmul.f32 0.35355338, %v884_v38 }
 0x1cb   : > { %v889_v40 = vmul.f32 %v888_v39, %v3220_v23 }
 0x1cd   : > { %v890_v41 = vsel %vm688_vm1, %v889_v40, -inf }
 0x1ce   : > { %891 = vmax.xlane.f32.xlu2 %v890_v41  ;;  %v2822_v41 = vld [vmem:[%s3676_s4] sm:$0xff] }
 0x1d0   : > { %v886_v42 = vpop.f32.mrf.mxu3 }
 0x1d2   : > { %727 = vrot.lane.b32.xlu0 %v3191_v7, %s3691_s23  ;;  %s575_s23 = sand.u32 1, %s3013_s27   ;;  %s3734_s27 = smov 104  }
 0x223   : > { %v717_v43 = vpop.xlane.xlu2 %716 }
 0x224   : > { %v718_v44 = vsub.f32 %v714_v25, %v717_v43 }
 0x226   : > { %v719_v45 = vmul.f32 1.442695, %v718_v44 }
 0x228   : > { %2917 = vpow2.f32 %v719_v45 }
 0x22a   : > { %v834_v46 = vpop.xlane.xlu1 %833 }
 0x22b   : > { %v835_v47 = vsub.f32 %v831_v30, %v834_v46 }
 0x22d   : > { %v836_v48 = vmul.f32 1.442695, %v835_v47 }
 0x22e   : > { %v2918_v49 = vpop.eup %2917 }
 0x22f   : > { %2919 = vpow2.f32 %v836_v48  ;;  %v721_v50 = vsel %vm688_vm1, %v2918_v49, 0.0 }
 0x230   : > { %722 = vadd.xlane.f32.xlu2 %v721_v50 }
 0x231   : > { %v776_v51 = vpop.xlane.xlu0 %775 }
 0x232   : > { %v777_v52 = vsub.f32 %v773_v35, %v776_v51 }
 0x234   : > { %v778_v53 = vmul.f32 1.442695, %v777_v52 }
 0x235   : > { %v2920_v54 = vpop.eup %2919 }
 0x236   : > { %2921 = vpow2.f32 %v778_v53  ;;  %v838_v55 = vsel %vm688_vm1, %v2920_v54, 0.0 }
 0x237   : > { %839 = vadd.xlane.f32.xlu1 %v838_v55 }
 0x23c   : > { %v2922_v56 = vpop.eup %2921 }
 0x23d   : > { %v780_v57 = vsel %vm688_vm1, %v2922_v56, 0.0 }
 0x23f   : > { %781 = vadd.xlane.f32.xlu1 %v780_v57 }
 0x241   : > { %v892_v58 = vpop.xlane.xlu2 %891 }
 0x242   : > { %v893_v59 = vsub.f32 %v889_v40, %v892_v58  ;;  %v2823_v40 = vld [vmem:[%s3676_s4 + $0x8] sm:$0xff] }
 0x243   : > { %970 = vmatpush.bf16.msra.mxu0 %v2823_v40 }
 0x244   : > { %v894_v60 = vmul.f32 1.442695, %v893_v59  ;;  %v728_v61 = vpop.permute.xlu0 %727 }
 0x245   : > { %v734_v62 = vsel %vm732_vm2, %v728_v61, 0 }
 0x246   : > { %2923 = vpow2.f32 %v894_v60  ;;  %743 = vmatpush.bf16.msra.mxu2 %v734_v62  ;;  %v2904_v60 = vld [vmem:[%s3677_s5] ss:$0 sm:$0xff] }
 0x247   : > { %971 = vmatpush.bf16.msra.mxu0 %v2822_v41 }
 0x248   : > { %786 = vrot.lane.b32.xlu2 %v3191_v7, %s3692_s25  ;;  %s3244_s25 = sshll.u32 %s575_s23, 4  ;;  %s3704_s23 = smov 16  }
 0x249   : > { %s3699_s1 = scalar_lea.vmem [#allocation2], %s3244_s25  ;;  %s3747_s18 = scalar_lea.vmem [#allocation2], %s3244_s25 }
 0x24a   : > { %v1017_v11 = vld [vmem:[%s3699_s1] sm:$0xff]  ;;  %s3743_s1 = smov 56  }
 0x24b   : > { %v1022_v13 = vpack.c.bf16 %v1017_v11, %v1017_v11 }
 0x24c   : > { %v2924_v63 = vpop.eup %2923 }
 0x24d   : > { %v896_v0 = vsel %vm688_vm1, %v2924_v63, 0.0 }
 0x24e   : > { %897 = vadd.xlane.f32.xlu0 %v896_v0 }
 0x250   : > { %902 = vrot.lane.b32.xlu2 %v3191_v7, %s3693_s26  ;;  %s3710_s26 = smov 24  }
 0x258   : > { %844 = vrot.lane.b32.xlu1 %v3191_v7, %s3696_s19  ;;  %v2825_v7 = vld [vmem:[%s3678_s6 + $0x8] sm:$0xff]  ;;  %s3733_s19 = smov 72  }
 0x259   : > { %1044 = vmatpush.bf16.msrb.mxu1 %v2825_v7 }
 0x25d   : > { %1045 = vmatpush.bf16.msrb.mxu1 %v2824_v10 }
 0x260   : > { %2592 = vmatmul.msk.bf16.vlgmr.msrb.gmra.mxu1 %vm667_vm0, %v1022_v13 }
 0x2a3   : > { %v723_v1 = vpop.xlane.xlu2 %722 }
 0x2a4   : > { %2925 = vrcp.f32 %v723_v1 }
 0x2aa   : > { %v2926_v2 = vpop.eup %2925  ;;  %v840_v3 = vpop.xlane.xlu1 %839 }
 0x2ab   : > { %v787_v5 = vpop.permute.xlu2 %786  ;;  %v725_v6 = vmul.f32 %v2926_v2, %v2918_v49 }
 0x2ac   : > { %v792_v8 = vsel %vm732_vm2, %v787_v5, 0 }
 0x2ad   : > { %801 = vmatpush.bf16.msrb.mxu2 %v792_v8  ;;  %v726_v9 = vpack.c.bf16 %v725_v6, %v725_v6 }
 0x2af   : > { %2568 = vmatmul.msk.bf16.vlgmr.msra.gmra.mxu2 %vm688_vm1, %v726_v9 }
 0x2b2   : > { %v782_v12 = vpop.xlane.xlu1 %781 }
 0x2b3   : > { %2927 = vrcp.f32 %v782_v12  ;;  %v903_v19 = vpop.permute.xlu2 %902 }
 0x2b4   : > { %2929 = vrcp.f32 %v840_v3  ;;  %v908_v22 = vsel %vm732_vm2, %v903_v19, 0 }
 0x2b9   : > { %v2928_v14 = vpop.eup %2927 }
 0x2ba   : > { %v784_v15 = vmul.f32 %v2928_v14, %v2922_v56  ;;  %v2930_v17 = vpop.eup %2929 }
 0x2bb   : > { %v842_v18 = vmul.f32 %v2930_v17, %v2920_v54 }
 0x2bc   : > { %v785_v16 = vpack.c.bf16 %v784_v15, %v784_v15 }
 0x2bd   : > { %v843_v24 = vpack.c.bf16 %v842_v18, %v842_v18  ;;  %v3038_v18 = vmov 32.0  }
 0x2bf   : > { %2570 = vmatmul.msk.bf16.vlgmr.msrb.gmra.mxu2 %vm688_vm1, %v785_v16 }
 0x2c1   : > { %v898_v25 = vpop.xlane.xlu0 %897 }
 0x2c2   : > { %2931 = vrcp.f32 %v898_v25 }
 0x2c3   : > { %2933 = vrcp.f32 %v3038_v18 }
 0x2c8   : > { %v2932_v26 = vpop.eup %2931 }
 0x2c9   : > { %v900_v27 = vmul.f32 %v2932_v26, %v2924_v63  ;;  %v2934_v19 = vpop.eup %2933 }
 0x2ca   : > { %v845_v20 = vpop.permute.xlu1 %844  ;;  %vm988_vm5 = vweird.f32 %v2934_v19 }
 0x2cb   : > { %v850_v21 = vsel %vm732_vm2, %v845_v20, 0  ;;  %v901_v28 = vpack.c.bf16 %v900_v27, %v900_v27  ;;  %v984_v20 = vmul.f32 32.0, %v2934_v19 }
 0x2cc   : > { %859 = vmatpush.bf16.msra.mxu2 %v850_v21 }
 0x2cd   : > { %v985_v21 = vsub.f32 1.0, %v984_v20 }
 0x2cf   : > { %2572 = vmatmul.msk.bf16.vlgmr.msra.gmra.mxu2 %vm688_vm1, %v843_v24 }
 0x2d0   : > { %917 = vmatpush.bf16.msrb.mxu2 %v908_v22  ;;  %v986_v22 = vmul.f32 %v2934_v19, %v985_v21 }
 0x2d2   : > { %v987_v24 = vadd.f32 %v2934_v19, %v986_v22 }
 0x2d4   : > { %v3300_v25 = vsel %vm988_vm5, %v2934_v19, %v987_v24 }
 0x2dd   : > { %v1047_v30 = vpop.f32.mrf.mxu1 }
 0x2de   : > { %v1084_v31 = vpack.c.bf16 %v1047_v30, %v1047_v30 }
 0x2df   : > { %2574 = vmatmul.msk.bf16.vlgmr.msrb.gmra.mxu2 %vm688_vm1, %v901_v28 }
 0x2e0   : > { %1142 = vrot.lane.b32.xlu0 %v1084_v31, %s3700_s22  ;;  %s3744_s22 = smov 40  }
 0x2e5   : > { %v1049_v33 = vpop.f32.mrf.mxu1 }
 0x2e8   : > { %1198 = vrot.lane.b32.xlu0 %v1084_v31, %s3708_s29 }
 0x332   : > { %v745_v29 = vpop.f32.mrf.mxu2 }
 0x33a   : > { %v747_v32 = vpop.f32.mrf.mxu2 }
 0x342   : > { %v803_v34 = vpop.f32.mrf.mxu2 }
 0x343   : > { %924 = vrot.lane.b32.xlu2 %v803_v34, %s3702_s2  ;;  %s3735_s2 = smov 16  }
 0x34a   : > { %v805_v35 = vpop.f32.mrf.mxu2 }
 0x352   : > { %v861_v36 = vpop.f32.mrf.mxu2  ;;  %v1143_v42 = vpop.permute.xlu0 %1142 }
 0x353   : > { %928 = vrot.lane.b32.xlu1 %v861_v36, %s3704_s23  ;;  %v1148_v43 = vsel %vm688_vm1, %v1143_v42, 0  ;;  %s3736_s23 = smov 8  }
 0x354   : > { %1157 = vmatpush.bf16.xpose.msra.mxu1 %v1148_v43 }
 0x35a   : > { %v863_v37 = vpop.f32.mrf.mxu2  ;;  %v1199_v56 = vpop.permute.xlu0 %1198 }
 0x362   : > { %v919_v38 = vpop.f32.mrf.mxu2 }
 0x363   : > { %932 = vrot.lane.b32.xlu2 %v919_v38, %s3710_s26 }
 0x36a   : > { %v921_v39 = vpop.f32.mrf.mxu2 }
 0x36b   : > { %1086 = vrot.lane.b32.xlu2 %v1084_v31, %s3714_s20  ;;  %s3740_s20 = smov 112  }
 0x373   : > { %1140 = vrot.lane.b32.xlu2 %v1084_v31, %s3712_s30 }
 0x37b   : > { %1200 = vrot.lane.b32.xlu2 %v1084_v31, %s3706_s21  ;;  %s3742_s21 = smov 64  }
 0x383   : > { %1257 = vrot.lane.b32.xlu2 %v1084_v31, %s3733_s19 }
 0x38b   : > { %1255 = vrot.lane.b32.xlu2 %v1084_v31, %s3734_s27 }
 0x39d   : > { %v925_v44 = vpop.permute.xlu2 %924 }
 0x39e   : > { %v935_v46 = vsel %vm688_vm1, %v745_v29, %v925_v44 }
 0x3bd   : > { %v933_v45 = vpop.permute.xlu2 %932 }
 0x3c5   : > { %v929_v47 = vpop.permute.xlu1 %928  ;;  %v1087_v48 = vpop.permute.xlu2 %1086 }
 0x3c6   : > { %v937_v49 = vsel %vm936_vm3, %v935_v46, %v929_v47  ;;  %v1092_v50 = vsel %vm688_vm1, %v1087_v48, 0 }
 0x3c7   : > { %v939_v51 = vsel %vm938_vm4, %v937_v49, %v933_v45  ;;  %1101 = vmatpush.bf16.xpose.msra.mxu2 %v1092_v50 }
 0x3c8   : > { %v944_v52 = vpack.c.bf16 %v939_v51, %v939_v51  ;;  %v2827_v51 = vld [vmem:[%s3679_s7 + $0x8] sm:$0xff] }
 0x3c9   : > { %1077 = vmatpush.bf16.msra.mxu3 %v2827_v51 }
 0x3ca   : > { %2583 = vmatmul.msk.bf16.vlgmr.msra.gmra.mxu0 %vm667_vm0, %v944_v52  ;;  %v2826_v52 = vld [vmem:[%s3679_s7] sm:$0xff] }
 0x3cd   : > { %v1141_v53 = vpop.permute.xlu2 %1140  ;;  %1078 = vmatpush.bf16.msra.mxu3 %v2826_v52 }
 0x3ce   : > { %2602 = vmatmul.msk.bf16.vlgmr.msra.gmra.mxu2 %vm688_vm1, %v1084_v31  ;;  %2604 = vmatmul.msk.bf16.vlgmr.msra.gmra.mxu1 %vm688_vm1, %v1141_v53 }
 0x3d5   : > { %v1201_v54 = vpop.permute.xlu2 %1200 }
 0x3d6   : > { %v1206_v55 = vsel %vm688_vm1, %v1201_v54, 0 }
 0x3d7   : > { %1215 = vmatpush.bf16.xpose.msrb.mxu2 %v1206_v55 }
 0x3dd   : > { %v1258_v57 = vpop.permute.xlu2 %1257 }
 0x3de   : > { %v1263_v58 = vsel %vm688_vm1, %v1258_v57, 0  ;;  %2606 = vmatmul.msk.bf16.vlgmr.msrb.gmra.mxu2 %vm688_vm1, %v1199_v56 }
 0x3df   : > { %1272 = vmatpush.bf16.xpose.msrb.mxu1 %v1263_v58 }
 0x3e5   : > { %v1256_v59 = vpop.permute.xlu2 %1255 }
 0x3e6   : > { %2608 = vmatmul.msk.bf16.vlgmr.msrb.gmra.mxu1 %vm688_vm1, %v1256_v59 }
 0x447   : > { %v973_v61 = vpop.f32.mrf.mxu0 }
 0x448   : > { %v974_v62 = vadd.f32 %v2904_v60, %v973_v61 }
 0x44a   : > { %v977_v63 = vadd.f32 %v974_v62, %v3186_v4  ;;  %v3324_v62 = vld [vmem:[%s3686_s14] ss:$0 sm:$0xff] }
 0x44b   : > { %v1159_v0 = vpop.f32.mrf.mxu1 }
 0x44c   : > { %v980_v1 = vsel %vm667_vm0, %v977_v63, 0.0  ;;  %v1163_v2 = vmul.f32 0.35355338, %v1159_v0  ;;  %v3329_v0 = vld [vmem:[%s3687_s15] ss:$0 sm:$0xff] }
 0x44d   : > { %981 = vadd.xlane.f32.xlu1 %v980_v1 }
 0x44e   : > { %v1164_v8 = vsel %vm688_vm1, %v1163_v2, -inf }
 0x44f   : > { %v975_v3 = vpop.f32.mrf.mxu0 }
 0x451   : > { %v1103_v5 = vpop.f32.mrf.mxu2 }
 0x452   : > { %v1107_v6 = vmul.f32 0.35355338, %v1103_v5 }
 0x453   : > { %v1161_v9 = vpop.f32.mrf.mxu1 }
 0x454   : > { %v1108_v7 = vsel %vm688_vm1, %v1107_v6, -inf }
 0x455   : > { %1109 = vmax.xlane.f32.xlu2 %v1108_v7  ;;  %1165 = vmax.xlane.f32.xlu1 %v1164_v8 }
 0x459   : > { %v1105_v10 = vpop.f32.mrf.mxu2 }
 0x461   : > { %v1217_v11 = vpop.f32.mrf.mxu2 }
 0x462   : > { %v1221_v14 = vmul.f32 0.35355338, %v1217_v11 }
 0x463   : > { %v1274_v12 = vpop.f32.mrf.mxu1 }
 0x464   : > { %v1278_v13 = vmul.f32 0.35355338, %v1274_v12  ;;  %v1222_v17 = vsel %vm688_vm1, %v1221_v14, -inf }
 0x466   : > { %v1279_v4 = vsel %vm688_vm1, %v1278_v13, -inf }
 0x467   : > { %1280 = vmax.xlane.f32.xlu1 %v1279_v4 }
 0x469   : > { %v1219_v15 = vpop.f32.mrf.mxu2 }
 0x46b   : > { %v1276_v16 = vpop.f32.mrf.mxu1 }
 0x46f   : > { %1223 = vmax.xlane.f32.xlu1 %v1222_v17 }
 0x4c0   : > { %v982_v26 = vpop.xlane.xlu1 %981 }
 0x4c1   : > { %v990_v27 = vmul.f32 %v3300_v25, %v982_v26 }
 0x4c3   : > { %v991_v28 = vsub.f32 %v977_v63, %v990_v27 }
 0x4c5   : > { %v992_v29 = vmul.f32 %v991_v28, %v991_v28 }
 0x4c7   : > { %v993_v30 = vsel %vm667_vm0, %v992_v29, 0.0 }
 0x4c8   : > { %994 = vadd.xlane.f32.xlu0 %v993_v30  ;;  %v1166_v31 = vpop.xlane.xlu1 %1165  ;;  %v1110_v32 = vpop.xlane.xlu2 %1109 }
 0x4c9   : > { %v1167_v33 = vsub.f32 %v1163_v2, %v1166_v31  ;;  %v1111_v35 = vsub.f32 %v1107_v6, %v1110_v32 }
 0x4cb   : > { %v1168_v34 = vmul.f32 1.442695, %v1167_v33  ;;  %v1112_v36 = vmul.f32 1.442695, %v1111_v35 }
 0x4cd   : > { %2935 = vpow2.f32 %v1168_v34 }
 0x4ce   : > { %2937 = vpow2.f32 %v1112_v36 }
 0x4d3   : > { %v3304_v37 = vpop.eup %2935 }
 0x4d4   : > { %v1170_v38 = vsel %vm688_vm1, %v3304_v37, 0.0  ;;  %v2938_v39 = vpop.eup %2937 }
 0x4d5   : > { %1171 = vadd.xlane.f32.xlu1 %v1170_v38  ;;  %v1114_v43 = vsel %vm688_vm1, %v2938_v39, 0.0 }
 0x4da   : > { %v1281_v40 = vpop.xlane.xlu1 %1280 }
 0x4db   : > { %v1282_v41 = vsub.f32 %v1278_v13, %v1281_v40 }
 0x4dd   : > { %v1283_v42 = vmul.f32 1.442695, %v1282_v41  ;;  %1115 = vadd.xlane.f32.xlu1 %v1114_v43  ;;  %v2829_v41 = vld [vmem:[%s3680_s8 + $0x8] sm:$0xff] }
 0x4de   : > { %1357 = vmatpush.bf16.msra.mxu2 %v2829_v41 }
 0x4df   : > { %2939 = vpow2.f32 %v1283_v42  ;;  %v2828_v42 = vld [vmem:[%s3680_s8] sm:$0xff] }
 0x4e2   : > { %v1224_v44 = vpop.xlane.xlu1 %1223  ;;  %1358 = vmatpush.bf16.msra.mxu2 %v2828_v42  ;;  %v2841_v42 = vld [vmem:[%s3728_s3 + $0x18] sm:$0xff] }
 0x4e3   : > { %v1225_v45 = vsub.f32 %v1221_v14, %v1224_v44 }
 0x4e5   : > { %v3309_v46 = vpop.eup %2939  ;;  %v1226_v47 = vmul.f32 1.442695, %v1225_v45 }
 0x4e6   : > { %v1285_v48 = vsel %vm688_vm1, %v3309_v46, 0.0 }
 0x4e7   : > { %2941 = vpow2.f32 %v1226_v47  ;;  %1286 = vadd.xlane.f32.xlu0 %v1285_v48 }
 0x4ed   : > { %v2942_v49 = vpop.eup %2941 }
 0x4ee   : > { %v1228_v50 = vsel %vm688_vm1, %v2942_v49, 0.0 }
 0x4ef   : > { %1229 = vadd.xlane.f32.xlu2 %v1228_v50  ;;  %v2907_v50 = vld [vmem:[%s3681_s9] ss:$0 sm:$0xff] }
 0x53b   : > { %v995_v53 = vpop.xlane.xlu0 %994 }
 0x53c   : > { %v996_v54 = vmul.f32 %v995_v53, %v3300_v25 }
 0x53e   : > { %v997_v55 = vadd.f32 1e-05, %v996_v54 }
 0x540   : > { %2943 = vrsqrt.f32 %v997_v55  ;;  %vm1004_vm7 = vweird.f32 %v997_v55 }
 0x546   : > { %v2944_v56 = vpop.eup %2943 }
 0x547   : > { %v999_v57 = vmul.f32 %v2944_v56, %v997_v55  ;;  %vm1005_vm6 = vweird.f32 %v2944_v56 }
 0x548   : > { %vm1006_vm8 = vmor %vm1004_vm7, %vm1005_vm6  ;;  %v1172_v6 = vpop.xlane.xlu1 %1171 }
 0x549   : > { %v1000_v58 = vmul.f32 %v2944_v56, %v999_v57 }
 0x54b   : > { %v1001_v59 = vmul.f32 0.5, %v1000_v58 }
 0x54d   : > { %v1002_v60 = vsub.f32 1.5, %v1001_v59 }
 0x54f   : > { %v1003_v61 = vmul.f32 %v2944_v56, %v1002_v60 }
 0x550   : > { %v1116_v8 = vpop.xlane.xlu1 %1115 }
 0x551   : > { %v1007_v63 = vsel %vm1006_vm8, %v2944_v56, %v1003_v61  ;;  %2945 = vrcp.f32 %v1116_v8  ;;  %v2831_v61 = vld [vmem:[%s3682_s10 + $0x8] sm:$0xff] }
 0x552   : > { %v1008_v1 = vmul.f32 %v1007_v63, %v991_v28  ;;  %v2830_v63 = vld [vmem:[%s3682_s10] sm:$0xff]  ;;  %v2837_v8 = vld [vmem:[%s3684_s12 + $0x28] sm:$0xff] }
 0x554   : > { %v1012_v2 = vmul.f32 %v3324_v62, %v1008_v1  ;;  %v2839_v1 = vld [vmem:[%s3684_s12 + $0x38] sm:$0xff] }
 0x555   : > { %1496 = vmatpush.bf16.msra.mxu1 %v2839_v1 }
 0x556   : > { %v3333_v3 = vadd.f32 %v3329_v0, %v1012_v2 }
 0x557   : > { %v2946_v9 = vpop.eup %2945 }
 0x558   : > { %v1055_v5 = vpack.c.bf16 %v3333_v3, %v3333_v3  ;;  %v1118_v10 = vmul.f32 %v2946_v9, %v2938_v39  ;;  %v2836_v9 = vld [vmem:[%s3684_s12 + $0x20] sm:$0xff] }
 0x55a   : > { %2601 = vmatmul.msk.bf16.vlgmr.msra.gmra.mxu3 %vm667_vm0, %v1055_v5  ;;  %v1119_v13 = vpack.c.bf16 %v1118_v10, %v1118_v10  ;;  %v1287_v20 = vpop.xlane.xlu0 %1286  ;;  %v2838_v5 = vld [vmem:[%s3684_s12 + $0x30] sm:$0xff] }
 0x55b   : > { %1497 = vmatpush.bf16.msra.mxu1 %v2838_v5 }
 0x55f   : > { %1498 = vmatpush.bf16.msra.mxu1 %v2837_v8 }
 0x562   : > { %v1230_v14 = vpop.xlane.xlu2 %1229 }
 0x563   : > { %2947 = vrcp.f32 %v1230_v14  ;;  %1499 = vmatpush.bf16.msra.mxu1 %v2836_v9 }
 0x564   : > { %2949 = vrcp.f32 %v1172_v6 }
 0x565   : > { %2951 = vrcp.f32 %v1287_v20 }
 0x569   : > { %v2948_v15 = vpop.eup %2947 }
 0x56a   : > { %v1232_v16 = vmul.f32 %v2948_v15, %v2942_v49  ;;  %v2950_v21 = vpop.eup %2949 }
 0x56b   : > { %v1174_v22 = vmul.f32 %v2950_v21, %v3304_v37  ;;  %v2952_v30 = vpop.eup %2951  ;;  %v2833_v21 = vld [vmem:[%s3684_s12 + $0x8] sm:$0xff] }
 0x56c   : > { %v1233_v19 = vpack.c.bf16 %v1232_v16, %v1232_v16  ;;  %v1289_v31 = vmul.f32 %v2952_v30, %v3309_v46 }
 0x56d   : > { %v1175_v29 = vpack.c.bf16 %v1174_v22, %v1174_v22  ;;  %v2832_v22 = vld [vmem:[%s3684_s12] sm:$0xff] }
 0x56e   : > { %v1290_v33 = vpack.c.bf16 %v1289_v31, %v1289_v31  ;;  %v2909_v31 = vld [vmem:[%s3685_s13] ss:$0 sm:$0xff] }
 0x5dd   : > { %v1080_v7 = vpop.f32.mrf.mxu3 }
 0x5de   : > { %v1120_v11 = vpack.c.bf16 %v1080_v7, %v1080_v7 }
 0x5e0   : > { %1177 = vrot.lane.b32.xlu1 %v1120_v11, %s3712_s30  ;;  %1291 = vrot.lane.b32.xlu0 %v1120_v11, %s3734_s27  ;;  %v1125_v12 = vsel %vm732_vm2, %v1120_v11, 0  ;;  %s3737_s30 = smov 88  }
 0x5e1   : > { %1234 = vrot.lane.b32.xlu2 %v1120_v11, %s3708_s29  ;;  %1134 = vmatpush.bf16.msrb.mxu0 %v1125_v12  ;;  %v2835_v11 = vld [vmem:[%s3684_s12 + $0x18] sm:$0xff]  ;;  %s3741_s29 = smov 80  }
 0x5e2   : > { %1500 = vmatpush.bf16.msra.mxu1 %v2835_v11 }
 0x5e4   : > { %2603 = vmatmul.msk.bf16.vlgmr.msrb.gmra.mxu0 %vm688_vm1, %v1119_v13 }
 0x5e5   : > { %v1082_v4 = vpop.f32.mrf.mxu3 }
 0x5e6   : > { %v2834_v4 = vld [vmem:[%s3684_s12 + $0x10] sm:$0xff] }
 0x5e7   : > { %1501 = vmatpush.bf16.msra.mxu1 %v2834_v4 }
 0x5eb   : > { %1502 = vmatpush.bf16.msra.mxu1 %v2833_v21 }
 0x5ef   : > { %1503 = vmatpush.bf16.msra.mxu1 %v2832_v22 }
 0x63b   : > { %v1235_v17 = vpop.permute.xlu2 %1234 }
 0x63c   : > { %v1240_v18 = vsel %vm732_vm2, %v1235_v17, 0 }
 0x63d   : > { %1249 = vmatpush.bf16.msra.mxu0 %v1240_v18 }
 0x640   : > { %2607 = vmatmul.msk.bf16.vlgmr.msra.gmra.mxu0 %vm688_vm1, %v1233_v19 }
 0x641   : > { %1419 = vmatpush.bf16.msrb.mxu0 %v2831_v61 }
 0x645   : > { %1420 = vmatpush.bf16.msrb.mxu0 %v2830_v63 }
 0x652   : > { %v1292_v24 = vpop.permute.xlu0 %1291  ;;  %v1178_v26 = vpop.permute.xlu1 %1177 }
 0x653   : > { %v1297_v27 = vsel %vm732_vm2, %v1292_v24, 0  ;;  %v1183_v28 = vsel %vm732_vm2, %v1178_v26, 0  ;;  %v2908_v24 = vld [vmem:[%s3683_s11] ss:$0 sm:$0xff] }
 0x654   : > { %1192 = vmatpush.bf16.msrb.mxu3 %v1183_v28 }
 0x657   : > { %2605 = vmatmul.msk.bf16.vlgmr.msrb.gmra.mxu3 %vm688_vm1, %v1175_v29 }
 0x658   : > { %1306 = vmatpush.bf16.msra.mxu3 %v1297_v27 }
 0x65c   : > { %1561 = vmatpush.bf16.msrb.mxu3 %v2841_v42 }
 0x661   : > { %v1136_v32 = vpop.f32.mrf.mxu0 }
 0x667   : > { %2609 = vmatmul.msk.bf16.vlgmr.msra.gmra.mxu3 %vm688_vm1, %v1290_v33 }
 0x669   : > { %v1138_v34 = vpop.f32.mrf.mxu0 }
 0x6bd   : > { %v1251_v35 = vpop.f32.mrf.mxu0 }
 0x6be   : > { %1317 = vrot.lane.b32.xlu0 %v1251_v35, %s3735_s2 }
 0x6c5   : > { %v1253_v36 = vpop.f32.mrf.mxu0 }
 0x6da   : > { %v1194_v37 = vpop.f32.mrf.mxu3 }
 0x6db   : > { %1313 = vrot.lane.b32.xlu1 %v1194_v37, %s3736_s23 }
 0x6e2   : > { %v1196_v38 = vpop.f32.mrf.mxu3 }
 0x6ea   : > { %v1308_v39 = vpop.f32.mrf.mxu3 }
 0x6eb   : > { %1321 = vrot.lane.b32.xlu1 %v1308_v39, %s3710_s26  ;;  %s3738_s26 = smov 96  }
 0x6f2   : > { %v1310_v40 = vpop.f32.mrf.mxu3 }
 0x730   : > { %v1318_v45 = vpop.permute.xlu0 %1317 }
 0x74d   : > { %v1314_v43 = vpop.permute.xlu1 %1313 }
 0x74e   : > { %v1324_v44 = vsel %vm688_vm1, %v1136_v32, %v1314_v43  ;;  %v2840_v43 = vld [vmem:[%s3728_s3 + $0x10] sm:$0xff] }
 0x74f   : > { %v1325_v46 = vsel %vm936_vm3, %v1324_v44, %v1318_v45  ;;  %1562 = vmatpush.bf16.msrb.mxu3 %v2840_v43 }
 0x75d   : > { %v1322_v47 = vpop.permute.xlu1 %1321 }
 0x75e   : > { %v1326_v48 = vsel %vm938_vm4, %v1325_v46, %v1322_v47 }
 0x75f   : > { %v1331_v49 = vpack.c.bf16 %v1326_v48, %v1326_v48 }
 0x761   : > { %2618 = vmatmul.msk.bf16.vlgmr.msra.gmra.mxu2 %vm667_vm0, %v1331_v49 }
 0x7e4   : > { %v1360_v51 = vpop.f32.mrf.mxu2 }
 0x7e5   : > { %v1361_v52 = vadd.f32 %v2907_v50, %v1360_v51 }
 0x7e7   : > { %v1364_v53 = vadd.f32 %v1361_v52, %v3333_v3 }
 0x7e9   : > { %v1365_v54 = vsel %vm667_vm0, %v1364_v53, 0.0 }
 0x7ea   : > { %1366 = vadd.xlane.f32.xlu0 %v1365_v54 }
 0x7ec   : > { %v1362_v55 = vpop.f32.mrf.mxu2 }
 0x85d   : > { %v1367_v56 = vpop.xlane.xlu0 %1366 }
 0x85e   : > { %v1368_v57 = vmul.f32 %v1367_v56, %v3300_v25 }
 0x860   : > { %v1369_v58 = vsub.f32 %v1364_v53, %v1368_v57 }
 0x862   : > { %v1370_v59 = vmul.f32 %v1369_v58, %v1369_v58 }
 0x864   : > { %v1371_v60 = vsel %vm667_vm0, %v1370_v59, 0.0 }
 0x865   : > { %1372 = vadd.xlane.f32.xlu2 %v1371_v60 }
 0x8d8   : > { %v1373_v2 = vpop.xlane.xlu2 %1372 }
 0x8d9   : > { %v1374_v3 = vmul.f32 %v1373_v2, %v3300_v25 }
 0x8db   : > { %v1375_v6 = vadd.f32 1e-05, %v1374_v3 }
 0x8dd   : > { %2953 = vrsqrt.f32 %v1375_v6  ;;  %vm1382_vm10 = vweird.f32 %v1375_v6 }
 0x8e3   : > { %v2954_v7 = vpop.eup %2953 }
 0x8e4   : > { %v1377_v10 = vmul.f32 %v2954_v7, %v1375_v6  ;;  %vm1383_vm9 = vweird.f32 %v2954_v7 }
 0x8e5   : > { %vm1384_vm11 = vmor %vm1382_vm10, %vm1383_vm9 }
 0x8e6   : > { %v1378_v12 = vmul.f32 %v2954_v7, %v1377_v10 }
 0x8e8   : > { %v1379_v13 = vmul.f32 0.5, %v1378_v12 }
 0x8ea   : > { %v1380_v14 = vsub.f32 1.5, %v1379_v13 }
 0x8ec   : > { %v1381_v15 = vmul.f32 %v2954_v7, %v1380_v14 }
 0x8ee   : > { %v1385_v16 = vsel %vm1384_vm11, %v2954_v7, %v1381_v15 }
 0x8ef   : > { %v1386_v17 = vmul.f32 %v1385_v16, %v1369_v58 }
 0x8f1   : > { %v1387_v18 = vmul.f32 %v3324_v62, %v1386_v17 }
 0x8f3   : > { %v1388_v19 = vadd.f32 %v3329_v0, %v1387_v18 }
 0x8f5   : > { %v1393_v20 = vpack.c.bf16 %v1388_v19, %v1388_v19 }
 0x8f7   : > { %2627 = vmatmul.msk.bf16.vlgmr.msrb.gmra.mxu0 %vm667_vm0, %v1393_v20 }
 0x974   : > { %v1422_v26 = vpop.f32.mrf.mxu0 }
 0x975   : > { %v1423_v27 = vadd.f32 %v2908_v24, %v1422_v26 }
 0x977   : > { %v1426_v28 = vmax.f32 %v1423_v27, 0.0 }
 0x979   : > { %v1443_v29 = vpack.c.bf16 %v1426_v28, %v1426_v28 }
 0x97b   : > { %1504 = vmatmul.bf16.vlgmr.msra.gmra.mxu1 %v1443_v29 }
 0x97c   : > { %v1424_v30 = vpop.f32.mrf.mxu0 }
 0x9f8   : > { %v1505_v32 = vpop.f32.mrf.mxu1 }
 0x9f9   : > { %v1506_v33 = vadd.f32 %v2909_v31, %v1505_v32 }
 0x9fb   : > { %v1509_v34 = vadd.f32 %v1506_v33, %v1388_v19 }
 0x9fd   : > { %v1510_v35 = vsel %vm667_vm0, %v1509_v34, 0.0 }
 0x9fe   : > { %1511 = vadd.xlane.f32.xlu1 %v1510_v35 }
 0xa00   : > { %v1507_v36 = vpop.f32.mrf.mxu1 }
 0xa71   : > { %v1512_v37 = vpop.xlane.xlu1 %1511 }
 0xa72   : > { %v1513_v38 = vmul.f32 %v1512_v37, %v3300_v25 }
 0xa74   : > { %v1514_v39 = vsub.f32 %v1509_v34, %v1513_v38 }
 0xa76   : > { %v1515_v40 = vmul.f32 %v1514_v39, %v1514_v39 }
 0xa78   : > { %v1516_v41 = vsel %vm667_vm0, %v1515_v40, 0.0 }
 0xa79   : > { %1517 = vadd.xlane.f32.xlu2 %v1516_v41 }
 0xaec   : > { %v1518_v44 = vpop.xlane.xlu2 %1517 }
 0xaed   : > { %v1519_v45 = vmul.f32 %v1518_v44, %v3300_v25 }
 0xaef   : > { %v1520_v46 = vadd.f32 1e-05, %v1519_v45 }
 0xaf1   : > { %2955 = vrsqrt.f32 %v1520_v46  ;;  %vm1527_vm13 = vweird.f32 %v1520_v46 }
 0xaf7   : > { %v2956_v47 = vpop.eup %2955 }
 0xaf8   : > { %v1522_v48 = vmul.f32 %v2956_v47, %v1520_v46  ;;  %vm1528_vm12 = vweird.f32 %v2956_v47 }
 0xaf9   : > { %vm1529_vm14 = vmor %vm1527_vm13, %vm1528_vm12 }
 0xafa   : > { %v1523_v49 = vmul.f32 %v2956_v47, %v1522_v48 }
 0xafc   : > { %v1524_v50 = vmul.f32 0.5, %v1523_v49 }
 0xafe   : > { %v1525_v51 = vsub.f32 1.5, %v1524_v50 }
 0xb00   : > { %v1526_v52 = vmul.f32 %v2956_v47, %v1525_v51 }
 0xb02   : > { %v1530_v53 = vsel %vm1529_vm14, %v2956_v47, %v1526_v52 }
 0xb03   : > { %v1531_v54 = vmul.f32 %v1530_v53, %v1514_v39 }
 0xb05   : > { %v1532_v55 = vmul.f32 %v3324_v62, %v1531_v54 }
 0xb07   : > { %v3423_v56 = vadd.f32 %v3329_v0, %v1532_v55 }
 0xb09   : > { %v1539_v57 = vpack.c.bf16 %v3423_v56, %v3423_v56 }
 0xb0b   : > { %2672 = vmatmul.msk.bf16.vlgmr.msrb.gmra.mxu3 %vm667_vm0, %v1539_v57 }
 0xb8e   : > { %v1564_v58 = vpop.f32.mrf.mxu3 }
 0xb8f   : > { %v3428_v59 = vpack.c.bf16 %v1564_v58, %v1564_v58 }
 0xb91   : > { %1628 = vrot.lane.b32.xlu2 %v3428_v59, %s3737_s30  ;;  %1570 = vrot.lane.b32.xlu0 %v3428_v59, %s3738_s26 }
 0xb96   : > { %v1566_v60 = vpop.f32.mrf.mxu3 }
 0xb99   : > { %1742 = vrot.lane.b32.xlu2 %v3428_v59, %s3734_s27  ;;  %1626 = vrot.lane.b32.xlu0 %v3428_v59, %s3739_s28 }
 0xba1   : > { %1684 = vrot.lane.b32.xlu2 %v3428_v59, %s3740_s20  ;;  %1744 = vrot.lane.b32.xlu0 %v3428_v59, %s3733_s19 }
 0xba9   : > { %1686 = vrot.lane.b32.xlu0 %v3428_v59, %s3741_s29 }
 0xbeb   : > { %v1629_v62 = vpop.permute.xlu2 %1628 }
 0xbec   : > { %v1634_v0 = vsel %vm688_vm1, %v1629_v62, 0 }
 0xbed   : > { %1643 = vmatpush.bf16.xpose.msra.mxu3 %v1634_v0 }
 0xbf3   : > { %v1743_v5 = vpop.permute.xlu2 %1742 }
 0xbfb   : > { %v1685_v40 = vpop.permute.xlu2 %1684 }
 0xc03   : > { %v1571_v61 = vpop.permute.xlu0 %1570 }
 0xc04   : > { %v1576_v63 = vsel %vm688_vm1, %v1571_v61, 0 }
 0xc05   : > { %1585 = vmatpush.bf16.xpose.msrb.mxu2 %v1576_v63 }
 0xc0b   : > { %v1627_v1 = vpop.permute.xlu0 %1626 }
 0xc0c   : > { %2673 = vmatmul.msk.bf16.vlgmr.msrb.gmra.mxu2 %vm688_vm1, %v3428_v59  ;;  %2675 = vmatmul.msk.bf16.vlgmr.msra.gmra.mxu3 %vm688_vm1, %v1627_v1 }
 0xc13   : > { %v1745_v2 = vpop.permute.xlu0 %1744 }
 0xc14   : > { %v1750_v3 = vsel %vm688_vm1, %v1745_v2, 0 }
 0xc15   : > { %1759 = vmatpush.bf16.xpose.msrb.mxu3 %v1750_v3 }
 0xc1b   : > { %v1687_v17 = vpop.permute.xlu0 %1686 }
 0xc1c   : > { %2679 = vmatmul.msk.bf16.vlgmr.msrb.gmra.mxu3 %vm688_vm1, %v1743_v5  ;;  %v1692_v38 = vsel %vm688_vm1, %v1687_v17, 0 }
 0xc8f   : > { %v1587_v6 = vpop.f32.mrf.mxu2  ;;  %v1645_v8 = vpop.f32.mrf.mxu3 }
 0xc90   : > { %v1591_v9 = vmul.f32 0.35355338, %v1587_v6  ;;  %v1649_v7 = vmul.f32 0.35355338, %v1645_v8 }
 0xc92   : > { %v1592_v10 = vmul.f32 %v1591_v9, %v3220_v23  ;;  %v1650_v11 = vmul.f32 %v1649_v7, %v3220_v23 }
 0xc94   : > { %v1593_v12 = vsel %vm688_vm1, %v1592_v10, -inf  ;;  %v1651_v13 = vsel %vm688_vm1, %v1650_v11, -inf }
 0xc95   : > { %1594 = vmax.xlane.f32.xlu1 %v1593_v12  ;;  %1652 = vmax.xlane.f32.xlu0 %v1651_v13  ;;  %v2845_v13 = vld [vmem:[%s3678_s6 + $0x18] sm:$0xff] }
 0xc97   : > { %v1589_v4 = vpop.f32.mrf.mxu2  ;;  %v1647_v14 = vpop.f32.mrf.mxu3 }
 0xc9f   : > { %v1761_v15 = vpop.f32.mrf.mxu3 }
 0xca0   : > { %v1765_v30 = vmul.f32 0.35355338, %v1761_v15 }
 0xca2   : > { %v1766_v31 = vmul.f32 %v1765_v30, %v3220_v23 }
 0xca4   : > { %v1767_v32 = vsel %vm688_vm1, %v1766_v31, -inf }
 0xca7   : > { %v1763_v16 = vpop.f32.mrf.mxu3 }
 0xca8   : > { %v2844_v16 = vld [vmem:[%s3678_s6 + $0x10] sm:$0xff] }
 0xd08   : > { %v1595_v18 = vpop.xlane.xlu1 %1594  ;;  %v1653_v19 = vpop.xlane.xlu0 %1652 }
 0xd09   : > { %v1596_v20 = vsub.f32 %v1592_v10, %v1595_v18  ;;  %v1654_v21 = vsub.f32 %v1650_v11, %v1653_v19  ;;  %v2697_v18 = vld [vmem:[%s3747_s18 + $0x8] sm:$0xff] }
 0xd0a   : > { %v1896_v19 = vpack.c.bf16 %v2697_v18, %v2697_v18 }
 0xd0b   : > { %v1597_v22 = vmul.f32 1.442695, %v1596_v20  ;;  %v1655_v24 = vmul.f32 1.442695, %v1654_v21 }
 0xd0d   : > { %2957 = vpow2.f32 %v1597_v22  ;;  %v2843_v22 = vld [vmem:[%s3676_s4 + $0x18] sm:$0xff] }
 0xd0e   : > { %2959 = vpow2.f32 %v1655_v24 }
 0xd13   : > { %v2958_v26 = vpop.eup %2957 }
 0xd14   : > { %v2960_v27 = vpop.eup %2959  ;;  %v1599_v28 = vsel %vm688_vm1, %v2958_v26, 0.0 }
 0xd15   : > { %1600 = vadd.xlane.f32.xlu1 %v1599_v28  ;;  %v1657_v29 = vsel %vm688_vm1, %v2960_v27, 0.0  ;;  %v2842_v28 = vld [vmem:[%s3676_s4 + $0x10] sm:$0xff] }
 0xd16   : > { %1658 = vadd.xlane.f32.xlu0 %v1657_v29 }
 0xd2e   : > { %1605 = vrot.lane.b32.xlu1 %v3428_v59, %s3742_s21  ;;  %s3745_s21 = smov 48  }
 0xd58   : > { %1768 = vmax.xlane.f32.xlu1 %v1767_v32 }
 0xd71   : > { %1663 = vrot.lane.b32.xlu1 %v3428_v59, %s3743_s1 }
 0xd88   : > { %v1601_v33 = vpop.xlane.xlu1 %1600 }
 0xd89   : > { %2961 = vrcp.f32 %v1601_v33  ;;  %v1659_v41 = vpop.xlane.xlu0 %1658 }
 0xd8a   : > { %2963 = vrcp.f32 %v1659_v41 }
 0xd8f   : > { %v2962_v34 = vpop.eup %2961 }
 0xd90   : > { %v1603_v35 = vmul.f32 %v2962_v34, %v2958_v26  ;;  %v2964_v43 = vpop.eup %2963 }
 0xd91   : > { %v1661_v44 = vmul.f32 %v2964_v43, %v2960_v27 }
 0xd92   : > { %v1604_v39 = vpack.c.bf16 %v1603_v35, %v1603_v35 }
 0xd93   : > { %v1662_v47 = vpack.c.bf16 %v1661_v44, %v1661_v44 }
 0xda0   : > { %v1606_v36 = vpop.permute.xlu1 %1605 }
 0xda1   : > { %v1611_v37 = vsel %vm732_vm2, %v1606_v36, 0 }
 0xda2   : > { %1620 = vmatpush.bf16.msra.mxu0 %v1611_v37 }
 0xda5   : > { %2674 = vmatmul.msk.bf16.vlgmr.msra.gmra.mxu0 %vm688_vm1, %v1604_v39 }
 0xda6   : > { %1701 = vmatpush.bf16.xpose.msrb.mxu0 %v1692_v38 }
 0xdae   : > { %1847 = vmatpush.bf16.msra.mxu0 %v2843_v22 }
 0xdb2   : > { %1848 = vmatpush.bf16.msra.mxu0 %v2842_v28 }
 0xdb5   : > { %2677 = vmatmul.msk.bf16.vlgmr.msrb.gmra.mxu0 %vm688_vm1, %v1685_v40 }
 0xdcb   : > { %v1769_v42 = vpop.xlane.xlu1 %1768 }
 0xdcc   : > { %v1770_v50 = vsub.f32 %v1766_v31, %v1769_v42 }
 0xdce   : > { %v1771_v51 = vmul.f32 1.442695, %v1770_v50 }
 0xdd0   : > { %2965 = vpow2.f32 %v1771_v51 }
 0xdd6   : > { %v2966_v58 = vpop.eup %2965 }
 0xdd7   : > { %v1773_v60 = vsel %vm688_vm1, %v2966_v58, 0.0 }
 0xde3   : > { %v1664_v45 = vpop.permute.xlu1 %1663 }
 0xde4   : > { %v1669_v46 = vsel %vm732_vm2, %v1664_v45, 0 }
 0xde5   : > { %1678 = vmatpush.bf16.msra.mxu2 %v1669_v46 }
 0xde8   : > { %2676 = vmatmul.msk.bf16.vlgmr.msra.gmra.mxu2 %vm688_vm1, %v1662_v47  ;;  %v2910_v47 = vld [vmem:[%s3677_s5 + $0x1] ss:$0 sm:$0xff] }
 0xe22   : > { %v3469_v48 = vpop.f32.mrf.mxu0 }
 0xe2a   : > { %v1624_v49 = vpop.f32.mrf.mxu0 }
 0xe32   : > { %v1703_v52 = vpop.f32.mrf.mxu0 }
 0xe33   : > { %v1707_v53 = vmul.f32 0.35355338, %v1703_v52 }
 0xe35   : > { %v1708_v54 = vmul.f32 %v1707_v53, %v3220_v23 }
 0xe37   : > { %v1709_v55 = vsel %vm688_vm1, %v1708_v54, -inf }
 0xe38   : > { %1710 = vmax.xlane.f32.xlu2 %v1709_v55 }
 0xe3a   : > { %v1705_v57 = vpop.f32.mrf.mxu0 }
 0xe40   : > { %1774 = vadd.xlane.f32.xlu2 %v1773_v60 }
 0xe58   : > { %1779 = vrot.lane.b32.xlu2 %v3428_v59, %s3744_s22 }
 0xe6b   : > { %v1680_v62 = vpop.f32.mrf.mxu2 }
 0xe6c   : > { %1801 = vrot.lane.b32.xlu1 %v1680_v62, %s3736_s23 }
 0xe73   : > { %v1682_v0 = vpop.f32.mrf.mxu2 }
 0xeab   : > { %v1711_v61 = vpop.xlane.xlu2 %1710 }
 0xeac   : > { %v1712_v63 = vsub.f32 %v1708_v54, %v1711_v61 }
 0xeae   : > { %v1713_v1 = vmul.f32 1.442695, %v1712_v63 }
 0xeb0   : > { %2967 = vpow2.f32 %v1713_v1 }
 0xeb3   : > { %v1775_v23 = vpop.xlane.xlu2 %1774 }
 0xeb4   : > { %2969 = vrcp.f32 %v1775_v23 }
 0xeb6   : > { %v2968_v2 = vpop.eup %2967 }
 0xeb7   : > { %v1715_v3 = vsel %vm688_vm1, %v2968_v2, 0.0 }
 0xeb8   : > { %1716 = vadd.xlane.f32.xlu0 %v1715_v3 }
 0xeba   : > { %v2970_v5 = vpop.eup %2969 }
 0xebb   : > { %v1777_v6 = vmul.f32 %v2970_v5, %v2966_v58  ;;  %v1780_v8 = vpop.permute.xlu2 %1779 }
 0xebc   : > { %v1785_v9 = vsel %vm732_vm2, %v1780_v8, 0 }
 0xebd   : > { %v1778_v7 = vpack.c.bf16 %v1777_v6, %v1777_v6  ;;  %1794 = vmatpush.bf16.msrb.mxu2 %v1785_v9 }
 0xec0   : > { %2680 = vmatmul.msk.bf16.vlgmr.msrb.gmra.mxu2 %vm688_vm1, %v1778_v7 }
 0xecc   : > { %1721 = vrot.lane.b32.xlu0 %v3428_v59, %s3745_s21  ;;  %s3746_s21 = smov 24  }
 0xede   : > { %v1802_v30 = vpop.permute.xlu1 %1801 }
 0xedf   : > { %v1812_v33 = vsel %vm688_vm1, %v3469_v48, %v1802_v30 }
 0xf2b   : > { %v1717_v10 = vpop.xlane.xlu0 %1716 }
 0xf2c   : > { %2971 = vrcp.f32 %v1717_v10 }
 0xf32   : > { %v2972_v11 = vpop.eup %2971 }
 0xf33   : > { %v1719_v12 = vmul.f32 %v2972_v11, %v2968_v2 }
 0xf35   : > { %v1720_v15 = vpack.c.bf16 %v1719_v12, %v1719_v12 }
 0xf3e   : > { %v1722_v4 = vpop.permute.xlu0 %1721 }
 0xf3f   : > { %v1727_v14 = vsel %vm732_vm2, %v1722_v4, 0 }
 0xf40   : > { %1736 = vmatpush.bf16.msrb.mxu1 %v1727_v14 }
 0xf43   : > { %2678 = vmatmul.msk.bf16.vlgmr.msrb.gmra.mxu1 %vm688_vm1, %v1720_v15  ;;  %v1796_v59 = vpop.f32.mrf.mxu2 }
 0xf44   : > { %1918 = vmatpush.bf16.msra.mxu1 %v2845_v13  ;;  %1809 = vrot.lane.b32.xlu2 %v1796_v59, %s3746_s21 }
 0xf48   : > { %1919 = vmatpush.bf16.msra.mxu1 %v2844_v16 }
 0xf4b   : > { %v1798_v17 = vpop.f32.mrf.mxu2 }
 0xf53   : > { %2710 = vmatmul.msk.bf16.vlgmr.msra.gmra.mxu1 %vm667_vm0, %v1896_v19 }
 0xf9e   : > { %v1810_v29 = vpop.permute.xlu2 %1809 }
 0xfc0   : > { %v1738_v20 = vpop.f32.mrf.mxu1 }
 0xfc1   : > { %1805 = vrot.lane.b32.xlu1 %v1738_v20, %s3735_s2 }
 0xfc8   : > { %v1740_v21 = vpop.f32.mrf.mxu1 }
 0xfd0   : > { %v1921_v24 = vpop.f32.mrf.mxu1 }
 0xfd1   : > { %v1959_v26 = vpack.c.bf16 %v1921_v24, %v1921_v24 }
 0xfd3   : > { %1961 = vrot.lane.b32.xlu1 %v1959_v26, %s3738_s26  ;;  %2017 = vrot.lane.b32.xlu2 %v1959_v26, %s3737_s30 }
 0xfd8   : > { %v1923_v27 = vpop.f32.mrf.mxu1 }
 0xfdb   : > { %2015 = vrot.lane.b32.xlu1 %v1959_v26, %s3739_s28  ;;  %2075 = vrot.lane.b32.xlu2 %v1959_v26, %s3741_s29 }
 0xfe3   : > { %2132 = vrot.lane.b32.xlu1 %v1959_v26, %s3733_s19  ;;  %2073 = vrot.lane.b32.xlu2 %v1959_v26, %s3740_s20 }
 0xfeb   : > { %2130 = vrot.lane.b32.xlu1 %v1959_v26, %s3734_s27 }
0x102d   : > { %v2018_v31 = vpop.permute.xlu2 %2017 }
0x102e   : > { %v2023_v32 = vsel %vm688_vm1, %v2018_v31, 0  ;;  %v2847_v31 = vld [vmem:[%s3679_s7 + $0x18] sm:$0xff] }
0x102f   : > { %2032 = vmatpush.bf16.xpose.msrb.mxu1 %v2023_v32  ;;  %1952 = vmatpush.bf16.msra.mxu3 %v2847_v31  ;;  %v2846_v32 = vld [vmem:[%s3679_s7 + $0x10] sm:$0xff] }
0x1033   : > { %v1806_v34 = vpop.permute.xlu1 %1805  ;;  %1953 = vmatpush.bf16.msra.mxu3 %v2846_v32 }
0x1034   : > { %v1813_v35 = vsel %vm936_vm3, %v1812_v33, %v1806_v34 }
0x1035   : > { %v1814_v36 = vsel %vm938_vm4, %v1813_v35, %v1810_v29  ;;  %v2076_v38 = vpop.permute.xlu2 %2075 }
0x1036   : > { %v1820_v37 = vpack.c.bf16 %v1814_v36, %v1814_v36  ;;  %v2081_v40 = vsel %vm688_vm1, %v2076_v38, 0 }
0x1038   : > { %2694 = vmatmul.msk.bf16.vlgmr.msra.gmra.mxu0 %vm667_vm0, %v1820_v37 }
0x103d   : > { %v2074_v45 = vpop.permute.xlu2 %2073 }
0x1045   : > { %v1962_v39 = vpop.permute.xlu1 %1961 }
0x1046   : > { %v1967_v41 = vsel %vm688_vm1, %v1962_v39, 0 }
0x1047   : > { %1976 = vmatpush.bf16.xpose.msra.mxu2 %v1967_v41 }
0x104d   : > { %v2016_v42 = vpop.permute.xlu1 %2015 }
0x104e   : > { %2724 = vmatmul.msk.bf16.vlgmr.msra.gmra.mxu2 %vm688_vm1, %v1959_v26  ;;  %2726 = vmatmul.msk.bf16.vlgmr.msrb.gmra.mxu1 %vm688_vm1, %v2016_v42  ;;  %v3552_v42 = vld [vmem:[%s3686_s14 + $0x1] ss:$0 sm:$0xff] }
0x104f   : > { %2090 = vmatpush.bf16.xpose.msrb.mxu2 %v2081_v40 }
0x1055   : > { %v2133_v43 = vpop.permute.xlu1 %2132 }
0x1056   : > { %v2138_v44 = vsel %vm688_vm1, %v2133_v43, 0 }
0x1057   : > { %2147 = vmatpush.bf16.xpose.msra.mxu1 %v2138_v44  ;;  %v3557_v44 = vld [vmem:[%s3687_s15 + $0x1] ss:$0 sm:$0xff] }
0x105d   : > { %v2131_v46 = vpop.permute.xlu1 %2130 }
0x105e   : > { %2730 = vmatmul.msk.bf16.vlgmr.msra.gmra.mxu1 %vm688_vm1, %v2131_v46  ;;  %2728 = vmatmul.msk.bf16.vlgmr.msrb.gmra.mxu2 %vm688_vm1, %v2074_v45 }
0x10b5   : > { %v1850_v48 = vpop.f32.mrf.mxu0 }
0x10b6   : > { %v1851_v49 = vadd.f32 %v2910_v47, %v1850_v48 }
0x10b8   : > { %v1854_v50 = vadd.f32 %v1851_v49, %v3423_v56 }
0x10ba   : > { %v1859_v51 = vsel %vm667_vm0, %v1854_v50, 0.0 }
0x10bb   : > { %1860 = vadd.xlane.f32.xlu0 %v1859_v51 }
0x10bd   : > { %v1852_v52 = vpop.f32.mrf.mxu0 }
0x10cb   : > { %v2034_v53 = vpop.f32.mrf.mxu1 }
0x10cc   : > { %v2038_v54 = vmul.f32 0.35355338, %v2034_v53 }
0x10ce   : > { %v2039_v55 = vsel %vm688_vm1, %v2038_v54, -inf }
0x10cf   : > { %2040 = vmax.xlane.f32.xlu1 %v2039_v55 }
0x10d1   : > { %v1978_v57 = vpop.f32.mrf.mxu2 }
0x10d2   : > { %v1982_v58 = vmul.f32 0.35355338, %v1978_v57 }
0x10d3   : > { %v2036_v60 = vpop.f32.mrf.mxu1 }
0x10d4   : > { %v1983_v62 = vsel %vm688_vm1, %v1982_v58, -inf }
0x10d5   : > { %1984 = vmax.xlane.f32.xlu0 %v1983_v62 }
0x10d9   : > { %v1980_v0 = vpop.f32.mrf.mxu2 }
0x10db   : > { %v2149_v61 = vpop.f32.mrf.mxu1 }
0x10dc   : > { %v2153_v63 = vmul.f32 0.35355338, %v2149_v61 }
0x10de   : > { %v2154_v56 = vsel %vm688_vm1, %v2153_v63, -inf }
0x10df   : > { %2155 = vmax.xlane.f32.xlu0 %v2154_v56 }
0x10e1   : > { %v2092_v1 = vpop.f32.mrf.mxu2 }
0x10e2   : > { %v2096_v23 = vmul.f32 0.35355338, %v2092_v1 }
0x10e3   : > { %v2151_v2 = vpop.f32.mrf.mxu1 }
0x10e4   : > { %v2097_v3 = vsel %vm688_vm1, %v2096_v23, -inf }
0x10e7   : > { %2098 = vmax.xlane.f32.xlu0 %v2097_v3 }
0x10e9   : > { %v2094_v5 = vpop.f32.mrf.mxu2 }
0x112e   : > { %v1861_v6 = vpop.xlane.xlu0 %1860 }
0x112f   : > { %v1862_v8 = vmul.f32 %v1861_v6, %v3300_v25 }
0x1131   : > { %v1863_v9 = vsub.f32 %v1854_v50, %v1862_v8 }
0x1133   : > { %v1864_v7 = vmul.f32 %v1863_v9, %v1863_v9 }
0x1135   : > { %v1865_v10 = vsel %vm667_vm0, %v1864_v7, 0.0 }
0x1136   : > { %1866 = vadd.xlane.f32.xlu2 %v1865_v10 }
0x1142   : > { %v2041_v11 = vpop.xlane.xlu1 %2040 }
0x1143   : > { %v2042_v12 = vsub.f32 %v2038_v54, %v2041_v11 }
0x1145   : > { %v2043_v13 = vmul.f32 1.442695, %v2042_v12 }
0x1147   : > { %2973 = vpow2.f32 %v2043_v13 }
0x1148   : > { %v1985_v4 = vpop.xlane.xlu0 %1984 }
0x1149   : > { %v1986_v14 = vsub.f32 %v1982_v58, %v1985_v4 }
0x114b   : > { %v1987_v15 = vmul.f32 1.442695, %v1986_v14 }
0x114d   : > { %v3532_v16 = vpop.eup %2973  ;;  %2975 = vpow2.f32 %v1987_v15 }
0x114e   : > { %v2045_v59 = vsel %vm688_vm1, %v3532_v16, 0.0 }
0x114f   : > { %2046 = vadd.xlane.f32.xlu0 %v2045_v59 }
0x1152   : > { %v2156_v17 = vpop.xlane.xlu0 %2155 }
0x1153   : > { %v2976_v18 = vpop.eup %2975  ;;  %v2157_v19 = vsub.f32 %v2153_v63, %v2156_v17 }
0x1154   : > { %v1989_v20 = vsel %vm688_vm1, %v2976_v18, 0.0 }
0x1155   : > { %v2158_v21 = vmul.f32 1.442695, %v2157_v19  ;;  %1990 = vadd.xlane.f32.xlu2 %v1989_v20  ;;  %v2848_v19 = vld [vmem:[%s3680_s8 + $0x10] sm:$0xff] }
0x1157   : > { %2977 = vpow2.f32 %v2158_v21 }
0x115a   : > { %v2099_v22 = vpop.xlane.xlu0 %2098 }
0x115b   : > { %v2100_v24 = vsub.f32 %v2096_v23, %v2099_v22 }
0x115d   : > { %v3537_v26 = vpop.eup %2977  ;;  %v2101_v27 = vmul.f32 1.442695, %v2100_v24 }
0x115e   : > { %v2160_v28 = vsel %vm688_vm1, %v3537_v26, 0.0 }
0x115f   : > { %2979 = vpow2.f32 %v2101_v27  ;;  %2161 = vadd.xlane.f32.xlu2 %v2160_v28 }
0x1165   : > { %v2980_v29 = vpop.eup %2979 }
0x1166   : > { %v2103_v30 = vsel %vm688_vm1, %v2980_v29, 0.0 }
0x1167   : > { %2104 = vadd.xlane.f32.xlu1 %v2103_v30 }
0x11a9   : > { %v1867_v33 = vpop.xlane.xlu2 %1866 }
0x11aa   : > { %v1868_v34 = vmul.f32 %v1867_v33, %v3300_v25 }
0x11ac   : > { %v1869_v35 = vadd.f32 1e-05, %v1868_v34 }
0x11ae   : > { %2981 = vrsqrt.f32 %v1869_v35  ;;  %vm1876_vm5 = vweird.f32 %v1869_v35 }
0x11b4   : > { %v2982_v36 = vpop.eup %2981 }
0x11b5   : > { %v1871_v37 = vmul.f32 %v2982_v36, %v1869_v35  ;;  %vm1877_vm15 = vweird.f32 %v2982_v36 }
0x11b6   : > { %vm1878_vm6 = vmor %vm1876_vm5, %vm1877_vm15 }
0x11b7   : > { %v1872_v38 = vmul.f32 %v2982_v36, %v1871_v37 }
0x11b9   : > { %v1873_v39 = vmul.f32 0.5, %v1872_v38 }
0x11bb   : > { %v1874_v40 = vsub.f32 1.5, %v1873_v39 }
0x11bd   : > { %v1875_v41 = vmul.f32 %v2982_v36, %v1874_v40  ;;  %v2851_v40 = vld [vmem:[%s3682_s10 + $0x18] sm:$0xff] }
0x11bf   : > { %v1879_v43 = vsel %vm1878_vm6, %v2982_v36, %v1875_v41  ;;  %v2850_v41 = vld [vmem:[%s3682_s10 + $0x10] sm:$0xff] }
0x11c0   : > { %v1880_v45 = vmul.f32 %v1879_v43, %v1863_v9  ;;  %v2859_v43 = vld [vmem:[%s3684_s12 + $0x78] sm:$0xff] }
0x11c1   : > { %2377 = vmatpush.bf16.msrb.mxu1 %v2859_v43 }
0x11c2   : > { %v1884_v46 = vmul.f32 %v3552_v42, %v1880_v45  ;;  %v2047_v60 = vpop.xlane.xlu0 %2046 }
0x11c4   : > { %v3561_v47 = vadd.f32 %v3557_v44, %v1884_v46 }
0x11c6   : > { %v1930_v48 = vpack.c.bf16 %v3561_v47, %v3561_v47 }
0x11c8   : > { %2723 = vmatmul.msk.bf16.vlgmr.msra.gmra.mxu3 %vm667_vm0, %v1930_v48  ;;  %v1991_v49 = vpop.xlane.xlu2 %1990 }
0x11c9   : > { %2983 = vrcp.f32 %v1991_v49  ;;  %v2857_v49 = vld [vmem:[%s3684_s12 + $0x68] sm:$0xff] }
0x11cf   : > { %v2984_v50 = vpop.eup %2983 }
0x11d0   : > { %v1993_v52 = vmul.f32 %v2984_v50, %v2976_v18  ;;  %v2849_v18 = vld [vmem:[%s3680_s8 + $0x18] sm:$0xff]  ;;  %v2856_v50 = vld [vmem:[%s3684_s12 + $0x60] sm:$0xff] }
0x11d1   : > { %2234 = vmatpush.bf16.msra.mxu2 %v2849_v18  ;;  %v2861_v18 = vld [vmem:[%s3688_s16 + $0x8] sm:$0xff] }
0x11d2   : > { %v1994_v55 = vpack.c.bf16 %v1993_v52, %v1993_v52  ;;  %v2162_v62 = vpop.xlane.xlu2 %2161 }
0x11d5   : > { %2235 = vmatpush.bf16.msra.mxu2 %v2848_v19  ;;  %v2860_v19 = vld [vmem:[%s3688_s16] sm:$0xff] }
0x11da   : > { %v2105_v58 = vpop.xlane.xlu1 %2104 }
0x11db   : > { %2985 = vrcp.f32 %v2105_v58 }
0x11dc   : > { %2987 = vrcp.f32 %v2047_v60 }
0x11dd   : > { %2989 = vrcp.f32 %v2162_v62 }
0x11e1   : > { %v2986_v0 = vpop.eup %2985 }
0x11e2   : > { %v2988_v61 = vpop.eup %2987  ;;  %v2107_v63 = vmul.f32 %v2986_v0, %v2980_v29  ;;  %v2913_v29 = vld [vmem:[%s3681_s9 + $0x1] ss:$0 sm:$0xff] }
0x11e3   : > { %v2049_v56 = vmul.f32 %v2988_v61, %v3532_v16  ;;  %v2990_v7 = vpop.eup %2989 }
0x11e4   : > { %v2108_v6 = vpack.c.bf16 %v2107_v63, %v2107_v63  ;;  %v2164_v11 = vmul.f32 %v2990_v7, %v3537_v26  ;;  %v2915_v7 = vld [vmem:[%s3685_s13 + $0x1] ss:$0 sm:$0xff] }
0x11e5   : > { %v2050_v9 = vpack.c.bf16 %v2049_v56, %v2049_v56 }
0x11e6   : > { %v2165_v12 = vpack.c.bf16 %v2164_v11, %v2164_v11 }
0x124b   : > { %v1955_v51 = vpop.f32.mrf.mxu3 }
0x124c   : > { %v1995_v53 = vpack.c.bf16 %v1955_v51, %v1955_v51 }
0x124e   : > { %2109 = vrot.lane.b32.xlu1 %v1995_v53, %s3740_s20  ;;  %2166 = vrot.lane.b32.xlu2 %v1995_v53, %s3734_s27  ;;  %v2000_v54 = vsel %vm732_vm2, %v1995_v53, 0 }
0x124f   : > { %2052 = vrot.lane.b32.xlu0 %v1995_v53, %s3739_s28  ;;  %2009 = vmatpush.bf16.msrb.mxu0 %v2000_v54  ;;  %v2855_v53 = vld [vmem:[%s3684_s12 + $0x58] sm:$0xff] }
0x1252   : > { %2725 = vmatmul.msk.bf16.vlgmr.msrb.gmra.mxu0 %vm688_vm1, %v1994_v55 }
0x1253   : > { %v1957_v57 = vpop.f32.mrf.mxu3 }
0x1254   : > { %v2854_v57 = vld [vmem:[%s3684_s12 + $0x50] sm:$0xff] }
0x12a8   : > { %v2167_v1 = vpop.permute.xlu2 %2166 }
0x12a9   : > { %v2172_v8 = vsel %vm732_vm2, %v2167_v1, 0  ;;  %v2853_v1 = vld [vmem:[%s3684_s12 + $0x48] sm:$0xff] }
0x12c0   : > { %v2110_v23 = vpop.permute.xlu1 %2109 }
0x12c1   : > { %v2115_v2 = vsel %vm732_vm2, %v2110_v23, 0  ;;  %v2053_v3 = vpop.permute.xlu0 %2052  ;;  %v2852_v23 = vld [vmem:[%s3684_s12 + $0x40] sm:$0xff] }
0x12c2   : > { %v2058_v5 = vsel %vm732_vm2, %v2053_v3, 0  ;;  %2124 = vmatpush.bf16.msra.mxu0 %v2115_v2  ;;  %v2914_v2 = vld [vmem:[%s3683_s11 + $0x1] ss:$0 sm:$0xff] }
0x12c3   : > { %2067 = vmatpush.bf16.msrb.mxu3 %v2058_v5 }
0x12c5   : > { %2729 = vmatmul.msk.bf16.vlgmr.msra.gmra.mxu0 %vm688_vm1, %v2108_v6 }
0x12c6   : > { %2727 = vmatmul.msk.bf16.vlgmr.msrb.gmra.mxu3 %vm688_vm1, %v2050_v9  ;;  %2298 = vmatpush.bf16.msrb.mxu0 %v2851_v40 }
0x12c7   : > { %2181 = vmatpush.bf16.msra.mxu3 %v2172_v8 }
0x12ca   : > { %2299 = vmatpush.bf16.msrb.mxu0 %v2850_v41 }
0x12cb   : > { %2445 = vmatpush.bf16.msrb.mxu3 %v2861_v18 }
0x12cf   : > { %v2011_v10 = vpop.f32.mrf.mxu0  ;;  %2446 = vmatpush.bf16.msrb.mxu3 %v2860_v19 }
0x12d6   : > { %2731 = vmatmul.msk.bf16.vlgmr.msra.gmra.mxu3 %vm688_vm1, %v2165_v12 }
0x12d7   : > { %v2013_v13 = vpop.f32.mrf.mxu0 }
0x1342   : > { %v2126_v4 = vpop.f32.mrf.mxu0 }
0x1343   : > { %2192 = vrot.lane.b32.xlu0 %v2126_v4, %s3735_s2 }
0x1349   : > { %v2069_v14 = vpop.f32.mrf.mxu3 }
0x134a   : > { %v2128_v15 = vpop.f32.mrf.mxu0 }
0x134b   : > { %2188 = vrot.lane.b32.xlu0 %v2069_v14, %s3736_s23 }
0x1351   : > { %v2071_v16 = vpop.f32.mrf.mxu3 }
0x1359   : > { %v2183_v59 = vpop.f32.mrf.mxu3 }
0x135a   : > { %2196 = vrot.lane.b32.xlu0 %v2183_v59, %s3746_s21  ;;  %s3748_s21 = sld [smem:[#allocation10_spill]] }
0x1360   : > { %s646_s25 = scalar_lea.vmem %s3748_s21, %s3180_s24 }
0x1361   : > { %v2185_v17 = vpop.f32.mrf.mxu3 }
0x13b5   : > { %v2193_v20 = vpop.permute.xlu0 %2192 }
0x13bd   : > { %v2189_v21 = vpop.permute.xlu0 %2188 }
0x13be   : > { %v2199_v22 = vsel %vm688_vm1, %v2011_v10, %v2189_v21 }
0x13bf   : > { %v2200_v24 = vsel %vm936_vm3, %v2199_v22, %v2193_v20 }
0x13cc   : > { %v2197_v26 = vpop.permute.xlu0 %2196 }
0x13cd   : > { %v2201_v27 = vsel %vm938_vm4, %v2200_v24, %v2197_v26 }
0x13ce   : > { %v2207_v28 = vpack.c.bf16 %v2201_v27, %v2201_v27 }
0x13d0   : > { %2745 = vmatmul.msk.bf16.vlgmr.msra.gmra.mxu2 %vm667_vm0, %v2207_v28 }
0x1453   : > { %v2237_v30 = vpop.f32.mrf.mxu2 }
0x1454   : > { %v2238_v31 = vadd.f32 %v2913_v29, %v2237_v30 }
0x1456   : > { %v2241_v32 = vadd.f32 %v2238_v31, %v3561_v47  ;;  %v2858_v47 = vld [vmem:[%s3684_s12 + $0x70] sm:$0xff] }
0x1457   : > { %2378 = vmatpush.bf16.msrb.mxu1 %v2858_v47 }
0x1458   : > { %v2242_v33 = vsel %vm667_vm0, %v2241_v32, 0.0 }
0x1459   : > { %2243 = vadd.xlane.f32.xlu2 %v2242_v33 }
0x145b   : > { %v2239_v34 = vpop.f32.mrf.mxu2  ;;  %2379 = vmatpush.bf16.msrb.mxu1 %v2857_v49 }
0x145f   : > { %2380 = vmatpush.bf16.msrb.mxu1 %v2856_v50 }
0x1463   : > { %2381 = vmatpush.bf16.msrb.mxu1 %v2855_v53 }
0x1467   : > { %2382 = vmatpush.bf16.msrb.mxu1 %v2854_v57 }
0x146b   : > { %2383 = vmatpush.bf16.msrb.mxu1 %v2853_v1 }
0x146f   : > { %2384 = vmatpush.bf16.msrb.mxu1 %v2852_v23 }
0x14cc   : > { %v2244_v35 = vpop.xlane.xlu2 %2243 }
0x14cd   : > { %v2245_v36 = vmul.f32 %v2244_v35, %v3300_v25 }
0x14cf   : > { %v2246_v37 = vsub.f32 %v2241_v32, %v2245_v36 }
0x14d1   : > { %v2247_v38 = vmul.f32 %v2246_v37, %v2246_v37 }
0x14d3   : > { %v2248_v39 = vsel %vm667_vm0, %v2247_v38, 0.0 }
0x14d4   : > { %2249 = vadd.xlane.f32.xlu1 %v2248_v39 }
0x1547   : > { %v2250_v45 = vpop.xlane.xlu1 %2249 }
0x1548   : > { %v2251_v46 = vmul.f32 %v2250_v45, %v3300_v25 }
0x154a   : > { %v2252_v48 = vadd.f32 1e-05, %v2251_v46 }
0x154c   : > { %2991 = vrsqrt.f32 %v2252_v48  ;;  %vm2259_vm2 = vweird.f32 %v2252_v48 }
0x1552   : > { %v2992_v51 = vpop.eup %2991 }
0x1553   : > { %v2254_v52 = vmul.f32 %v2992_v51, %v2252_v48  ;;  %vm2260_vm1 = vweird.f32 %v2992_v51 }
0x1554   : > { %vm2261_vm4 = vmor %vm2259_vm2, %vm2260_vm1 }
0x1555   : > { %v2255_v54 = vmul.f32 %v2992_v51, %v2254_v52 }
0x1557   : > { %v2256_v55 = vmul.f32 0.5, %v2255_v54 }
0x1559   : > { %v2257_v58 = vsub.f32 1.5, %v2256_v55 }
0x155b   : > { %v2258_v60 = vmul.f32 %v2992_v51, %v2257_v58 }
0x155d   : > { %v2262_v62 = vsel %vm2261_vm4, %v2992_v51, %v2258_v60 }
0x155e   : > { %v2263_v0 = vmul.f32 %v2262_v62, %v2246_v37 }
0x1560   : > { %v2264_v61 = vmul.f32 %v3552_v42, %v2263_v0 }
0x1562   : > { %v2265_v63 = vadd.f32 %v3557_v44, %v2264_v61 }
0x1564   : > { %v2271_v56 = vpack.c.bf16 %v2265_v63, %v2265_v63 }
0x1566   : > { %2759 = vmatmul.msk.bf16.vlgmr.msrb.gmra.mxu0 %vm667_vm0, %v2271_v56 }
0x15e3   : > { %v2301_v3 = vpop.f32.mrf.mxu0 }
0x15e4   : > { %v2302_v5 = vadd.f32 %v2914_v2, %v2301_v3 }
0x15e6   : > { %v2305_v6 = vmax.f32 %v2302_v5, 0.0 }
0x15e8   : > { %v2323_v8 = vpack.c.bf16 %v2305_v6, %v2305_v6 }
0x15ea   : > { %2385 = vmatmul.bf16.vlgmr.msrb.gmra.mxu1 %v2323_v8 }
0x15eb   : > { %v2303_v9 = vpop.f32.mrf.mxu0 }
0x1667   : > { %v2386_v10 = vpop.f32.mrf.mxu1 }
0x1668   : > { %v2387_v11 = vadd.f32 %v2915_v7, %v2386_v10 }
0x166a   : > { %v2390_v12 = vadd.f32 %v2387_v11, %v2265_v63 }
0x166c   : > { %v2391_v13 = vsel %vm667_vm0, %v2390_v12, 0.0 }
0x166d   : > { %2392 = vadd.xlane.f32.xlu0 %v2391_v13 }
0x166f   : > { %v2388_v4 = vpop.f32.mrf.mxu1 }
0x16e0   : > { %v2393_v14 = vpop.xlane.xlu0 %2392 }
0x16e1   : > { %v2394_v15 = vmul.f32 %v2393_v14, %v3300_v25 }
0x16e3   : > { %v2395_v16 = vsub.f32 %v2390_v12, %v2394_v15 }
0x16e5   : > { %v2396_v59 = vmul.f32 %v2395_v16, %v2395_v16 }
0x16e7   : > { %v2397_v17 = vsel %vm667_vm0, %v2396_v59, 0.0 }
0x16e8   : > { %2398 = vadd.xlane.f32.xlu2 %v2397_v17 }
0x175b   : > { %v2399_v20 = vpop.xlane.xlu2 %2398 }
0x175c   : > { %v2400_v21 = vmul.f32 %v2399_v20, %v3300_v25  ;;  %v2916_v25 = vld [vmem:[%s3689_s17] ss:$0 sm:$0xff] }
0x175e   : > { %v2401_v22 = vadd.f32 1e-05, %v2400_v21 }
0x1760   : > { %2993 = vrsqrt.f32 %v2401_v22  ;;  %vm2408_vm8 = vweird.f32 %v2401_v22 }
0x1766   : > { %v2994_v24 = vpop.eup %2993 }
0x1767   : > { %v2403_v26 = vmul.f32 %v2994_v24, %v2401_v22  ;;  %vm2409_vm7 = vweird.f32 %v2994_v24 }
0x1768   : > { %vm2410_vm9 = vmor %vm2408_vm8, %vm2409_vm7 }
0x1769   : > { %v2404_v27 = vmul.f32 %v2994_v24, %v2403_v26 }
0x176b   : > { %v2405_v28 = vmul.f32 0.5, %v2404_v27 }
0x176d   : > { %v2406_v29 = vsub.f32 1.5, %v2405_v28 }
0x176f   : > { %v2407_v30 = vmul.f32 %v2994_v24, %v2406_v29 }
0x1771   : > { %v2411_v31 = vsel %vm2410_vm9, %v2994_v24, %v2407_v30 }
0x1772   : > { %v2412_v32 = vmul.f32 %v2411_v31, %v2395_v16 }
0x1774   : > { %v2413_v33 = vmul.f32 %v3552_v42, %v2412_v32 }
0x1776   : > { %v2414_v34 = vadd.f32 %v3557_v44, %v2413_v33 }
0x1778   : > { %v2419_v35 = vpack.c.bf16 %v2414_v34, %v2414_v34 }
0x177a   : > { %2817 = vmatmul.msk.bf16.vlgmr.msrb.gmra.mxu3 %vm667_vm0, %v2419_v35 }
0x17fd   : > { %v2448_v36 = vpop.f32.mrf.mxu3 }
0x17fe   : > { %v2449_v37 = vadd.f32 %v2916_v25, %v2448_v36 }
0x1800   : > { %v2452_v38 = vsel %vm936_vm3, %v2449_v37, -inf }
0x1801   : > { %2453 = vmax.xlane.f32.xlu1 %v2452_v38 }
0x1805   : > { %v2450_v39 = vpop.f32.mrf.mxu3 }
0x1874   : > { %v2454_v40 = vpop.xlane.xlu1 %2453 }
0x1875   : > { %v2455_v41 = vsub.f32 %v2449_v37, %v2454_v40 }
0x1877   : > { %v2456_v43 = vmul.f32 1.442695, %v2455_v41 }
0x1879   : > { %2995 = vpow2.f32 %v2456_v43 }
0x187f   : > { %v2996_v42 = vpop.eup %2995 }
0x1880   : > { %v2458_v44 = vsel %vm936_vm3, %v2996_v42, 0.0 }
0x1881   : > { %2459 = vadd.xlane.f32.xlu0 %v2458_v44 }
0x18f4   : > { %v2460_v45 = vpop.xlane.xlu0 %2459 }
0x18f5   : > { %2997 = vrcp.f32 %v2460_v45 }
0x18fb   : > { %v2998_v46 = vpop.eup %2997 }
0x18fc   : > { %v2462_v47 = vmul.f32 %v2998_v46, %v2996_v42 }
0x18fe   : > { %2463 = vst.msk [vmem:[%s646_s25] sm:$0xff] %vm936_vm3, %v2462_v47 }
0x18ff PF: > { %s3749_s29 = sld [smem:[#allocation4_spill]] }
0x1900   : > { %s3750_s27 = sld [smem:[#allocation3_spill]] }
0x1901   : > { %s3751_s28 = sld [smem:[#allocation5_spill]] }
0x1905   : > { %p25_p9 = scmp.ge.s32.totalorder %s3749_s29, 4  }
0x1907   :  { %27 = sbr.rel (!%p25_p9) target bundleno = 8 (0x8), region = 185 }

</bundles_post_ra>
